<compile_context>
chip_gen: v5e
topology: v5e:2x2
jax: 0.10.0
libtpu: 0.0.40
codegen_flags: <defaults>
</compile_context>

<pallas_src>
import math

import jax
import jax.numpy as jnp
import numpy as np
from jax.experimental import pallas as pl
from jax.experimental.pallas import tpu as pltpu


# ----------------------------------------------------------------------------
# deterministic Gaussian window (matches PyTorch create_window / gaussian)
# ----------------------------------------------------------------------------
def gaussian_1d(window_size: int, sigma: float) -> np.ndarray:
    g = np.array(
        [math.exp(-((x - window_size // 2) ** 2) / float(2 * sigma**2))
         for x in range(window_size)],
        dtype=np.float64,
    )
    return (g / g.sum()).astype(np.float32)


def _round_up(x: int, m: int) -> int:
    return (x + m - 1) // m * m


def _toeplitz_same(win: np.ndarray, n: int, n_pad: int) -> np.ndarray:
    """(n_pad x n_pad) matrix M with (M @ x)[i] = sum_t w[t]*x[i+t-p] for i < n
    ('same' zero-padded cross-correlation); rows i >= n are exactly zero."""
    k = len(win)
    p = k // 2
    m = np.zeros((n_pad, n_pad), dtype=np.float32)
    for i in range(n):
        for t in range(k):
            j = i + t - p
            if 0 <= j < n:
                m[i, j] = float(win[t])
    return m


def _band_matrix(win: np.ndarray, tw: int, kw: int, halo: int) -> np.ndarray:
    """Shift-invariant band slab B (kw x tw) such that, for an input slab that
    starts `halo` columns before the output tile,
        out[:, c] = (in_slab @ B)[:, c] = sum_t w[t] * in_slab[:, halo + c + t - p].
    The same slab serves every W tile because the 'same' zero padding is baked
    into the host-side halo zero columns."""
    k = len(win)
    p = k // 2
    b = np.zeros((kw, tw), dtype=np.float32)
    for c in range(tw):
        for t in range(k):
            b[halo + c + t - p, c] = float(win[t])
    return b


# ----------------------------------------------------------------------------
# Pallas kernel factory: one batch of P planes per grid step
# ----------------------------------------------------------------------------
def _make_ssim_kernel(*, P, H, W, H_a, W_in, W_out, TW, KW, n_w_tiles,
                      mu_bf16, approx_recip):
    C1 = 0.01**2
    C2 = 0.03**2
    M = P * H_a  # rows of the flattened (P*H_a, W) plane batch

    def blur(x2d, t_blk, band):
        # W direction: band-tiled 'same' blur via the MXU band slab.  The slab
        # is the same for every tile (halo zero-padding handles the edges).
        parts = [
            jnp.dot(x2d[:, j * TW: j * TW + KW], band,
                    preferred_element_type=jnp.float32)
            for j in range(n_w_tiles)
        ]
        yw = parts[0] if n_w_tiles == 1 else jnp.concatenate(parts, axis=1)
        # keep MXU operands in the same dtype as the weights (bf16 fast path)
        yw = yw.astype(band.dtype)
        # H direction: block-diagonal 'same' Toeplitz (one matmul for all P
        # planes, zero rows beyond H -> padded rows stay exactly zero).
        return jnp.dot(t_blk, yw, preferred_element_type=jnp.float32)

    def kernel(*refs):
        if mu_bf16:
            th_f_ref, bw_f_ref, th_b_ref, bw_b_ref, i1_ref, i2_ref, out_ref = refs
        else:
            th_f_ref, bw_f_ref, i1_ref, i2_ref, out_ref = refs

        x1 = i1_ref[...].astype(jnp.float32).reshape(M, W_in)
        x2 = i2_ref[...].astype(jnp.float32).reshape(M, W_in)

        t_f = th_f_ref[...]
        b_f = bw_f_ref[...]

        if mu_bf16:
            # bf16 MXU operands, f32 accumulation (review item); second-moment
            # blurs stay f32 to avoid sigma = E[x^2]-mu^2 cancellation.
            t_b = th_b_ref[...]
            b_b = bw_b_ref[...]
            mu1 = blur(x1.astype(jnp.bfloat16), t_b, b_b)
            mu2 = blur(x2.astype(jnp.bfloat16), t_b, b_b)
        else:
            mu1 = blur(x1, t_f, b_f)
            mu2 = blur(x2, t_f, b_f)

        e11 = blur(x1 * x1, t_f, b_f)
        e22 = blur(x2 * x2, t_f, b_f)
        e12 = blur(x1 * x2, t_f, b_f)

        mu1_sq = mu1 * mu1
        mu2_sq = mu2 * mu2
        mu1_mu2 = mu1 * mu2
        sigma1_sq = e11 - mu1_sq
        sigma2_sq = e22 - mu2_sq
        sigma12 = e12 - mu1_mu2

        num = (2.0 * mu1_mu2 + C1) * (2.0 * sigma12 + C2)
        den = (mu1_sq + mu2_sq + C1) * (sigma1_sq + sigma2_sq + C2)
        if approx_recip:
            ssim_map = num * pl.reciprocal(den, approx=True)   # free EUP slot
        else:
            ssim_map = num / den                                # exact path

        # Spatial reduction per plane.  Only the structurally-needed masks are
        # built (once per P-plane step -> amortised by the batching).
        m3 = ssim_map.reshape(P, H_a, W_out)
        if W_out != W:
            col = jax.lax.broadcasted_iota(jnp.int32, (P, H_a, W_out), 2)
            m3 = jnp.where(col < W, m3, 0.0)
        if H_a != H:
            row = jax.lax.broadcasted_iota(jnp.int32, (P, H_a, W_out), 1)
            m3 = jnp.where(row < H, m3, 0.0)

        s = jnp.sum(m3, axis=2)                      # (P, H_a)  lane reduce
        s = jnp.sum(s, axis=1, keepdims=True)        # (P, 1)
        # lane-dense, unmasked store of the P per-plane sums
        out_ref[...] = jnp.broadcast_to(s, (P, 128))

    return kernel


# ----------------------------------------------------------------------------
# wrapper (equivalent to SSIM().forward(img1, img2))
# ----------------------------------------------------------------------------
def ssim_pallas(img1, img2, window_size: int = 11, size_average: bool = True,
                precise: bool = False):
    assert img1.shape == img2.shape and img1.ndim == 4
    B, C, H, W = img1.shape
    BC = B * C
    pad = window_size // 2
    assert pad <= 128, "window halo must fit inside one 128-lane block"

    # sublane alignment depends on the HBM dtype (8 for f32, 16 for bf16, ...)
    itemsize = jnp.dtype(img1.dtype).itemsize
    sub = {4: 8, 2: 16, 1: 32}.get(itemsize, 8)
    H_a = _round_up(H, sub)

    # W tiling: 128-multiple tiles, capped at 512 (v5e-friendly per review)
    W_a = _round_up(W, 128)
    TW = min(512, W_a)
    n_w_tiles = -(-W_a // TW)
    W_out = n_w_tiles * TW
    halo = 128
    KW = TW + 2 * halo          # rows of the band slab / width of input slab
    W_in = W_out + 2 * halo     # stored plane width (zero halo on both sides)

    mu_bf16 = not precise
    approx_recip = not precise

    # per-generation VMEM limit (~112 MiB v5e/v6e, ~52 MiB v7x, safe fallback)
    try:
        cap = int(getattr(pltpu.get_tpu_info(), "vmem_capacity_bytes",
                          64 * 1024 * 1024))
    except Exception:
        cap = 64 * 1024 * 1024
    vmem_limit = max(32 * 2**20, min(cap - 12 * 2**20, 112 * 2**20))

    # planes per grid step: fill the MXU M dimension (~128 rows), keep at
    # least 2 grid steps when possible (megacore), respect a VMEM budget.
    P = max(1, -(-128 // H_a))
    P = min(P, 16, BC)
    if BC >= 2 and -(-BC // P) < 2:
        P = -(-BC // 2)

    def step_bytes(p):
        m = p * H_a
        mats = (m * m + KW * TW) * 4 * (2 if mu_bf16 else 1)
        return (4 * p * H_a * W_in * 4      # 2 inputs, double buffered
                + 8 * m * W_out * 4         # 5 blurred maps + temps
                + 3 * m * W_in * 4          # x1, x2, products
                + mats)

    while P > 1 and step_bytes(P) > 0.6 * vmem_limit:
        P -= 1
    n_steps = -(-BC // P)
    BC_pad = n_steps * P
    M = P * H_a

    # blur matrices (built once on the host)
    win = gaussian_1d(window_size, 1.5)
    t_h = _toeplitz_same(win, H, H_a)                      # (H_a, H_a)
    t_blk = np.kron(np.eye(P, dtype=np.float32), t_h)      # (M, M) block-diag
    band = _band_matrix(win, TW, KW, halo)                 # (KW, TW)

    th_f = jnp.asarray(t_blk)
    bw_f = jnp.asarray(band)
    mat_ops = [th_f, bw_f]
    mat_shapes = [(M, M), (KW, TW)]
    if mu_bf16:
        mat_ops += [th_f.astype(jnp.bfloat16), bw_f.astype(jnp.bfloat16)]
        mat_shapes += [(M, M), (KW, TW)]

    def prep(x):
        x = x.reshape(BC, H, W)
        # fake planes (BC padding) + row alignment + 128-lane zero halos; the
        # kernel upcasts to f32, so the HBM dtype is untouched.
        return jnp.pad(
            x, ((0, BC_pad - BC), (0, H_a - H), (halo, W_in - halo - W)))

    i1 = prep(img1)
    i2 = prep(img2)

    kernel = _make_ssim_kernel(
        P=P, H=H, W=W, H_a=H_a, W_in=W_in, W_out=W_out, TW=TW, KW=KW,
        n_w_tiles=n_w_tiles, mu_bf16=mu_bf16, approx_recip=approx_recip)

    plane_spec = pl.BlockSpec((P, H_a, W_in), lambda i: (i, 0, 0))
    out_spec = pl.BlockSpec((None, P, 128), lambda i: (i, 0, 0))
    out_shape = jax.ShapeDtypeStruct((n_steps, P, 128), jnp.float32)
    cparams = pltpu.CompilerParams(
        # TODO(synk): pltpu.CORE_PARALLEL on v7x for its two TensorCores.
        dimension_semantics=("parallel",),
        vmem_limit_bytes=int(vmem_limit),
    )

    def run(single_buffer: bool):
        if single_buffer:
            # grid-invariant matrices: no double buffering (review item)
            mspecs = [pl.BlockSpec(s, lambda i: (0, 0),
                                   pipeline_mode=pl.Buffered(1))
                      for s in mat_shapes]
        else:
            mspecs = [pl.BlockSpec(s, lambda i: (0, 0)) for s in mat_shapes]
        return pl.pallas_call(
            kernel,
            out_shape=out_shape,
            grid=(n_steps,),
            in_specs=mspecs + [plane_spec, plane_spec],
            out_specs=out_spec,
            compiler_params=cparams,
        )(*mat_ops, i1, i2)

    try:
        sums = run(True)
    except Exception:
        # fallback if this runtime rejects Buffered(1)
        sums = run(False)

    plane_sums = sums.reshape(BC_pad, 128)[:BC, 0].reshape(B, C)
    if size_average:
        return jnp.sum(plane_sums) / (B * C * H * W)
    # matches ssim_map.mean(1).mean(1).mean(1): per-batch mean over C, H, W
    return jnp.sum(plane_sums, axis=1) / (C * H * W)


# ----------------------------------------------------------------------------
# pure-JAX reference (for a correctness self-check)
# ----------------------------------------------------------------------------
def ssim_reference(img1, img2, window_size: int = 11, size_average: bool = True):
    B, C, H, W = img1.shape
    pad = window_size // 2
    w1d = jnp.asarray(gaussian_1d(window_size, 1.5))
    w2d = jnp.outer(w1d, w1d)
    win = jnp.tile(w2d[None, None], (C, 1, 1, 1))  # (C,1,k,k) depthwise

    def conv(x):
        return jax.lax.conv_general_dilated(
            x, win, window_strides=(1, 1), padding=[(pad, pad), (pad, pad)],
            dimension_numbers=("NCHW", "OIHW", "NCHW"), feature_group_count=C,
            precision=jax.lax.Precision.HIGHEST)

    mu1, mu2 = conv(img1), conv(img2)
    mu1_sq, mu2_sq, mu1_mu2 = mu1 * mu1, mu2 * mu2, mu1 * mu2
    sigma1_sq = conv(img1 * img1) - mu1_sq
    sigma2_sq = conv(img2 * img2) - mu2_sq
    sigma12 = conv(img1 * img2) - mu1_mu2
    C1, C2 = 0.01**2, 0.03**2
    ssim_map = ((2 * mu1_mu2 + C1) * (2 * sigma12 + C2)
                / ((mu1_sq + mu2_sq + C1) * (sigma1_sq + sigma2_sq + C2)))
    if size_average:
        return ssim_map.mean()
    return ssim_map.mean(axis=(1, 2, 3))


# ----------------------------------------------------------------------------
if __name__ == "__main__":
    key = jax.random.PRNGKey(0)
    k1, k2 = jax.random.split(key)
    B, C, H, W = 2, 4, 16, 16
    img1 = jax.random.uniform(k1, (B, C, H, W), dtype=jnp.float32)
    noise = jax.random.uniform(k2, (B, C, H, W), dtype=jnp.float32)
    img2 = jnp.clip(0.8 * img1 + 0.2 * noise, 0.0, 1.0)

    ref = jax.block_until_ready(ssim_reference(img1, img2))

    # precise path: all-f32 MXU blurs + exact divide -> tight cross-check
    out_precise = jax.block_until_ready(
        ssim_pallas(img1, img2, window_size=11, size_average=True, precise=True))
    assert np.allclose(np.asarray(out_precise), np.asarray(ref),
                       rtol=1e-3, atol=5e-4), (float(out_precise), float(ref))

    # fast path (default): bf16 mu blurs + approx reciprocal -> loose check
    out_fast = jax.block_until_ready(
        ssim_pallas(img1, img2, window_size=11, size_average=True))
    assert np.allclose(np.asarray(out_fast), np.asarray(ref),
                       rtol=2e-2, atol=3e-2), (float(out_fast), float(ref))

    print("KERNEL_OK")
</pallas_src>

<mosaic_0001>
module attributes {stable_mosaic.version = 11 : i64} {
  func.func @kernel(%arg0: i32, %arg1: memref<64x64xf32, #tpu.memory_space<vmem>>, %arg2: memref<384x128xf32, #tpu.memory_space<vmem>>, %arg3: memref<4x16x384xf32, #tpu.memory_space<vmem>>, %arg4: memref<4x16x384xf32, #tpu.memory_space<vmem>>, %arg5: memref<1x4x128xf32, #tpu.memory_space<vmem>>) attributes {dimension_semantics = [#tpu.dimension_semantics<parallel>], iteration_bounds = array<i64: 2>, scalar_prefetch = 0 : i64, scratch_operands = 0 : i64, tpu.core_type = #tpu.core_type<tc>, window_params = [{pipeline_mode = #tpu.pipeline_mode<synchronous>, transform_indices = @transform_0, window_bounds = array<i64: 64, 64>}, {pipeline_mode = #tpu.pipeline_mode<synchronous>, transform_indices = @transform_1, window_bounds = array<i64: 384, 128>}, {transform_indices = @transform_2, window_bounds = array<i64: 4, 16, 384>}, {transform_indices = @transform_3, window_bounds = array<i64: 4, 16, 384>}, {transform_indices = @transform_4, window_bounds = array<i64: 1, 4, 128>}]} {
    %c0 = arith.constant 0 : index
    %c0_0 = arith.constant 0 : index
    %c0_1 = arith.constant 0 : index
    %0 = vector.load %arg3[%c0, %c0_0, %c0_1] : memref<4x16x384xf32, #tpu.memory_space<vmem>>, vector<4x16x384xf32>
    %1 = vector.shape_cast %0 : vector<4x16x384xf32> to vector<64x384xf32>
    %c0_2 = arith.constant 0 : index
    %c0_3 = arith.constant 0 : index
    %c0_4 = arith.constant 0 : index
    %2 = vector.load %arg4[%c0_2, %c0_3, %c0_4] : memref<4x16x384xf32, #tpu.memory_space<vmem>>, vector<4x16x384xf32>
    %3 = vector.shape_cast %2 : vector<4x16x384xf32> to vector<64x384xf32>
    %c0_5 = arith.constant 0 : index
    %c0_6 = arith.constant 0 : index
    %4 = vector.load %arg1[%c0_5, %c0_6] : memref<64x64xf32, #tpu.memory_space<vmem>>, vector<64x64xf32>
    %c0_7 = arith.constant 0 : index
    %c0_8 = arith.constant 0 : index
    %5 = vector.load %arg2[%c0_7, %c0_8] : memref<384x128xf32, #tpu.memory_space<vmem>>, vector<384x128xf32>
    %cst = arith.constant dense<0.000000e+00> : vector<64x128xf32>
    %6 = tpu.matmul %1, %5, %cst {dimension_numbers = #tpu.dot_dimension_numbers<[1], [0], [0], [1], [0, 0, 1, 1], [], []>} : vector<64x384xf32>, vector<384x128xf32>, vector<64x128xf32> -> vector<64x128xf32>
    %cst_9 = arith.constant dense<0.000000e+00> : vector<64x128xf32>
    %7 = tpu.matmul %4, %6, %cst_9 {dimension_numbers = #tpu.dot_dimension_numbers<[1], [0], [0], [1], [0, 0, 1, 1], [], []>} : vector<64x64xf32>, vector<64x128xf32>, vector<64x128xf32> -> vector<64x128xf32>
    %cst_10 = arith.constant dense<0.000000e+00> : vector<64x128xf32>
    %8 = tpu.matmul %3, %5, %cst_10 {dimension_numbers = #tpu.dot_dimension_numbers<[1], [0], [0], [1], [0, 0, 1, 1], [], []>} : vector<64x384xf32>, vector<384x128xf32>, vector<64x128xf32> -> vector<64x128xf32>
    %cst_11 = arith.constant dense<0.000000e+00> : vector<64x128xf32>
    %9 = tpu.matmul %4, %8, %cst_11 {dimension_numbers = #tpu.dot_dimension_numbers<[1], [0], [0], [1], [0, 0, 1, 1], [], []>} : vector<64x64xf32>, vector<64x128xf32>, vector<64x128xf32> -> vector<64x128xf32>
    %10 = arith.mulf %1, %1 : vector<64x384xf32>
    %cst_12 = arith.constant dense<0.000000e+00> : vector<64x128xf32>
    %11 = tpu.matmul %10, %5, %cst_12 {dimension_numbers = #tpu.dot_dimension_numbers<[1], [0], [0], [1], [0, 0, 1, 1], [], []>} : vector<64x384xf32>, vector<384x128xf32>, vector<64x128xf32> -> vector<64x128xf32>
    %cst_13 = arith.constant dense<0.000000e+00> : vector<64x128xf32>
    %12 = tpu.matmul %4, %11, %cst_13 {dimension_numbers = #tpu.dot_dimension_numbers<[1], [0], [0], [1], [0, 0, 1, 1], [], []>} : vector<64x64xf32>, vector<64x128xf32>, vector<64x128xf32> -> vector<64x128xf32>
    %13 = arith.mulf %3, %3 : vector<64x384xf32>
    %cst_14 = arith.constant dense<0.000000e+00> : vector<64x128xf32>
    %14 = tpu.matmul %13, %5, %cst_14 {dimension_numbers = #tpu.dot_dimension_numbers<[1], [0], [0], [1], [0, 0, 1, 1], [], []>} : vector<64x384xf32>, vector<384x128xf32>, vector<64x128xf32> -> vector<64x128xf32>
    %cst_15 = arith.constant dense<0.000000e+00> : vector<64x128xf32>
    %15 = tpu.matmul %4, %14, %cst_15 {dimension_numbers = #tpu.dot_dimension_numbers<[1], [0], [0], [1], [0, 0, 1, 1], [], []>} : vector<64x64xf32>, vector<64x128xf32>, vector<64x128xf32> -> vector<64x128xf32>
    %16 = arith.mulf %1, %3 : vector<64x384xf32>
    %cst_16 = arith.constant dense<0.000000e+00> : vector<64x128xf32>
    %17 = tpu.matmul %16, %5, %cst_16 {dimension_numbers = #tpu.dot_dimension_numbers<[1], [0], [0], [1], [0, 0, 1, 1], [], []>} : vector<64x384xf32>, vector<384x128xf32>, vector<64x128xf32> -> vector<64x128xf32>
    %cst_17 = arith.constant dense<0.000000e+00> : vector<64x128xf32>
    %18 = tpu.matmul %4, %17, %cst_17 {dimension_numbers = #tpu.dot_dimension_numbers<[1], [0], [0], [1], [0, 0, 1, 1], [], []>} : vector<64x64xf32>, vector<64x128xf32>, vector<64x128xf32> -> vector<64x128xf32>
    %19 = arith.mulf %7, %7 : vector<64x128xf32>
    %20 = arith.mulf %9, %9 : vector<64x128xf32>
    %21 = arith.mulf %7, %9 : vector<64x128xf32>
    %22 = arith.subf %12, %19 : vector<64x128xf32>
    %23 = arith.subf %15, %20 : vector<64x128xf32>
    %24 = arith.subf %18, %21 : vector<64x128xf32>
    %cst_18 = arith.constant 2.000000e+00 : f32
    %25 = vector.broadcast %cst_18 : f32 to vector<64x128xf32>
    %26 = arith.mulf %25, %21 : vector<64x128xf32>
    %cst_19 = arith.constant 9.99999974E-5 : f32
    %27 = vector.broadcast %cst_19 : f32 to vector<64x128xf32>
    %28 = arith.addf %26, %27 : vector<64x128xf32>
    %cst_20 = arith.constant 2.000000e+00 : f32
    %29 = vector.broadcast %cst_20 : f32 to vector<64x128xf32>
    %30 = arith.mulf %29, %24 : vector<64x128xf32>
    %cst_21 = arith.constant 8.99999984E-4 : f32
    %31 = vector.broadcast %cst_21 : f32 to vector<64x128xf32>
    %32 = arith.addf %30, %31 : vector<64x128xf32>
    %33 = arith.mulf %28, %32 : vector<64x128xf32>
    %34 = arith.addf %19, %20 : vector<64x128xf32>
    %cst_22 = arith.constant 9.99999974E-5 : f32
    %35 = vector.broadcast %cst_22 : f32 to vector<64x128xf32>
    %36 = arith.addf %34, %35 : vector<64x128xf32>
    %37 = arith.addf %22, %23 : vector<64x128xf32>
    %cst_23 = arith.constant 8.99999984E-4 : f32
    %38 = vector.broadcast %cst_23 : f32 to vector<64x128xf32>
    %39 = arith.addf %37, %38 : vector<64x128xf32>
    %40 = arith.mulf %36, %39 : vector<64x128xf32>
    %41 = arith.divf %33, %40 : vector<64x128xf32>
    %42 = vector.shape_cast %41 : vector<64x128xf32> to vector<4x16x128xf32>
    %43 = tpu.iota {dimensions = array<i32: 2>} : vector<4x16x128xi32>
    %c16_i32 = arith.constant 16 : i32
    %44 = vector.broadcast %c16_i32 : i32 to vector<4x16x128xi32>
    %45 = arith.cmpi slt, %43, %44 : vector<4x16x128xi32>
    %cst_24 = arith.constant 0.000000e+00 : f32
    %46 = vector.broadcast %cst_24 : f32 to vector<4x16x128xf32>
    %47 = arith.select %45, %42, %46 : vector<4x16x128xi1>, vector<4x16x128xf32>
    %cst_25 = arith.constant dense<0.000000e+00> : vector<4x16xf32>
    %48 = vector.multi_reduction <add>, %47, %cst_25 [2] : vector<4x16x128xf32> to vector<4x16xf32>
    %cst_26 = arith.constant dense<0.000000e+00> : vector<4xf32>
    %49 = vector.multi_reduction <add>, %48, %cst_26 [1] : vector<4x16xf32> to vector<4xf32>
    %50 = vector.shape_cast %49 : vector<4xf32> to vector<4x1xf32>
    %51 = vector.shape_cast %50 : vector<4x1xf32> to vector<4x1xf32>
    %52 = vector.broadcast %51 : vector<4x1xf32> to vector<4x128xf32>
    %c0_27 = arith.constant 0 : index
    %c0_28 = arith.constant 0 : index
    %c0_29 = arith.constant 0 : index
    %53 = vector.load %arg5[%c0_27, %c0_28, %c0_29] : memref<1x4x128xf32, #tpu.memory_space<vmem>>, vector<1x4x128xf32>
    %54 = vector.shape_cast %53 : vector<1x4x128xf32> to vector<4x128xf32>
    %55 = vector.shape_cast %52 : vector<4x128xf32> to vector<1x4x128xf32>
    tpu.vector_store %arg5[%c0_27, %c0_28, %c0_29], %55 {strides = array<i32>} : memref<1x4x128xf32, #tpu.memory_space<vmem>>, vector<1x4x128xf32>,
    return
  }
  func.func @transform_0(%arg0: i32) -> (i32, i32) {
    %c0_i32 = arith.constant 0 : i32
    %c0_i32_0 = arith.constant 0 : i32
    %c0_i32_1 = arith.constant 0 : i32
    return %c0_i32, %c0_i32_0 : i32, i32
  }
  func.func @transform_1(%arg0: i32) -> (i32, i32) {
    %c0_i32 = arith.constant 0 : i32
    %c0_i32_0 = arith.constant 0 : i32
    %c0_i32_1 = arith.constant 0 : i32
    return %c0_i32, %c0_i32_0 : i32, i32
  }
  func.func @transform_2(%arg0: i32) -> (i32, i32, i32) {
    %c0_i32 = arith.constant 0 : i32
    %c0_i32_0 = arith.constant 0 : i32
    %c0_i32_1 = arith.constant 0 : i32
    return %arg0, %c0_i32, %c0_i32_0 : i32, i32, i32
  }
  func.func @transform_3(%arg0: i32) -> (i32, i32, i32) {
    %c0_i32 = arith.constant 0 : i32
    %c0_i32_0 = arith.constant 0 : i32
    %c0_i32_1 = arith.constant 0 : i32
    return %arg0, %c0_i32, %c0_i32_0 : i32, i32, i32
  }
  func.func @transform_4(%arg0: i32) -> (i32, i32, i32) {
    %c0_i32 = arith.constant 0 : i32
    %c0_i32_0 = arith.constant 0 : i32
    %c0_i32_1 = arith.constant 0 : i32
    return %arg0, %c0_i32, %c0_i32_0 : i32, i32, i32
  }
}

module attributes {stable_mosaic.version = 11 : i64} {
  func.func @kernel(%arg0: i32, %arg1: memref<64x64xf32, #tpu.memory_space<vmem>>, %arg2: memref<384x128xf32, #tpu.memory_space<vmem>>, %arg3: memref<4x16x384xf32, #tpu.memory_space<vmem>>, %arg4: memref<4x16x384xf32, #tpu.memory_space<vmem>>, %arg5: memref<1x4x128xf32, #tpu.memory_space<vmem>>) attributes {dimension_semantics = [#tpu.dimension_semantics<parallel>], iteration_bounds = array<i64: 2>, scalar_prefetch = 0 : i64, scratch_operands = 0 : i64, tpu.core_type = #tpu.core_type<tc>, window_params = [{pipeline_mode = #tpu.pipeline_mode<synchronous>, transform_indices = @transform_0, window_bounds = array<i64: 64, 64>}, {pipeline_mode = #tpu.pipeline_mode<synchronous>, transform_indices = @transform_1, window_bounds = array<i64: 384, 128>}, {transform_indices = @transform_2, window_bounds = array<i64: 4, 16, 384>}, {transform_indices = @transform_3, window_bounds = array<i64: 4, 16, 384>}, {transform_indices = @transform_4, window_bounds = array<i64: 1, 4, 128>}]} {
    %c0 = arith.constant 0 : index
    %c0_0 = arith.constant 0 : index
    %c0_1 = arith.constant 0 : index
    %0 = vector.load %arg3[%c0, %c0_0, %c0_1] : memref<4x16x384xf32, #tpu.memory_space<vmem>>, vector<4x16x384xf32>
    %1 = vector.shape_cast %0 : vector<4x16x384xf32> to vector<64x384xf32>
    %c0_2 = arith.constant 0 : index
    %c0_3 = arith.constant 0 : index
    %c0_4 = arith.constant 0 : index
    %2 = vector.load %arg4[%c0_2, %c0_3, %c0_4] : memref<4x16x384xf32, #tpu.memory_space<vmem>>, vector<4x16x384xf32>
    %3 = vector.shape_cast %2 : vector<4x16x384xf32> to vector<64x384xf32>
    %c0_5 = arith.constant 0 : index
    %c0_6 = arith.constant 0 : index
    %4 = vector.load %arg1[%c0_5, %c0_6] : memref<64x64xf32, #tpu.memory_space<vmem>>, vector<64x64xf32>
    %c0_7 = arith.constant 0 : index
    %c0_8 = arith.constant 0 : index
    %5 = vector.load %arg2[%c0_7, %c0_8] : memref<384x128xf32, #tpu.memory_space<vmem>>, vector<384x128xf32>
    %cst = arith.constant dense<0.000000e+00> : vector<64x128xf32>
    %6 = tpu.matmul %1, %5, %cst {dimension_numbers = #tpu.dot_dimension_numbers<[1], [0], [0], [1], [0, 0, 1, 1], [], []>} : vector<64x384xf32>, vector<384x128xf32>, vector<64x128xf32> -> vector<64x128xf32>
    %cst_9 = arith.constant dense<0.000000e+00> : vector<64x128xf32>
    %7 = tpu.matmul %4, %6, %cst_9 {dimension_numbers = #tpu.dot_dimension_numbers<[1], [0], [0], [1], [0, 0, 1, 1], [], []>} : vector<64x64xf32>, vector<64x128xf32>, vector<64x128xf32> -> vector<64x128xf32>
    %cst_10 = arith.constant dense<0.000000e+00> : vector<64x128xf32>
    %8 = tpu.matmul %3, %5, %cst_10 {dimension_numbers = #tpu.dot_dimension_numbers<[1], [0], [0], [1], [0, 0, 1, 1], [], []>} : vector<64x384xf32>, vector<384x128xf32>, vector<64x128xf32> -> vector<64x128xf32>
    %cst_11 = arith.constant dense<0.000000e+00> : vector<64x128xf32>
    %9 = tpu.matmul %4, %8, %cst_11 {dimension_numbers = #tpu.dot_dimension_numbers<[1], [0], [0], [1], [0, 0, 1, 1], [], []>} : vector<64x64xf32>, vector<64x128xf32>, vector<64x128xf32> -> vector<64x128xf32>
    %10 = arith.mulf %1, %1 : vector<64x384xf32>
    %cst_12 = arith.constant dense<0.000000e+00> : vector<64x128xf32>
    %11 = tpu.matmul %10, %5, %cst_12 {dimension_numbers = #tpu.dot_dimension_numbers<[1], [0], [0], [1], [0, 0, 1, 1], [], []>} : vector<64x384xf32>, vector<384x128xf32>, vector<64x128xf32> -> vector<64x128xf32>
    %cst_13 = arith.constant dense<0.000000e+00> : vector<64x128xf32>
    %12 = tpu.matmul %4, %11, %cst_13 {dimension_numbers = #tpu.dot_dimension_numbers<[1], [0], [0], [1], [0, 0, 1, 1], [], []>} : vector<64x64xf32>, vector<64x128xf32>, vector<64x128xf32> -> vector<64x128xf32>
    %13 = arith.mulf %3, %3 : vector<64x384xf32>
    %cst_14 = arith.constant dense<0.000000e+00> : vector<64x128xf32>
    %14 = tpu.matmul %13, %5, %cst_14 {dimension_numbers = #tpu.dot_dimension_numbers<[1], [0], [0], [1], [0, 0, 1, 1], [], []>} : vector<64x384xf32>, vector<384x128xf32>, vector<64x128xf32> -> vector<64x128xf32>
    %cst_15 = arith.constant dense<0.000000e+00> : vector<64x128xf32>
    %15 = tpu.matmul %4, %14, %cst_15 {dimension_numbers = #tpu.dot_dimension_numbers<[1], [0], [0], [1], [0, 0, 1, 1], [], []>} : vector<64x64xf32>, vector<64x128xf32>, vector<64x128xf32> -> vector<64x128xf32>
    %16 = arith.mulf %1, %3 : vector<64x384xf32>
    %cst_16 = arith.constant dense<0.000000e+00> : vector<64x128xf32>
    %17 = tpu.matmul %16, %5, %cst_16 {dimension_numbers = #tpu.dot_dimension_numbers<[1], [0], [0], [1], [0, 0, 1, 1], [], []>} : vector<64x384xf32>, vector<384x128xf32>, vector<64x128xf32> -> vector<64x128xf32>
    %cst_17 = arith.constant dense<0.000000e+00> : vector<64x128xf32>
    %18 = tpu.matmul %4, %17, %cst_17 {dimension_numbers = #tpu.dot_dimension_numbers<[1], [0], [0], [1], [0, 0, 1, 1], [], []>} : vector<64x64xf32>, vector<64x128xf32>, vector<64x128xf32> -> vector<64x128xf32>
    %19 = arith.mulf %7, %7 : vector<64x128xf32>
    %20 = arith.mulf %9, %9 : vector<64x128xf32>
    %21 = arith.mulf %7, %9 : vector<64x128xf32>
    %22 = arith.subf %12, %19 : vector<64x128xf32>
    %23 = arith.subf %15, %20 : vector<64x128xf32>
    %24 = arith.subf %18, %21 : vector<64x128xf32>
    %cst_18 = arith.constant 2.000000e+00 : f32
    %25 = vector.broadcast %cst_18 : f32 to vector<64x128xf32>
    %26 = arith.mulf %25, %21 : vector<64x128xf32>
    %cst_19 = arith.constant 9.99999974E-5 : f32
    %27 = vector.broadcast %cst_19 : f32 to vector<64x128xf32>
    %28 = arith.addf %26, %27 : vector<64x128xf32>
    %cst_20 = arith.constant 2.000000e+00 : f32
    %29 = vector.broadcast %cst_20 : f32 to vector<64x128xf32>
    %30 = arith.mulf %29, %24 : vector<64x128xf32>
    %cst_21 = arith.constant 8.99999984E-4 : f32
    %31 = vector.broadcast %cst_21 : f32 to vector<64x128xf32>
    %32 = arith.addf %30, %31 : vector<64x128xf32>
    %33 = arith.mulf %28, %32 : vector<64x128xf32>
    %34 = arith.addf %19, %20 : vector<64x128xf32>
    %cst_22 = arith.constant 9.99999974E-5 : f32
    %35 = vector.broadcast %cst_22 : f32 to vector<64x128xf32>
    %36 = arith.addf %34, %35 : vector<64x128xf32>
    %37 = arith.addf %22, %23 : vector<64x128xf32>
    %cst_23 = arith.constant 8.99999984E-4 : f32
    %38 = vector.broadcast %cst_23 : f32 to vector<64x128xf32>
    %39 = arith.addf %37, %38 : vector<64x128xf32>
    %40 = arith.mulf %36, %39 : vector<64x128xf32>
    %41 = arith.divf %33, %40 : vector<64x128xf32>
    %42 = vector.shape_cast %41 : vector<64x128xf32> to vector<4x16x128xf32>
    %43 = tpu.iota {dimensions = array<i32: 2>} : vector<4x16x128xi32>
    %c16_i32 = arith.constant 16 : i32
    %44 = vector.broadcast %c16_i32 : i32 to vector<4x16x128xi32>
    %45 = arith.cmpi slt, %43, %44 : vector<4x16x128xi32>
    %cst_24 = arith.constant 0.000000e+00 : f32
    %46 = vector.broadcast %cst_24 : f32 to vector<4x16x128xf32>
    %47 = arith.select %45, %42, %46 : vector<4x16x128xi1>, vector<4x16x128xf32>
    %cst_25 = arith.constant dense<0.000000e+00> : vector<4x16xf32>
    %48 = vector.multi_reduction <add>, %47, %cst_25 [2] : vector<4x16x128xf32> to vector<4x16xf32>
    %cst_26 = arith.constant dense<0.000000e+00> : vector<4xf32>
    %49 = vector.multi_reduction <add>, %48, %cst_26 [1] : vector<4x16xf32> to vector<4xf32>
    %50 = vector.shape_cast %49 : vector<4xf32> to vector<4x1xf32>
    %51 = vector.shape_cast %50 : vector<4x1xf32> to vector<4x1xf32>
    %52 = vector.broadcast %51 : vector<4x1xf32> to vector<4x128xf32>
    %c0_27 = arith.constant 0 : index
    %c0_28 = arith.constant 0 : index
    %c0_29 = arith.constant 0 : index
    %53 = vector.load %arg5[%c0_27, %c0_28, %c0_29] : memref<1x4x128xf32, #tpu.memory_space<vmem>>, vector<1x4x128xf32>
    %54 = vector.shape_cast %53 : vector<1x4x128xf32> to vector<4x128xf32>
    %55 = vector.shape_cast %52 : vector<4x128xf32> to vector<1x4x128xf32>
    tpu.vector_store %arg5[%c0_27, %c0_28, %c0_29], %55 {strides = array<i32>} : memref<1x4x128xf32, #tpu.memory_space<vmem>>, vector<1x4x128xf32>,
    return
  }
  func.func @transform_0(%arg0: i32) -> (i32, i32) {
    %c0_i32 = arith.constant 0 : i32
    %c0_i32_0 = arith.constant 0 : i32
    %c0_i32_1 = arith.constant 0 : i32
    return %c0_i32, %c0_i32_0 : i32, i32
  }
  func.func @transform_1(%arg0: i32) -> (i32, i32) {
    %c0_i32 = arith.constant 0 : i32
    %c0_i32_0 = arith.constant 0 : i32
    %c0_i32_1 = arith.constant 0 : i32
    return %c0_i32, %c0_i32_0 : i32, i32
  }
  func.func @transform_2(%arg0: i32) -> (i32, i32, i32) {
    %c0_i32 = arith.constant 0 : i32
    %c0_i32_0 = arith.constant 0 : i32
    %c0_i32_1 = arith.constant 0 : i32
    return %arg0, %c0_i32, %c0_i32_0 : i32, i32, i32
  }
  func.func @transform_3(%arg0: i32) -> (i32, i32, i32) {
    %c0_i32 = arith.constant 0 : i32
    %c0_i32_0 = arith.constant 0 : i32
    %c0_i32_1 = arith.constant 0 : i32
    return %arg0, %c0_i32, %c0_i32_0 : i32, i32, i32
  }
  func.func @transform_4(%arg0: i32) -> (i32, i32, i32) {
    %c0_i32 = arith.constant 0 : i32
    %c0_i32_0 = arith.constant 0 : i32
    %c0_i32_1 = arith.constant 0 : i32
    return %arg0, %c0_i32, %c0_i32_0 : i32, i32, i32
  }
}

</mosaic_0001>

<bundles_post_ra>
// kernel: tpu_custom_call.1
= control target key start
LH: loop header
LB: loop body
LE: loop exit
PB: predicated region body
PF: predicated region fallthrough
CT: control target
= control target key end

     0   :  { %s3408_s0 = inlined_call_operand.hbm [shape: f32[64,64], index: 0, kind: input, shape index: {}]   ;;  %s3409_s1 = inlined_call_operand.hbm [shape: f32[384,128], index: 1, kind: input, shape index: {}]   ;;  %s3410_s2 = inlined_call_operand.hbm [shape: f32[8,16,384], index: 2, kind: input, shape index: {}]   ;;  %s3411_s3 = inlined_call_operand.hbm [shape: f32[8,16,384], index: 3, kind: input, shape index: {}]   ;;  %s3412_s4 = inlined_call_operand.hbm [shape: f32[2,4,128], index: 4, kind: output, shape index: {}]  }
   0x1   :  { %3551 = sst [smem:[#allocation69_spill]] %s3408_s0 }
   0x2   :  { %3552 = sst [smem:[#allocation70_spill]] %s3409_s1 }
   0x3   :  { %3553 = sst [smem:[#allocation71_spill]] %s3410_s2 }
   0x4   :  { %9 = vsyncpa [#allocation3], 0 }
   0x5   :  { %10 = vsyncpa [#allocation6], 0 }
   0x6   :  { %11 = vsyncpa [#allocation4], 0 }
   0x7   :  { %13 = vsyncpa [#allocation4 + $0x1], 0  ;;  %s2142_s15 = smov 0   ;;  %s2144_s16 = smov 0  }
   0x8   :  { %s2146_s17 = smov 0   ;;  %s2148_s18 = smov 0  }
   0x9 LB: > { %3554 = sst [smem:[#allocation14_spill]] %s2105_s17  ;;  %s2163_s19 = sadd.s32 4294967295, %s2109_s18   ;;  %s2109_s18 = sphi %s2148_s18, %s3731_s18   ;;  %s2105_s17 = sphi %s2146_s17, %s3728_s17   ;;  %s2101_s16 = sphi %s2144_s16, %s3730_s16   ;;  %s2097_s15 = sphi %s2142_s15, %s3729_s15  }
   0xa   : > { %s1747_s20 = sadd.s32 4294967294, %s2109_s18   ;;  %p81_p0 = scmp.ne.s32.totalorder %s2101_s16, %s2097_s15 }
   0xb   : > { %p3416_p1 = scmp.eq.s32.totalorder %s2163_s19, 0  ;;  %p131_p2 = scmp.eq.s32.totalorder %s2163_s19, 1 }
   0xc   : > { %p137_p3 = scmp.eq.s32.totalorder %s1747_s20, 1  ;;  %p1748_p5 = scmp.ge.s32.totalorder %s2109_s18, 1 }
   0xd   : > { %p2172_p4 = por %p3416_p1, %p81_p0  ;;  %p144_p7 = scmp.lt.s32.totalorder %s2109_s18, 3 }
   0xe   : > { %p2177_p6 = por %p137_p3, %p81_p0  ;;  %s3557_s0 = sld [smem:[#allocation69_spill]] }
   0xf   : > { %p2185_p8 = pnand %p1748_p5, %p144_p7  ;;  %s2111_s27 = smov [#allocation2]  }
  0x10   : > { %s157_s28 = sshll.u32 %s2111_s27, 4  ;;  %s2199_s30 = sadd.s32 1, %s2109_s18   ;;  %s158_s28 = int_to_ptr.vmem [resolvable:$true] %s157_s28 }
  0x11   : > { %p1825_p9 = pneg %p2185_p8  ;;  %s3413_s5 = smov 128  }
  0x12   : > { %s3414_s6 = smov 8   ;;  %s65_s7 = ssub.s32 %s2109_s18, %s2199_s30 }
  0x13   : > { %p2193_p10 = pnand %p1825_p9, %p3416_p1  ;;  %s68_s8 = sadd.s32 1, %s2105_s17 }
  0x14   : > { %s155_s25 = sshll.u32 %s3557_s0, 4  ;;  %p66_p12 = scmp.eq.s32.totalorder %s65_s7, 0  ;;  %s156_s25 = int_to_ptr.hbm [resolvable:$true] %s155_s25 }
  0x15   : > { %1828 = dma.hbm_to_vmem [thread:$0]  (!%p2193_p10), %s156_s25, 1024, %s158_s28, [#allocation3], %s3413_s5, %s3413_s5, %s3414_s6  }
  0x16   : > { %p75_p13 = scmp.ne.s32.totalorder %s2105_s17, %s2101_s16  ;;  %p76_p0 = scmp.eq.s32.totalorder %s2109_s18, 0 }
  0x17   : > { %p1845_p3 = scmp.lt.s32.totalorder %s2109_s18, 2  ;;  %s185_s11 = sand.u32 1, %s2109_s18  }
  0x18   : > { %s2214_s9 = scalar_select %p66_p12, %s2105_s17, %s68_s8  }
  0x19   : > { %p77_p5 = por %p76_p0, %p75_p13  ;;  %p2218_p7 = por %p131_p2, %p75_p13 }
  0x1a   : > { %3560 = sst [smem:[#allocation15_spill]] %s2214_s9  ;;  %s187_s12 = sand.u32 1, %s2105_s17  }
  0x1b   : > { %s2224_s13 = smul.u32 192, %s187_s12  ;;  %p2227_p9 = pnand %p1845_p3, %p77_p5 }
  0x1c   : > { %s3415_s14 = smul.u32 192, %s2109_s18  ;;  %s3563_s2 = sld [smem:[#allocation71_spill]] }
  0x1d   : > { %s189_s27 = scalar_lea.vmem [#allocation7], %s2224_s13  ;;  %s3564_s1 = sld [smem:[#allocation70_spill]] }
  0x1e   : > { %s198_s28 = sshll.u32 %s189_s27, 4  ;;  %s2240_s6 = scalar_lea.sflag [#allocation3], %s185_s11  ;;  %s199_s28 = int_to_ptr.vmem [resolvable:$true] %s198_s28 }
  0x1f   : > { %p1949_p12 = pneg %p2227_p9 }
  0x22   : > { %s195_s25 = scalar_lea.hbm %s3563_s2, %s3415_s14 }
  0x23   : > { %s196_s7 = sshll.u32 %s195_s25, 4  ;;  %s169_s5 = sshll.u32 %s3564_s1, 4  ;;  %s197_s7 = int_to_ptr.hbm [resolvable:$true] %s196_s7  ;;  %s170_s5 = int_to_ptr.hbm [resolvable:$true] %s169_s5 }
  0x24   : > { %s1945_s0 = sshra.s32 %s197_s7, 4  ;;  %s1952_s25 = scalar_lea.hbm %s3563_s2, 384  ;;  %s1946_s0 = int_to_ptr.hbm [resolvable:$true] %s1945_s0 }
  0x25   : > { %s1947_s9 = scalar_lea.hbm %s1946_s0, 192  ;;  %p1953_p3 = scmp.lt.s32.totalorder %s1946_s0, %s3563_s2 }
  0x26   : > { %p1948_p2 = scmp.ne.s32.totalorder %s1946_s0, %s1947_s9  ;;  %p1954_p5 = scmp.lt.s32.totalorder %s1952_s25, %s1947_s9 }
  0x28   : > { %p1950_p13 = pnand %p1949_p12, %p1948_p2  ;;  %p1955_p11 = por %p1954_p5, %p1953_p3 }
  0x2a   : > { %p1951_p0 = pneg %p1950_p13 }
  0x2c   : > { %p1956_p1 = pnand %p1955_p11, %p1951_p0 }
  0x2e   : > { %1959 = shalt.err (!%p1956_p1)
}
  0x2f   : > { %s2114_s11 = smov 384   ;;  %s2115_s8 = smov 24  }
  0x30   : > { %1835 = dma.hbm_to_vmem [thread:$0]  (!%p2227_p9), %s197_s7, 3072, %s199_s28, %s2240_s6, %s2114_s11, %s2114_s11, %s2115_s8  }
  0x31   : > { %s2116_s14 = smov [#allocation5]   ;;  %s3565_s9 = smul.u32 192, %s2109_s18 }
  0x32   : > { %s171_s0 = sshll.u32 %s2116_s14, 4  ;;  %s3566_s25 = smov 8   ;;  %s172_s0 = int_to_ptr.vmem [resolvable:$true] %s171_s0 }
  0x33   : > { %s218_s24 = scalar_lea.hbm %s3411_s3, %s3565_s9  ;;  %s3567_s27 = smov 128  }
  0x34   : > { %1831 = dma.hbm_to_vmem [thread:$0]  (!%p2193_p10), %s170_s5, 6144, %s172_s0, [#allocation6], %s3567_s27, %s3567_s27, %s3566_s25  }
  0x35   : > { %s219_s1 = sshll.u32 %s218_s24, 4  ;;  %s212_s2 = scalar_lea.vmem [#allocation8], %s2224_s13  ;;  %s220_s1 = int_to_ptr.hbm [resolvable:$true] %s219_s1 }
  0x36   : > { %s221_s17 = sshll.u32 %s212_s2, 4  ;;  %s2005_s28 = sshra.s32 %s220_s1, 4  ;;  %s222_s17 = int_to_ptr.vmem [resolvable:$true] %s221_s17  ;;  %s2006_s28 = int_to_ptr.hbm [resolvable:$true] %s2005_s28 }
  0x37   : > { %s2007_s7 = scalar_lea.hbm %s2006_s28, 192  ;;  %s2012_s29 = scalar_lea.hbm %s3411_s3, 384 }
  0x38   : > { %p2008_p1 = scmp.ne.s32.totalorder %s2006_s28, %s2007_s7  ;;  %p2013_p10 = scmp.lt.s32.totalorder %s2006_s28, %s3411_s3 }
  0x39   : > { %p2014_p13 = scmp.lt.s32.totalorder %s2012_s29, %s2007_s7 }
  0x3a   : > { %p2010_p11 = pnand %p2008_p1, %p1949_p12 }
  0x3b   : > { %p2015_p0 = por %p2014_p13, %p2013_p10 }
  0x3c   : > { %p2011_p2 = pneg %p2010_p11 }
  0x3e   : > { %p2016_p3 = pnand %p2015_p0, %p2011_p2 }
  0x40   : > { %2019 = shalt.err (!%p2016_p3)
}
  0x41   : > { %1838 = dma.hbm_to_vmem [thread:$0]  (!%p2227_p9), %s220_s1, 3072, %s222_s17, %s2240_s6, %s2114_s11, %s2114_s11, %s2115_s8  }
  0x42   : > { %233 = sbr.rel (%p2185_p8) target bundleno = 1222 (0x4c6), region = 36 }
  0x47   : > { %p3568_p12 = scmp.eq.s32.totalorder %s2163_s19, 0 }
  0x49   : > { %2080 = dma.done.wait (%p3568_p12), [#allocation3], 1024   ;;  %p3569_p5 = pmov %p3568_p12 }
  0x4b   : > { %2082 = vsyncadd (%p3569_p5), [#allocation3], 4294966272  ;;  %p3570_p1 = pmov %p3569_p5 }
  0x4d   : > { %2084 = dma.done.wait (%p3570_p1), [#allocation6], 6144   ;;  %p3571_p11 = pmov %p3570_p1 }
  0x4e   : > { %s245_s2 = sand.u32 1, %s2163_s19   ;;  %s2297_s1 = sand.u32 1, %s2101_s16  }
  0x4f   : > { %2086 = vsyncadd (%p3571_p11), [#allocation6], 4294961152  ;;  %s1810_s17 = smul.u32 192, %s2297_s1  ;;  %s246_s26 = scalar_lea.sflag [#allocation3], %s245_s2 }
  0x51   : > { %s2302_s5 = scalar_lea.vmem [#allocation7], %s1810_s17 }
  0x52   : > { %2088 = dma.done.wait (%p2172_p4), %s246_s26, 6144  }
  0x53   : > { %2090 = vsyncadd (%p2172_p4), %s246_s26, 4294961152  ;;  %v2308_v0 = vld [vmem:[#allocation5 + $0x178] sm:$0xff]  ;;  %v2310_v1 = vld [vmem:[#allocation5 + $0x170] sm:$0xff]  ;;  %vm519_vm0 = vcmask 523264   ;;  %s2650_s21 = scalar_lea.vmem [#allocation8], %s1810_s17  ;;  %s1761_s6 = sshll.u32 %s2297_s1, 2 }
  0x54   : > { %v2312_v2 = vld [vmem:[#allocation5 + $0x78] sm:$0xff]  ;;  %478 = vmatpush.msra.mxu2 %v2308_v0  ;;  %v2318_v4 = vld [vmem:[#allocation5 + $0x70] sm:$0xff]  ;;  %v2321_v5 = vld [vmem:[#allocation5 + $0x168] sm:$0xff]  ;;  %s1803_s13 = sshll.u32 %s2163_s19, 2  ;;  %s289_s0 = scalar_lea.vmem [#allocation9], %s1761_s6 }
  0x55   : > { %396 = vmatpush.msra.mxu0 %v2312_v2  ;;  %v2316_v3 = vld [vmem:[#allocation5 + $0xf8] sm:$0xff]  ;;  %v2323_v6 = vld [vmem:[#allocation5 + $0xf0] sm:$0xff]  ;;  %v2325_v7 = vld [vmem:[#allocation5 + $0x68] sm:$0xff]  ;;  %s1633_s8 = scalar_lea.hbm %s3412_s4, %s1803_s13  ;;  %s1635_s24 = sshll.u32 %s289_s0, 4  ;;  %s1636_s24 = int_to_ptr.vmem [resolvable:$true] %s1635_s24 }
  0x56   : > { %437 = vmatpush.msra.mxu1 %v2316_v3  ;;  %479 = vmatpush.msra.mxu2 %v2310_v1  ;;  %v2329_v8 = vld [vmem:[#allocation5 + $0xe8] sm:$0xff]  ;;  %v2332_v9 = vld [vmem:[#allocation5 + $0x160] sm:$0xff]  ;;  %v2341_v12 = vld [vmem:[#allocation5 + $0x158] sm:$0xff]  ;;  %s1637_s25 = sshll.u32 %s1633_s8, 4  ;;  %s1623_s27 = scalar_lea.sflag [#allocation4], %s2297_s1  ;;  %s1638_s25 = int_to_ptr.hbm [resolvable:$true] %s1637_s25 }
  0x57   : > { %397 = vmatpush.msra.mxu0 %v2318_v4  ;;  %v2334_v10 = vld [vmem:[#allocation5 + $0x60] sm:$0xff]  ;;  %3572 = vst [vmem:[#allocation16_spill] sm:$0xff] %v2341_v12  ;;  %v2343_v13 = vld [vmem:[#allocation5 + $0x58] sm:$0xff]  ;;  %v2350_v15 = vld [vmem:[#allocation5 + $0x150] sm:$0xff]  ;;  %s2049_s28 = sshra.s32 %s1638_s25, 4  ;;  %s2055_s9 = scalar_lea.hbm %s3412_s4, 8  ;;  %s2050_s28 = int_to_ptr.hbm [resolvable:$true] %s2049_s28 }
  0x58   : > { %438 = vmatpush.msra.mxu1 %v2323_v6  ;;  %480 = vmatpush.msra.mxu2 %v2321_v5  ;;  %v2338_v11 = vld [vmem:[#allocation5 + $0xe0] sm:$0xff]  ;;  %v2347_v14 = vld [vmem:[#allocation5 + $0xd8] sm:$0xff]  ;;  %3573 = vst [vmem:[#allocation17_spill] sm:$0xff] %v2350_v15  ;;  %v2352_v16 = vld [vmem:[#allocation5 + $0x50] sm:$0xff]  ;;  %s2051_s7 = scalar_lea.hbm %s2050_s28, 4  ;;  %p2056_p2 = scmp.lt.s32.totalorder %s2050_s28, %s3412_s4 }
  0x59   : > { %398 = vmatpush.msra.mxu0 %v2325_v7  ;;  %v2356_v17 = vld [vmem:[#allocation5 + $0xd0] sm:$0xff]  ;;  %v2359_v18 = vld [vmem:[#allocation5 + $0x148] sm:$0xff]  ;;  %v2368_v21 = vld [vmem:[#allocation5 + $0x140] sm:$0xff]  ;;  %p2052_p4 = scmp.ne.s32.totalorder %s2050_s28, %s2051_s7  ;;  %p2057_p10 = scmp.lt.s32.totalorder %s2055_s9, %s2051_s7 }
  0x5a   : > { %439 = vmatpush.msra.mxu1 %v2329_v8  ;;  %481 = vmatpush.msra.mxu2 %v2332_v9  ;;  %3574 = vst [vmem:[#allocation18_spill] sm:$0xff] %v2359_v18  ;;  %v2361_v19 = vld [vmem:[#allocation5 + $0x48] sm:$0xff]  ;;  %v2370_v22 = vld [vmem:[#allocation5 + $0x40] sm:$0xff]  ;;  %v2377_v24 = vld [vmem:[#allocation5 + $0x138] sm:$0xff] }
  0x5b   : > { %399 = vmatpush.msra.mxu0 %v2334_v10  ;;  %v2365_v20 = vld [vmem:[#allocation5 + $0xc8] sm:$0xff]  ;;  %3576 = vst [vmem:[#allocation20_spill] sm:$0xff] %v2368_v21  ;;  %v2374_v23 = vld [vmem:[#allocation5 + $0xc0] sm:$0xff]  ;;  %v2379_v25 = vld [vmem:[#allocation5 + $0x38] sm:$0xff]  ;;  %p2053_p8 = pnand %p2052_p4, %p2218_p7  ;;  %p2058_p13 = por %p2057_p10, %p2056_p2 }
  0x5c   : > { %440 = vmatpush.msra.mxu1 %v2338_v11  ;;  %482 = vmatpush.msra.mxu2 %v2341_v12  ;;  %3575 = vst [vmem:[#allocation19_spill] sm:$0xff] %v2365_v20  ;;  %v2383_v26 = vld [vmem:[#allocation5 + $0xb8] sm:$0xff]  ;;  %v2386_v27 = vld [vmem:[#allocation5 + $0x130] sm:$0xff]  ;;  %v2395_v30 = vld [vmem:[#allocation5 + $0x128] sm:$0xff] }
  0x5d   : > { %400 = vmatpush.msra.mxu0 %v2343_v13  ;;  %3577 = vst [vmem:[#allocation21_spill] sm:$0xff] %v2374_v23  ;;  %v2388_v28 = vld [vmem:[#allocation5 + $0x30] sm:$0xff]  ;;  %v2397_v31 = vld [vmem:[#allocation5 + $0x28] sm:$0xff]  ;;  %v2404_v33 = vld [vmem:[#allocation5 + $0x120] sm:$0xff]  ;;  %p2054_p9 = pneg %p2053_p8 }
  0x5e   : > { %441 = vmatpush.msra.mxu1 %v2347_v14  ;;  %483 = vmatpush.msra.mxu2 %v2350_v15  ;;  %3578 = vst [vmem:[#allocation22_spill] sm:$0xff] %v2377_v24  ;;  %v2392_v29 = vld [vmem:[#allocation5 + $0xb0] sm:$0xff]  ;;  %v2401_v32 = vld [vmem:[#allocation5 + $0xa8] sm:$0xff]  ;;  %v2406_v34 = vld [vmem:[#allocation5 + $0x20] sm:$0xff] }
  0x5f   : > { %401 = vmatpush.msra.mxu0 %v2352_v16  ;;  %3579 = vst [vmem:[#allocation23_spill] sm:$0xff] %v2383_v26  ;;  %v2410_v35 = vld [vmem:[#allocation5 + $0xa0] sm:$0xff]  ;;  %v2413_v36 = vld [vmem:[#allocation5 + $0x118] sm:$0xff]  ;;  %v2422_v39 = vld [vmem:[#allocation5 + $0x110] sm:$0xff]  ;;  %p2059_p0 = pnand %p2058_p13, %p2054_p9 }
  0x60   : > { %442 = vmatpush.msra.mxu1 %v2356_v17  ;;  %484 = vmatpush.msra.mxu2 %v2359_v18  ;;  %3580 = vst [vmem:[#allocation24_spill] sm:$0xff] %v2386_v27  ;;  %v2415_v37 = vld [vmem:[#allocation5 + $0x18] sm:$0xff]  ;;  %v2424_v40 = vld [vmem:[#allocation5 + $0x10] sm:$0xff]  ;;  %v2431_v42 = vld [vmem:[#allocation5 + $0x108] sm:$0xff] }
  0x61   : > { %402 = vmatpush.msra.mxu0 %v2361_v19  ;;  %3581 = vst [vmem:[#allocation25_spill] sm:$0xff] %v2392_v29  ;;  %v2419_v38 = vld [vmem:[#allocation5 + $0x98] sm:$0xff]  ;;  %v2428_v41 = vld [vmem:[#allocation5 + $0x90] sm:$0xff]  ;;  %v2433_v43 = vld [vmem:[#allocation5 + $0x8] sm:$0xff] }
  0x62   : > { %443 = vmatpush.msra.mxu1 %v2365_v20  ;;  %485 = vmatpush.msra.mxu2 %v2368_v21  ;;  %3582 = vst [vmem:[#allocation26_spill] sm:$0xff] %v2395_v30  ;;  %v2437_v44 = vld [vmem:[#allocation5 + $0x88] sm:$0xff]  ;;  %v2440_v45 = vld [vmem:[#allocation5 + $0x100] sm:$0xff]  ;;  %v2446_v47 = vld [vmem:[%s2302_s5 + $0x10] sm:$0xff] }
  0x63   : > { %403 = vmatpush.msra.mxu0 %v2370_v22  ;;  %3583 = vst [vmem:[#allocation27_spill] sm:$0xff] %v2401_v32  ;;  %v2442_v46 = vld [vmem:[#allocation5] sm:$0xff]  ;;  %v2456_v50 = vld [vmem:[%s2302_s5 + $0x8] sm:$0xff]  ;;  %v2472_v52 = vld [vmem:[%s2302_s5 + $0x18] sm:$0xff] }
  0x64   : > { %444 = vmatpush.msra.mxu1 %v2374_v23  ;;  %486 = vmatpush.msra.mxu2 %v2377_v24  ;;  %3584 = vst [vmem:[#allocation28_spill] sm:$0xff] %v2404_v33  ;;  %v2449_v48 = vld [vmem:[#allocation5 + $0x80] sm:$0xff]  ;;  %v2469_v51 = vld [vmem:[%s2302_s5 + $0x28] sm:$0xff]  ;;  %v2491_v55 = vld [vmem:[%s2302_s5 + $0x30] sm:$0xff] }
  0x65   : > { %404 = vmatpush.msra.mxu0 %v2379_v25  ;;  %3585 = vst [vmem:[#allocation29_spill] sm:$0xff] %v2410_v35  ;;  %v2453_v49 = vld [vmem:[%s2302_s5] sm:$0xff]  ;;  %v2494_v56 = vld [vmem:[%s2302_s5 + $0x38] sm:$0xff]  ;;  %v2510_v58 = vld [vmem:[%s2302_s5 + $0x48] sm:$0xff] }
  0x66   : > { %445 = vmatpush.msra.mxu1 %v2383_v26  ;;  %487 = vmatpush.msra.mxu2 %v2386_v27  ;;  %3586 = vst [vmem:[#allocation30_spill] sm:$0xff] %v2413_v36  ;;  %v2475_v53 = vld [vmem:[%s2302_s5 + $0x20] sm:$0xff]  ;;  %v2507_v57 = vld [vmem:[%s2302_s5 + $0x58] sm:$0xff]  ;;  %v2513_v59 = vld [vmem:[%s2302_s5 + $0x50] sm:$0xff] }
  0x67   : > { %405 = vmatpush.msra.mxu0 %v2388_v28  ;;  %3587 = vst [vmem:[#allocation31_spill] sm:$0xff] %v2419_v38  ;;  %v2488_v54 = vld [vmem:[%s2302_s5 + $0x40] sm:$0xff]  ;;  %v2526_v60 = vld [vmem:[%s2302_s5 + $0x70] sm:$0xff]  ;;  %v2532_v62 = vld [vmem:[%s2302_s5 + $0x68] sm:$0xff] }
  0x68   : > { %446 = vmatpush.msra.mxu1 %v2392_v29  ;;  %488 = vmatpush.msra.mxu2 %v2395_v30  ;;  %3588 = vst [vmem:[#allocation32_spill] sm:$0xff] %v2422_v39  ;;  %v2529_v61 = vld [vmem:[%s2302_s5 + $0x60] sm:$0xff]  ;;  %v2545_v63 = vld [vmem:[%s2302_s5 + $0x88] sm:$0xff] }
  0x69   : > { %406 = vmatpush.msra.mxu0 %v2397_v31  ;;  %3589 = vst [vmem:[#allocation33_spill] sm:$0xff] %v2428_v41 }
  0x6a   : > { %447 = vmatpush.msra.mxu1 %v2401_v32  ;;  %489 = vmatpush.msra.mxu2 %v2404_v33  ;;  %3590 = vst [vmem:[#allocation34_spill] sm:$0xff] %v2431_v42 }
  0x6b   : > { %407 = vmatpush.msra.mxu0 %v2406_v34  ;;  %3591 = vst [vmem:[#allocation35_spill] sm:$0xff] %v2437_v44 }
  0x6c   : > { %448 = vmatpush.msra.mxu1 %v2410_v35  ;;  %490 = vmatpush.msra.mxu2 %v2413_v36  ;;  %3592 = vst [vmem:[#allocation36_spill] sm:$0xff] %v2440_v45 }
  0x6d   : > { %408 = vmatpush.msra.mxu0 %v2415_v37  ;;  %3593 = vst [vmem:[#allocation37_spill] sm:$0xff] %v2446_v47 }
  0x6e   : > { %449 = vmatpush.msra.mxu1 %v2419_v38  ;;  %491 = vmatpush.msra.mxu2 %v2422_v39  ;;  %3594 = vst [vmem:[#allocation38_spill] sm:$0xff] %v2449_v48 }
  0x6f   : > { %409 = vmatpush.msra.mxu0 %v2424_v40  ;;  %3595 = vst [vmem:[#allocation39_spill] sm:$0xff] %v2453_v49 }
  0x70   : > { %450 = vmatpush.msra.mxu1 %v2428_v41  ;;  %492 = vmatpush.msra.mxu2 %v2431_v42  ;;  %3596 = vst [vmem:[#allocation40_spill] sm:$0xff] %v2456_v50 }
  0x71   : > { %410 = vmatpush.msra.mxu0 %v2433_v43  ;;  %3597 = vst [vmem:[#allocation41_spill] sm:$0xff] %v2469_v51 }
  0x72   : > { %451 = vmatpush.msra.mxu1 %v2437_v44  ;;  %493 = vmatpush.msra.mxu2 %v2440_v45  ;;  %3598 = vst [vmem:[#allocation42_spill] sm:$0xff] %v2472_v52 }
  0x73   : > { %411 = vmatpush.msra.mxu0 %v2442_v46  ;;  %494 = vmatmul.f32.vlgmr.msra.gmra.mxu2 %v2446_v47  ;;  %3599 = vst [vmem:[#allocation43_spill] sm:$0xff] %v2475_v53 }
  0x74   : > { %452 = vmatpush.msra.mxu1 %v2449_v48  ;;  %412 = vmatmul.f32.vlgmr.msra.gmra.mxu0 %v2453_v49  ;;  %3600 = vst [vmem:[#allocation44_spill] sm:$0xff] %v2488_v54 }
  0x75   : > { %453 = vmatmul.f32.vlgmr.msra.gmra.mxu1 %v2456_v50  ;;  %626 = vmatpush.msrb.mxu0 %v2316_v3  ;;  %3601 = vst [vmem:[#allocation45_spill] sm:$0xff] %v2491_v55 }
  0x76   : > { %667 = vmatpush.msrb.mxu1 %v2308_v0  ;;  %3602 = vst [vmem:[#allocation46_spill] sm:$0xff] %v2494_v56 }
  0x77   : > { %627 = vmatpush.msrb.mxu0 %v2323_v6  ;;  %3603 = vst [vmem:[#allocation47_spill] sm:$0xff] %v2507_v57 }
  0x78   : > { %668 = vmatpush.msrb.mxu1 %v2310_v1  ;;  %3604 = vst [vmem:[#allocation48_spill] sm:$0xff] %v2510_v58 }
  0x79   : > { %628 = vmatpush.msrb.mxu0 %v2329_v8  ;;  %3605 = vst [vmem:[#allocation49_spill] sm:$0xff] %v2513_v59 }
  0x7a   : > { %669 = vmatpush.msrb.mxu1 %v2321_v5  ;;  %3606 = vst [vmem:[#allocation50_spill] sm:$0xff] %v2526_v60 }
  0x7b   : > { %497 = vmatmul.f32.gmra.mxu2 %v2469_v51  ;;  %629 = vmatpush.msrb.mxu0 %v2338_v11  ;;  %3607 = vst [vmem:[#allocation51_spill] sm:$0xff] %v2529_v61 }
  0x7c   : > { %415 = vmatmul.f32.gmra.mxu0 %v2472_v52  ;;  %670 = vmatpush.msrb.mxu1 %v2332_v9  ;;  %3608 = vst [vmem:[#allocation52_spill] sm:$0xff] %v2532_v62  ;;  %v2590_v52 = vld [vmem:[%s2302_s5 + $0xb0] sm:$0xff] }
  0x7d   : > { %456 = vmatmul.f32.gmra.mxu1 %v2475_v53  ;;  %630 = vmatpush.msrb.mxu0 %v2347_v14  ;;  %3609 = vst [vmem:[#allocation53_spill] sm:$0xff] %v2545_v63 }
  0x7e   : > { %671 = vmatpush.msrb.mxu1 %v2341_v12  ;;  %3617 = vst [vmem:[#allocation61_spill] sm:$0xff] %v2590_v52 }
  0x7f   : > { %631 = vmatpush.msrb.mxu0 %v2356_v17 }
  0x80   : > { %672 = vmatpush.msrb.mxu1 %v2350_v15 }
  0x81   : > { %632 = vmatpush.msrb.mxu0 %v2365_v20 }
  0x82   : > { %673 = vmatpush.msrb.mxu1 %v2359_v18 }
  0x83   : > { %500 = vmatmul.f32.gmra.mxu2 %v2488_v54  ;;  %633 = vmatpush.msrb.mxu0 %v2374_v23 }
  0x84   : > { %418 = vmatmul.f32.gmra.mxu0 %v2491_v55  ;;  %674 = vmatpush.msrb.mxu1 %v2368_v21  ;;  %v2565_v55 = vld [vmem:[%s2302_s5 + $0xa0] sm:$0xff] }
  0x85   : > { %459 = vmatmul.f32.gmra.mxu1 %v2494_v56  ;;  %634 = vmatpush.msrb.mxu0 %v2383_v26  ;;  %3612 = vst [vmem:[#allocation56_spill] sm:$0xff] %v2565_v55 }
  0x86   : > { %675 = vmatpush.msrb.mxu1 %v2377_v24 }
  0x87   : > { %635 = vmatpush.msrb.mxu0 %v2392_v29 }
  0x88   : > { %676 = vmatpush.msrb.mxu1 %v2386_v27 }
  0x89   : > { %636 = vmatpush.msrb.mxu0 %v2401_v32 }
  0x8a   : > { %677 = vmatpush.msrb.mxu1 %v2395_v30 }
  0x8b   : > { %503 = vmatmul.f32.gmra.mxu2 %v2507_v57  ;;  %637 = vmatpush.msrb.mxu0 %v2410_v35 }
  0x8c   : > { %421 = vmatmul.f32.gmra.mxu0 %v2510_v58  ;;  %678 = vmatpush.msrb.mxu1 %v2404_v33  ;;  %v2549_v58 = vld [vmem:[%s2302_s5 + $0x78] sm:$0xff] }
  0x8d   : > { %462 = vmatmul.f32.gmra.mxu1 %v2513_v59  ;;  %638 = vmatpush.msrb.mxu0 %v2419_v38  ;;  %3610 = vst [vmem:[#allocation54_spill] sm:$0xff] %v2549_v58 }
  0x8e   : > { %679 = vmatpush.msrb.mxu1 %v2413_v36 }
  0x8f   : > { %639 = vmatpush.msrb.mxu0 %v2428_v41 }
  0x90   : > { %680 = vmatpush.msrb.mxu1 %v2422_v39 }
  0x91   : > { %640 = vmatpush.msrb.mxu0 %v2437_v44 }
  0x92   : > { %681 = vmatpush.msrb.mxu1 %v2431_v42 }
  0x93   : > { %506 = vmatmul.f32.gmra.mxu2 %v2526_v60  ;;  %641 = vmatpush.msrb.mxu0 %v2449_v48  ;;  %v2568_v60 = vld [vmem:[%s2302_s5 + $0x90] sm:$0xff] }
  0x94   : > { %424 = vmatmul.f32.gmra.mxu0 %v2529_v61  ;;  %v2552_v61 = vld [vmem:[%s2302_s5 + $0x80] sm:$0xff]  ;;  %682 = vmatpush.msrb.mxu1 %v2440_v45  ;;  %3613 = vst [vmem:[#allocation57_spill] sm:$0xff] %v2568_v60 }
  0x95   : > { %465 = vmatmul.f32.gmra.mxu1 %v2532_v62  ;;  %814 = vmatpush.msra.mxu0 %v2316_v3  ;;  %3611 = vst [vmem:[#allocation55_spill] sm:$0xff] %v2552_v61 }
  0x96   : > { %855 = vmatpush.msra.mxu1 %v2308_v0 }
  0x97   : > { %815 = vmatpush.msra.mxu0 %v2323_v6 }
  0x98   : > { %856 = vmatpush.msra.mxu1 %v2310_v1 }
  0x99   : > { %816 = vmatpush.msra.mxu0 %v2329_v8 }
  0x9a   : > { %857 = vmatpush.msra.mxu1 %v2321_v5 }
  0x9b   : > { %509 = vmatmul.f32.gmra.mxu2 %v2545_v63  ;;  %817 = vmatpush.msra.mxu0 %v2338_v11  ;;  %v2571_v63 = vld [vmem:[%s2302_s5 + $0x98] sm:$0xff] }
  0x9c   : > { %427 = vmatmul.f32.gmra.mxu0 %v2549_v58  ;;  %3614 = vst [vmem:[#allocation58_spill] sm:$0xff] %v2571_v63  ;;  %858 = vmatpush.msra.mxu1 %v2332_v9  ;;  %v2584_v58 = vld [vmem:[%s2302_s5 + $0xb8] sm:$0xff] }
  0x9d   : > { %468 = vmatmul.f32.gmra.mxu1 %v2552_v61  ;;  %818 = vmatpush.msra.mxu0 %v2347_v14  ;;  %3615 = vst [vmem:[#allocation59_spill] sm:$0xff] %v2584_v58  ;;  %v2587_v61 = vld [vmem:[%s2302_s5 + $0xa8] sm:$0xff] }
  0x9e   : > { %859 = vmatpush.msra.mxu1 %v2341_v12  ;;  %3616 = vst [vmem:[#allocation60_spill] sm:$0xff] %v2587_v61 }
  0x9f   : > { %819 = vmatpush.msra.mxu0 %v2356_v17 }
  0xa0   : > { %860 = vmatpush.msra.mxu1 %v2350_v15 }
  0xa1   : > { %820 = vmatpush.msra.mxu0 %v2365_v20 }
  0xa2   : > { %861 = vmatpush.msra.mxu1 %v2359_v18 }
  0xa3   : > { %512 = vmatmul.f32.gmra.mxu2 %v2565_v55  ;;  %821 = vmatpush.msra.mxu0 %v2374_v23 }
  0xa4   : > { %430 = vmatmul.f32.gmra.mxu0 %v2568_v60  ;;  %862 = vmatpush.msra.mxu1 %v2368_v21 }
  0xa5   : > { %471 = vmatmul.f32.gmra.mxu1 %v2571_v63  ;;  %822 = vmatpush.msra.mxu0 %v2383_v26 }
  0xa6   : > { %863 = vmatpush.msra.mxu1 %v2377_v24 }
  0xa7   : > { %823 = vmatpush.msra.mxu0 %v2392_v29 }
  0xa8   : > { %864 = vmatpush.msra.mxu1 %v2386_v27 }
  0xa9   : > { %824 = vmatpush.msra.mxu0 %v2401_v32 }
  0xaa   : > { %865 = vmatpush.msra.mxu1 %v2395_v30 }
  0xab   : > { %515 = vmatmul.f32.gmra.mxu2 %v2584_v58  ;;  %825 = vmatpush.msra.mxu0 %v2410_v35 }
  0xac   : > { %433 = vmatmul.f32.gmra.mxu0 %v2587_v61  ;;  %866 = vmatpush.msra.mxu1 %v2404_v33 }
  0xad   : > { %474 = vmatmul.f32.gmra.mxu1 %v2590_v52  ;;  %826 = vmatpush.msra.mxu0 %v2419_v38 }
  0xae   : > { %867 = vmatpush.msra.mxu1 %v2413_v36 }
  0xaf   : > { %827 = vmatpush.msra.mxu0 %v2428_v41 }
  0xb0   : > { %868 = vmatpush.msra.mxu1 %v2422_v39 }
  0xb1   : > { %828 = vmatpush.msra.mxu0 %v2437_v44 }
  0xb2   : > { %869 = vmatpush.msra.mxu1 %v2431_v42 }
  0xb3   : > { %829 = vmatpush.msra.mxu0 %v2449_v48 }
  0xb4   : > { %870 = vmatpush.msra.mxu1 %v2440_v45 }
  0xf1   : > { %v413_v61 = vpop.f32.mrf.mxu0 }
  0xf2   : > { %v454_v60 = vpop.f32.mrf.mxu1 }
  0xf3   : > { %v455_v12 = vadd.f32 %v454_v60, %v413_v61  ;;  %v3641_v60 = vld [vmem:[#allocation33_spill] sm:$0xff]  ;;  %v2748_v61 = vld [vmem:[%s2650_s21 + $0x18] sm:$0xff] }
  0xf6   : > { %v495_v58 = vpop.f32.mrf.mxu2 }
  0xf9   : > { %v416_v52 = vpop.f32.mrf.mxu0 }
  0xfa   : > { %v457_v55 = vpop.f32.mrf.mxu1 }
  0xfb   : > { %v458_v15 = vadd.f32 %v457_v55, %v416_v52  ;;  %v2726_v52 = vld [vmem:[%s2650_s21] sm:$0xff]  ;;  %v2732_v55 = vld [vmem:[%s2650_s21 + $0x58] sm:$0xff] }
  0xfe   : > { %v498_v63 = vpop.f32.mrf.mxu2 }
 0x101   : > { %v419_v62 = vpop.f32.mrf.mxu0 }
 0x102   : > { %v460_v57 = vpop.f32.mrf.mxu1 }
 0x103   : > { %v461_v18 = vadd.f32 %v460_v57, %v419_v62  ;;  %v3638_v57 = vld [vmem:[#allocation24_spill] sm:$0xff] }
 0x104   : > { %v3643_v62 = vld [vmem:[#allocation28_spill] sm:$0xff] }
 0x106   : > { %v501_v49 = vpop.f32.mrf.mxu2 }
 0x107   : > { %v502_v20 = vadd.f32 %v501_v49, %v461_v18  ;;  %v2642_v18 = vld [vmem:[#allocation2 + $0x20] sm:$0xff]  ;;  %v3632_v49 = vld [vmem:[#allocation25_spill] sm:$0xff] }
 0x108   : > { %3622 = vst [vmem:[#allocation66_spill] sm:$0xff] %v2642_v18 }
 0x109   : > { %v422_v59 = vpop.f32.mrf.mxu0 }
 0x10a   : > { %v463_v54 = vpop.f32.mrf.mxu1 }
 0x10b   : > { %v464_v21 = vadd.f32 %v463_v54, %v422_v59  ;;  %v3636_v54 = vld [vmem:[#allocation29_spill] sm:$0xff]  ;;  %v3640_v59 = vld [vmem:[#allocation26_spill] sm:$0xff] }
 0x10e   : > { %v504_v56 = vpop.f32.mrf.mxu2 }
 0x10f   : > { %v505_v23 = vadd.f32 %v504_v56, %v464_v21  ;;  %v2660_v21 = vld [vmem:[#allocation2 + $0x28] sm:$0xff] }
 0x110   : > { %3623 = vst [vmem:[#allocation67_spill] sm:$0xff] %v2660_v21  ;;  %v2738_v56 = vld [vmem:[%s2650_s21 + $0x68] sm:$0xff] }
 0x111   : > { %v425_v51 = vpop.f32.mrf.mxu0 }
 0x112   : > { %v466_v53 = vpop.f32.mrf.mxu1 }
 0x113   : > { %v467_v24 = vadd.f32 %v466_v53, %v425_v51  ;;  %v3634_v51 = vld [vmem:[#allocation27_spill] sm:$0xff]  ;;  %v3635_v53 = vld [vmem:[#allocation22_spill] sm:$0xff] }
 0x116   : > { %v507_v47 = vpop.f32.mrf.mxu2 }
 0x117   : > { %v508_v26 = vadd.f32 %v507_v47, %v467_v24  ;;  %v2618_v24 = vld [vmem:[#allocation2 + $0x8] sm:$0xff]  ;;  %v2716_v47 = vld [vmem:[%s2650_s21 + $0x50] sm:$0xff] }
 0x118   : > { %3619 = vst [vmem:[#allocation63_spill] sm:$0xff] %v2618_v24 }
 0x119   : > { %v428_v50 = vpop.f32.mrf.mxu0 }
 0x11a   : > { %v469_v39 = vpop.f32.mrf.mxu1 }
 0x11b   : > { %v470_v27 = vadd.f32 %v469_v39, %v428_v50  ;;  %v496_v39 = vadd.f32 %v495_v58, %v455_v12  ;;  %v2626_v12 = vld [vmem:[#allocation2 + $0x10] sm:$0xff]  ;;  %v3633_v50 = vld [vmem:[#allocation20_spill] sm:$0xff]  ;;  %v3639_v58 = vld [vmem:[#allocation31_spill] sm:$0xff] }
 0x11c   : > { %3620 = vst [vmem:[#allocation64_spill] sm:$0xff] %v2626_v12 }
 0x11e   : > { %v510_v42 = vpop.f32.mrf.mxu2 }
 0x11f   : > { %v511_v29 = vadd.f32 %v510_v42, %v470_v27  ;;  %v2681_v27 = vld [vmem:[#allocation2 + $0x30] sm:$0xff] }
 0x120   : > { %3624 = vst [vmem:[#allocation68_spill] sm:$0xff] %v2681_v27  ;;  %v3629_v42 = vld [vmem:[#allocation17_spill] sm:$0xff] }
 0x121   : > { %v431_v48 = vpop.f32.mrf.mxu0 }
 0x122   : > { %v472_v45 = vpop.f32.mrf.mxu1 }
 0x123   : > { %v473_v30 = vadd.f32 %v472_v45, %v431_v48  ;;  %v2709_v45 = vld [vmem:[%s2650_s21 + $0x40] sm:$0xff]  ;;  %v3631_v48 = vld [vmem:[#allocation18_spill] sm:$0xff] }
 0x126   : > { %v513_v36 = vpop.f32.mrf.mxu2 }
 0x127   : > { %v514_v32 = vadd.f32 %v513_v36, %v473_v30  ;;  %v2694_v30 = vld [vmem:[%s2650_s21 + $0x38] sm:$0xff]  ;;  %v3627_v36 = vld [vmem:[#allocation21_spill] sm:$0xff] }
 0x128   : > { %3642 = vst [vmem:[#allocation21_spill] sm:$0xff] %v2748_v61 }
 0x129   : > { %v434_v44 = vpop.f32.mrf.mxu0 }
 0x12a   : > { %v475_v33 = vpop.f32.mrf.mxu1 }
 0x12b   : > { %v476_v41 = vadd.f32 %v475_v33, %v434_v44  ;;  %v499_v33 = vadd.f32 %v498_v63, %v458_v15  ;;  %v2634_v15 = vld [vmem:[#allocation2 + $0x18] sm:$0xff]  ;;  %v3630_v44 = vld [vmem:[#allocation23_spill] sm:$0xff] }
 0x12c   : > { %3621 = vst [vmem:[#allocation65_spill] sm:$0xff] %v2634_v15  ;;  %v3644_v63 = vld [vmem:[#allocation35_spill] sm:$0xff] }
 0x12e   : > { %v516_v38 = vpop.f32.mrf.mxu2 }
 0x12f   : > { %v517_v35 = vadd.f32 %v516_v38, %v476_v41  ;;  %v2612_v38 = vld [vmem:[#allocation2] sm:$0xff]  ;;  %v2703_v41 = vld [vmem:[#allocation2 + $0x38] sm:$0xff] }
 0x130   : > { %3618 = vst [vmem:[#allocation62_spill] sm:$0xff] %v2612_v38 }
 0x131   : > { %552 = vmatpush.msra.mxu3 %v517_v35  ;;  %v3626_v35 = vld [vmem:[#allocation16_spill] sm:$0xff] }
 0x132   : > { %3637 = vst [vmem:[#allocation16_spill] sm:$0xff] %v2738_v56 }
 0x133   : > { %553 = vmatpush.msra.mxu3 %v514_v32  ;;  %v3625_v32 = vld [vmem:[#allocation19_spill] sm:$0xff] }
 0x134   : > { %3628 = vst [vmem:[#allocation19_spill] sm:$0xff] %v2703_v41 }
 0x135   : > { %554 = vmatpush.msra.mxu3 %v511_v29  ;;  %v2687_v29 = vld [vmem:[%s2650_s21 + $0x28] sm:$0xff] }
 0x137   : > { %555 = vmatpush.msra.mxu3 %v508_v26  ;;  %v2672_v26 = vld [vmem:[%s2650_s21 + $0x20] sm:$0xff] }
 0x139   : > { %556 = vmatpush.msra.mxu3 %v505_v23  ;;  %v2665_v23 = vld [vmem:[%s2650_s21 + $0x10] sm:$0xff] }
 0x13a   : > { %683 = vmatmul.f32.vlgmr.msrb.gmra.mxu1 %v2665_v23 }
 0x13b   : > { %557 = vmatpush.msra.mxu3 %v502_v20  ;;  %v2653_v20 = vld [vmem:[%s2650_s21 + $0x8] sm:$0xff]  ;;  %1043 = vmatpush.msrb.mxu1 %v2308_v0 }
 0x13c   : > { %642 = vmatmul.f32.vlgmr.msrb.gmra.mxu0 %v2653_v20 }
 0x13d   : > { %558 = vmatpush.msra.mxu3 %v499_v33  ;;  %1002 = vmatpush.msrb.mxu0 %v2316_v3  ;;  %v2754_v33 = vld [vmem:[%s2650_s21 + $0x70] sm:$0xff] }
 0x13e   : > { %1044 = vmatpush.msrb.mxu1 %v2310_v1  ;;  %3645 = vst [vmem:[#allocation17_spill] sm:$0xff] %v2754_v33 }
 0x13f   : > { %559 = vmatpush.msra.mxu3 %v496_v39  ;;  %1003 = vmatpush.msrb.mxu0 %v2323_v6  ;;  %v2760_v39 = vld [vmem:[%s2650_s21 + $0x80] sm:$0xff] }
 0x140   : > { %1762 = vmatmul.msk.f32.vlgmr.msra.gmra.mxu3 %vm519_vm0, %v2612_v38  ;;  %1045 = vmatpush.msrb.mxu1 %v2321_v5  ;;  %3646 = vst [vmem:[#allocation23_spill] sm:$0xff] %v2760_v39  ;;  %v3654_v38 = vld [vmem:[#allocation36_spill] sm:$0xff] }
 0x141   : > { %585 = vmatpush.msrb.mxu3 %v2312_v2  ;;  %1004 = vmatpush.msrb.mxu0 %v2329_v8 }
 0x142   : > { %686 = vmatmul.f32.gmra.mxu1 %v2687_v29 }
 0x143   : > { %586 = vmatpush.msrb.mxu3 %v2318_v4  ;;  %1005 = vmatpush.msrb.mxu0 %v2338_v11 }
 0x144   : > { %645 = vmatmul.f32.gmra.mxu0 %v2672_v26  ;;  %1046 = vmatpush.msrb.mxu1 %v2332_v9 }
 0x145   : > { %587 = vmatpush.msrb.mxu3 %v2325_v7  ;;  %1006 = vmatpush.msrb.mxu0 %v2347_v14 }
 0x146   : > { %1047 = vmatpush.msrb.mxu1 %v3626_v35 }
 0x147   : > { %588 = vmatpush.msrb.mxu3 %v2334_v10  ;;  %1007 = vmatpush.msrb.mxu0 %v2356_v17 }
 0x148   : > { %1763 = vmatmul.msk.f32.gmra.mxu3 %vm519_vm0, %v2618_v24  ;;  %1048 = vmatpush.msrb.mxu1 %v3629_v42  ;;  %v2780_v24 = vld [vmem:[%s2650_s21 + $0x98] sm:$0xff] }
 0x149   : > { %589 = vmatpush.msrb.mxu3 %v2343_v13  ;;  %1008 = vmatpush.msrb.mxu0 %v3625_v32  ;;  %3653 = vst [vmem:[#allocation20_spill] sm:$0xff] %v2780_v24 }
 0x14a   : > { %689 = vmatmul.f32.gmra.mxu1 %v2709_v45 }
 0x14b   : > { %590 = vmatpush.msrb.mxu3 %v2352_v16  ;;  %1009 = vmatpush.msrb.mxu0 %v3627_v36 }
 0x14c   : > { %648 = vmatmul.f32.gmra.mxu0 %v2694_v30  ;;  %1049 = vmatpush.msrb.mxu1 %v3631_v48 }
 0x14d   : > { %591 = vmatpush.msrb.mxu3 %v2361_v19  ;;  %1010 = vmatpush.msrb.mxu0 %v3630_v44 }
 0x14e   : > { %1050 = vmatpush.msrb.mxu1 %v3633_v50 }
 0x14f   : > { %592 = vmatpush.msrb.mxu3 %v2370_v22  ;;  %1011 = vmatpush.msrb.mxu0 %v3632_v49 }
 0x150   : > { %1764 = vmatmul.msk.f32.gmra.mxu3 %vm519_vm0, %v2626_v12  ;;  %1051 = vmatpush.msrb.mxu1 %v3635_v53  ;;  %v2774_v12 = vld [vmem:[%s2650_s21 + $0x88] sm:$0xff] }
 0x151   : > { %593 = vmatpush.msrb.mxu3 %v2379_v25  ;;  %1012 = vmatpush.msrb.mxu0 %v3634_v51  ;;  %3652 = vst [vmem:[#allocation25_spill] sm:$0xff] %v2774_v12 }
 0x152   : > { %692 = vmatmul.f32.gmra.mxu1 %v2732_v55 }
 0x153   : > { %594 = vmatpush.msrb.mxu3 %v2388_v28  ;;  %1013 = vmatpush.msrb.mxu0 %v3636_v54 }
 0x154   : > { %651 = vmatmul.f32.gmra.mxu0 %v2716_v47  ;;  %1052 = vmatpush.msrb.mxu1 %v3638_v57 }
 0x155   : > { %595 = vmatpush.msrb.mxu3 %v2397_v31  ;;  %1014 = vmatpush.msrb.mxu0 %v3639_v58 }
 0x156   : > { %1053 = vmatpush.msrb.mxu1 %v3640_v59 }
 0x157   : > { %596 = vmatpush.msrb.mxu3 %v2406_v34  ;;  %1015 = vmatpush.msrb.mxu0 %v3641_v60 }
 0x158   : > { %1765 = vmatmul.msk.f32.gmra.mxu3 %vm519_vm0, %v2634_v15  ;;  %1054 = vmatpush.msrb.mxu1 %v3643_v62  ;;  %v3651_v15 = vld [vmem:[#allocation34_spill] sm:$0xff] }
 0x159   : > { %597 = vmatpush.msrb.mxu3 %v2415_v37  ;;  %1016 = vmatpush.msrb.mxu0 %v3644_v63 }
 0x15a   : > { %695 = vmatmul.f32.gmra.mxu1 %v2754_v33  ;;  %v2791_v33 = vld [vmem:[%s2650_s21 + $0xa0] sm:$0xff] }
 0x15b   : > { %598 = vmatpush.msrb.mxu3 %v2424_v40  ;;  %3655 = vst [vmem:[#allocation27_spill] sm:$0xff] %v2791_v33 }
 0x15c   : > { %654 = vmatmul.f32.gmra.mxu0 %v2738_v56  ;;  %v2805_v56 = vld [vmem:[%s2650_s21 + $0x60] sm:$0xff] }
 0x15d   : > { %599 = vmatpush.msrb.mxu3 %v2433_v43  ;;  %3658 = vst [vmem:[#allocation29_spill] sm:$0xff] %v2805_v56 }
 0x15f   : > { %600 = vmatpush.msrb.mxu3 %v2442_v46 }
 0x160   : > { %1766 = vmatmul.msk.f32.gmra.mxu3 %vm519_vm0, %v2642_v18  ;;  %v2769_v18 = vld [vmem:[%s2650_s21 + $0x30] sm:$0xff] }
 0x161   : > { %773 = vmatpush.msra.mxu3 %v2312_v2  ;;  %3650 = vst [vmem:[#allocation18_spill] sm:$0xff] %v2769_v18 }
 0x162   : > { %698 = vmatmul.f32.gmra.mxu1 %v2774_v12  ;;  %v3657_v12 = vld [vmem:[#allocation40_spill] sm:$0xff] }
 0x163   : > { %774 = vmatpush.msra.mxu3 %v2318_v4 }
 0x164   : > { %657 = vmatmul.f32.gmra.mxu0 %v2760_v39  ;;  %v2787_v39 = vld [vmem:[%s2650_s21 + $0x48] sm:$0xff] }
 0x165   : > { %775 = vmatpush.msra.mxu3 %v2325_v7 }
 0x167   : > { %776 = vmatpush.msra.mxu3 %v2334_v10 }
 0x168   : > { %1767 = vmatmul.msk.f32.gmra.mxu3 %vm519_vm0, %v2660_v21  ;;  %v3649_v21 = vld [vmem:[#allocation32_spill] sm:$0xff] }
 0x169   : > { %777 = vmatpush.msra.mxu3 %v2343_v13 }
 0x16a   : > { %701 = vmatmul.f32.gmra.mxu1 %v2791_v33 }
 0x16b   : > { %778 = vmatpush.msra.mxu3 %v2352_v16 }
 0x16c   : > { %660 = vmatmul.f32.gmra.mxu0 %v2780_v24  ;;  %v2797_v24 = vld [vmem:[%s2650_s21 + $0xb0] sm:$0xff] }
 0x16d   : > { %779 = vmatpush.msra.mxu3 %v2361_v19  ;;  %3656 = vst [vmem:[#allocation22_spill] sm:$0xff] %v2797_v24 }
 0x16f   : > { %780 = vmatpush.msra.mxu3 %v2370_v22 }
 0x170   : > { %1768 = vmatmul.msk.f32.gmra.mxu3 %vm519_vm0, %v2681_v27  ;;  %v3648_v27 = vld [vmem:[#allocation38_spill] sm:$0xff] }
 0x171   : > { %781 = vmatpush.msra.mxu3 %v2379_v25  ;;  %1017 = vmatpush.msrb.mxu0 %v3648_v27 }
 0x173   : > { %782 = vmatpush.msra.mxu3 %v2388_v28 }
 0x174   : > { %663 = vmatmul.f32.gmra.mxu0 %v2797_v24  ;;  %v3660_v24 = vld [vmem:[#allocation37_spill] sm:$0xff] }
 0x175   : > { %783 = vmatpush.msra.mxu3 %v2397_v31  ;;  %v751_v33 = vmul.f32 %v3660_v24, %v3660_v24 }
 0x177   : > { %784 = vmatpush.msra.mxu3 %v2406_v34 }
 0x178   : > { %1769 = vmatmul.msk.f32.gmra.mxu3 %vm519_vm0, %v2703_v41  ;;  %v3647_v41 = vld [vmem:[#allocation30_spill] sm:$0xff] }
 0x179   : > { %785 = vmatpush.msra.mxu3 %v2415_v37  ;;  %1055 = vmatpush.msrb.mxu1 %v3647_v41 }
 0x17b   : > { %786 = vmatpush.msra.mxu3 %v2424_v40  ;;  %1056 = vmatpush.msrb.mxu1 %v3649_v21 }
 0x17d   : > { %787 = vmatpush.msra.mxu3 %v2433_v43  ;;  %1057 = vmatpush.msrb.mxu1 %v3651_v15 }
 0x17f   : > { %788 = vmatpush.msra.mxu3 %v2442_v46  ;;  %1058 = vmatpush.msrb.mxu1 %v3654_v38 }
 0x180   : > { %601 = vmatmul.f32.vlgmr.msrb.gmra.mxu3 %v2726_v52 }
 0x181   : > { %961 = vmatpush.msrb.mxu3 %v2312_v2 }
 0x183   : > { %962 = vmatpush.msrb.mxu3 %v2318_v4 }
 0x185   : > { %963 = vmatpush.msrb.mxu3 %v2325_v7 }
 0x187   : > { %964 = vmatpush.msrb.mxu3 %v2334_v10 }
 0x188   : > { %604 = vmatmul.f32.gmra.mxu3 %v2748_v61  ;;  %v2808_v61 = vld [vmem:[%s2650_s21 + $0xb8] sm:$0xff] }
 0x189   : > { %965 = vmatpush.msrb.mxu3 %v2343_v13  ;;  %3659 = vst [vmem:[#allocation24_spill] sm:$0xff] %v2808_v61  ;;  %704 = vmatmul.f32.gmra.mxu1 %v2808_v61  ;;  %v3661_v61 = vld [vmem:[#allocation43_spill] sm:$0xff] }
 0x18b   : > { %966 = vmatpush.msrb.mxu3 %v2352_v16 }
 0x18d   : > { %967 = vmatpush.msrb.mxu3 %v2361_v19 }
 0x18f   : > { %968 = vmatpush.msrb.mxu3 %v2370_v22 }
 0x190   : > { %607 = vmatmul.f32.gmra.mxu3 %v2769_v18  ;;  %v750_v18 = vmul.f32 %v3657_v12, %v3657_v12  ;;  %v2819_v12 = vld [vmem:[%s2650_s21 + $0x78] sm:$0xff] }
 0x191   : > { %969 = vmatpush.msrb.mxu3 %v2379_v25  ;;  %871 = vmatmul.f32.vlgmr.msra.gmra.mxu1 %v751_v33  ;;  %v3685_v33 = vld [vmem:[#allocation54_spill] sm:$0xff] }
 0x192   : > { %830 = vmatmul.f32.vlgmr.msra.gmra.mxu0 %v750_v18  ;;  %1231 = vmatpush.msra.mxu1 %v2308_v0  ;;  %v753_v18 = vmul.f32 %v3661_v61, %v3661_v61  ;;  %v3663_v0 = vld [vmem:[#allocation46_spill] sm:$0xff] }
 0x193   : > { %970 = vmatpush.msrb.mxu3 %v2388_v28  ;;  %1190 = vmatpush.msra.mxu0 %v2316_v3  ;;  %v2830_v3 = vld [vmem:[%s2650_s21 + $0x90] sm:$0xff] }
 0x194   : > { %1232 = vmatpush.msra.mxu1 %v2310_v1  ;;  %v756_v1 = vmul.f32 %v3663_v0, %v3663_v0 }
 0x195   : > { %971 = vmatpush.msrb.mxu3 %v2397_v31  ;;  %1191 = vmatpush.msra.mxu0 %v2323_v6  ;;  %v3662_v6 = vld [vmem:[#allocation41_spill] sm:$0xff] }
 0x196   : > { %1233 = vmatpush.msra.mxu1 %v2321_v5  ;;  %v2845_v5 = vld [vmem:[%s2650_s21 + $0xa8] sm:$0xff] }
 0x197   : > { %972 = vmatpush.msrb.mxu3 %v2406_v34  ;;  %1192 = vmatpush.msra.mxu0 %v2329_v8  ;;  %v754_v8 = vmul.f32 %v3662_v6, %v3662_v6 }
 0x198   : > { %610 = vmatmul.f32.gmra.mxu3 %v2787_v39  ;;  %1234 = vmatpush.msra.mxu1 %v2332_v9  ;;  %v3664_v9 = vld [vmem:[#allocation44_spill] sm:$0xff] }
 0x199   : > { %973 = vmatpush.msrb.mxu3 %v2415_v37  ;;  %1193 = vmatpush.msra.mxu0 %v2338_v11  ;;  %v757_v11 = vmul.f32 %v3664_v9, %v3664_v9 }
 0x19a   : > { %833 = vmatmul.f32.gmra.mxu0 %v753_v18  ;;  %874 = vmatmul.f32.gmra.mxu1 %v754_v8  ;;  %v764_v18 = vmul.f32 %v3685_v33, %v3685_v33 }
 0x19b   : > { %974 = vmatpush.msrb.mxu3 %v2424_v40  ;;  %1194 = vmatpush.msra.mxu0 %v2347_v14  ;;  %v3665_v14 = vld [vmem:[#allocation49_spill] sm:$0xff] }
 0x19c   : > { %1235 = vmatpush.msra.mxu1 %v3626_v35 }
 0x19d   : > { %975 = vmatpush.msrb.mxu3 %v2433_v43  ;;  %1195 = vmatpush.msra.mxu0 %v2356_v17  ;;  %v759_v17 = vmul.f32 %v3665_v14, %v3665_v14 }
 0x19e   : > { %1236 = vmatpush.msra.mxu1 %v3629_v42 }
 0x19f   : > { %976 = vmatpush.msrb.mxu3 %v2442_v46  ;;  %1196 = vmatpush.msra.mxu0 %v3625_v32  ;;  %v3666_v32 = vld [vmem:[#allocation39_spill] sm:$0xff] }
 0x1a0   : > { %613 = vmatmul.f32.gmra.mxu3 %v2805_v56  ;;  %1237 = vmatpush.msra.mxu1 %v3631_v48  ;;  %v749_v35 = vmul.f32 %v3666_v32, %v3666_v32  ;;  %v3669_v48 = vld [vmem:[#allocation52_spill] sm:$0xff] }
 0x1a1   : > { %1197 = vmatpush.msra.mxu0 %v3627_v36  ;;  %v3667_v36 = vld [vmem:[#allocation47_spill] sm:$0xff] }
 0x1a2   : > { %836 = vmatmul.f32.gmra.mxu0 %v756_v1  ;;  %1238 = vmatpush.msra.mxu1 %v3633_v50  ;;  %v760_v42 = vmul.f32 %v3667_v36, %v3667_v36  ;;  %v3670_v50 = vld [vmem:[#allocation42_spill] sm:$0xff]  ;;  %v3687_v1 = vld [vmem:[#allocation57_spill] sm:$0xff] }
 0x1a3   : > { %1198 = vmatpush.msra.mxu0 %v3630_v44  ;;  %877 = vmatmul.f32.gmra.mxu1 %v757_v11  ;;  %v767_v11 = vmul.f32 %v3687_v1, %v3687_v1  ;;  %v3700_v1 = vld [vmem:[#allocation24_spill] sm:$0xff] }
 0x1a4   : > { %1239 = vmatpush.msra.mxu1 %v3635_v53  ;;  %v3674_v53 = vld [vmem:[#allocation45_spill] sm:$0xff]  ;;  %v960_v33 = vmul.f32 %v3700_v1, %v3700_v1 }
 0x1a5   : > { %1199 = vmatpush.msra.mxu0 %v3632_v49  ;;  %v762_v49 = vmul.f32 %v3669_v48, %v3669_v48 }
 0x1a6   : > { %1240 = vmatpush.msra.mxu1 %v3638_v57 }
 0x1a7   : > { %1200 = vmatpush.msra.mxu0 %v3634_v51  ;;  %v752_v51 = vmul.f32 %v3670_v50, %v3670_v50 }
 0x1a8   : > { %616 = vmatmul.f32.gmra.mxu3 %v2819_v12  ;;  %1241 = vmatpush.msra.mxu1 %v3640_v59  ;;  %v3682_v59 = vld [vmem:[#allocation51_spill] sm:$0xff] }
 0x1a9   : > { %1201 = vmatpush.msra.mxu0 %v3636_v54  ;;  %v3678_v54 = vld [vmem:[#allocation48_spill] sm:$0xff] }
 0x1aa   : > { %839 = vmatmul.f32.gmra.mxu0 %v759_v17  ;;  %1242 = vmatpush.msra.mxu1 %v3643_v62  ;;  %v758_v57 = vmul.f32 %v3678_v54, %v3678_v54  ;;  %v941_v17 = vmul.f32 %v2672_v26, %v2672_v26  ;;  %v937_v54 = vmul.f32 %v2726_v52, %v2726_v52 }
 0x1ab   : > { %880 = vmatmul.f32.gmra.mxu1 %v760_v42  ;;  %1202 = vmatpush.msra.mxu0 %v3639_v58  ;;  %v3681_v58 = vld [vmem:[#allocation61_spill] sm:$0xff]  ;;  %v942_v42 = vmul.f32 %v2687_v29, %v2687_v29 }
 0x1ac   : > { %1243 = vmatpush.msra.mxu1 %v3647_v41 }
 0x1ad   : > { %1203 = vmatpush.msra.mxu0 %v3641_v60  ;;  %v761_v60 = vmul.f32 %v3682_v59, %v3682_v59 }
 0x1ae   : > { %1244 = vmatpush.msra.mxu1 %v3649_v21 }
 0x1af   : > { %1204 = vmatpush.msra.mxu0 %v3644_v63 }
 0x1b0   : > { %619 = vmatmul.f32.gmra.mxu3 %v2830_v3  ;;  %1245 = vmatpush.msra.mxu1 %v3651_v15  ;;  %v755_v15 = vmul.f32 %v3674_v53, %v3674_v53 }
 0x1b1   : > { %1205 = vmatpush.msra.mxu0 %v3648_v27  ;;  %v3677_v27 = vld [vmem:[#allocation58_spill] sm:$0xff] }
 0x1b2   : > { %842 = vmatmul.f32.gmra.mxu0 %v762_v49  ;;  %1246 = vmatpush.msra.mxu1 %v3654_v38 }
 0x1b7   : > { %v684_v8 = vpop.f32.mrf.mxu1 }
 0x1b8   : > { %622 = vmatmul.f32.gmra.mxu3 %v2845_v5 }
 0x1b9   : > { %v643_v63 = vpop.f32.mrf.mxu0 }
 0x1c0   : > { %789 = vmatmul.f32.vlgmr.msra.gmra.mxu3 %v749_v35  ;;  %v2938_v35 = vpop.f32.mrf.mxu1 }
 0x1c1   : > { %1149 = vmatpush.msra.mxu3 %v2312_v2  ;;  %v3671_v2 = vld [vmem:[#allocation50_spill] sm:$0xff] }
 0x1c2   : > { %v763_v41 = vmul.f32 %v3671_v2, %v3671_v2 }
 0x1c3   : > { %v2869_v44 = vpop.f32.mrf.mxu3  ;;  %1150 = vmatpush.msra.mxu3 %v2318_v4 }
 0x1c4   : > { %3668 = vst [vmem:[#allocation31_spill] sm:$0xff] %v2869_v44  ;;  %883 = vmatmul.f32.gmra.mxu1 %v763_v41 }
 0x1c5   : > { %1151 = vmatpush.msra.mxu3 %v2325_v7  ;;  %v3673_v7 = vld [vmem:[#allocation55_spill] sm:$0xff] }
 0x1c6   : > { %v765_v21 = vmul.f32 %v3673_v7, %v3673_v7 }
 0x1c7   : > { %1152 = vmatpush.msra.mxu3 %v2334_v10  ;;  %v3675_v10 = vld [vmem:[#allocation53_spill] sm:$0xff] }
 0x1c8   : > { %792 = vmatmul.f32.gmra.mxu3 %v752_v51  ;;  %845 = vmatmul.f32.gmra.mxu0 %v765_v21  ;;  %v3689_v51 = vld [vmem:[#allocation60_spill] sm:$0xff]  ;;  %v944_v21 = vmul.f32 %v2694_v30, %v2694_v30  ;;  %v2950_v53 = vpop.f32.mrf.mxu1 }
 0x1c9   : > { %1153 = vmatpush.msra.mxu3 %v2343_v13  ;;  %v766_v13 = vmul.f32 %v3675_v10, %v3675_v10  ;;  %v770_v41 = vmul.f32 %v3689_v51, %v3689_v51 }
 0x1cb   : > { %v2887_v4 = vpop.f32.mrf.mxu3  ;;  %1154 = vmatpush.msra.mxu3 %v2352_v16  ;;  %v768_v16 = vmul.f32 %v3677_v27, %v3677_v27 }
 0x1cc   : > { %3672 = vst [vmem:[#allocation26_spill] sm:$0xff] %v2887_v4  ;;  %886 = vmatmul.f32.gmra.mxu1 %v766_v13 }
 0x1cd   : > { %1155 = vmatpush.msra.mxu3 %v2361_v19  ;;  %v3679_v19 = vld [vmem:[#allocation56_spill] sm:$0xff] }
 0x1cf   : > { %1156 = vmatpush.msra.mxu3 %v2370_v22  ;;  %v769_v22 = vmul.f32 %v3679_v19, %v3679_v19 }
 0x1d0   : > { %795 = vmatmul.f32.gmra.mxu3 %v755_v15  ;;  %848 = vmatmul.f32.gmra.mxu0 %v768_v16  ;;  %v945_v15 = vmul.f32 %v2709_v45, %v2709_v45 }
 0x1d1   : > { %1157 = vmatpush.msra.mxu3 %v2379_v25 }
 0x1d3   : > { %v2899_v38 = vpop.f32.mrf.mxu3  ;;  %1158 = vmatpush.msra.mxu3 %v2388_v28  ;;  %v771_v28 = vmul.f32 %v3681_v58, %v3681_v58  ;;  %v1127_v58 = vmul.f32 %v2665_v23, %v3660_v24  ;;  %v1130_v24 = vmul.f32 %v2687_v29, %v3662_v6  ;;  %v1125_v6 = vmul.f32 %v2726_v52, %v3666_v32 }
 0x1d4   : > { %3676 = vst [vmem:[#allocation33_spill] sm:$0xff] %v2899_v38  ;;  %889 = vmatmul.f32.gmra.mxu1 %v769_v22  ;;  %v2962_v22 = vpop.f32.mrf.mxu1 }
 0x1d5   : > { %1159 = vmatpush.msra.mxu3 %v2397_v31  ;;  %v3683_v31 = vld [vmem:[#allocation59_spill] sm:$0xff] }
 0x1d6   : > { %v772_v62 = vmul.f32 %v3683_v31, %v3683_v31 }
 0x1d7   : > { %1160 = vmatpush.msra.mxu3 %v2406_v34  ;;  %v938_v34 = vmul.f32 %v2653_v20, %v2653_v20 }
 0x1d8   : > { %798 = vmatmul.f32.gmra.mxu3 %v758_v57  ;;  %851 = vmatmul.f32.gmra.mxu0 %v771_v28  ;;  %v947_v57 = vmul.f32 %v2716_v47, %v2716_v47  ;;  %v948_v28 = vmul.f32 %v2732_v55, %v2732_v55 }
 0x1d9   : > { %1161 = vmatpush.msra.mxu3 %v2415_v37 }
 0x1db   : > { %v2911_v25 = vpop.f32.mrf.mxu3  ;;  %1162 = vmatpush.msra.mxu3 %v2424_v40  ;;  %v939_v40 = vmul.f32 %v2665_v23, %v2665_v23 }
 0x1dc   : > { %3680 = vst [vmem:[#allocation28_spill] sm:$0xff] %v2911_v25  ;;  %892 = vmatmul.f32.gmra.mxu1 %v772_v62  ;;  %v3698_v25 = vld [vmem:[#allocation27_spill] sm:$0xff] }
 0x1dd   : > { %1163 = vmatpush.msra.mxu3 %v2433_v43  ;;  %v957_v38 = vmul.f32 %v3698_v25, %v3698_v25 }
 0x1df   : > { %1164 = vmatpush.msra.mxu3 %v2442_v46  ;;  %v2932_v46 = vpop.f32.mrf.mxu0 }
 0x1e0   : > { %801 = vmatmul.f32.gmra.mxu3 %v761_v60  ;;  %1018 = vmatmul.f32.vlgmr.msrb.gmra.mxu0 %v938_v34  ;;  %v3691_v34 = vld [vmem:[#allocation21_spill] sm:$0xff] }
 0x1e3   : > { %v2924_v37 = vpop.f32.mrf.mxu3 }
 0x1e4   : > { %3684 = vst [vmem:[#allocation35_spill] sm:$0xff] %v2924_v37  ;;  %1059 = vmatmul.f32.vlgmr.msrb.gmra.mxu1 %v939_v40  ;;  %v940_v40 = vmul.f32 %v3691_v34, %v3691_v34 }
 0x1e7   : > { %v2944_v50 = vpop.f32.mrf.mxu0 }
 0x1e8   : > { %804 = vmatmul.f32.gmra.mxu3 %v764_v18  ;;  %1021 = vmatmul.f32.gmra.mxu0 %v941_v17  ;;  %v3692_v18 = vld [vmem:[#allocation16_spill] sm:$0xff]  ;;  %v2972_v17 = vpop.f32.mrf.mxu1 }
 0x1eb   : > { %v2930_v43 = vpop.f32.mrf.mxu3 }
 0x1ec   : > { %3686 = vst [vmem:[#allocation30_spill] sm:$0xff] %v2930_v43  ;;  %1062 = vmatmul.f32.gmra.mxu1 %v942_v42  ;;  %v3693_v42 = vld [vmem:[#allocation17_spill] sm:$0xff] }
 0x1ef   : > { %v2956_v16 = vpop.f32.mrf.mxu0 }
 0x1f0   : > { %807 = vmatmul.f32.gmra.mxu3 %v767_v11  ;;  %1024 = vmatmul.f32.gmra.mxu0 %v944_v21  ;;  %v950_v11 = vmul.f32 %v3692_v18, %v3692_v18 }
 0x1f3   : > { %v2942_v49 = vpop.f32.mrf.mxu3 }
 0x1f4   : > { %3688 = vst [vmem:[#allocation38_spill] sm:$0xff] %v2942_v49  ;;  %1065 = vmatmul.f32.gmra.mxu1 %v945_v15 }
 0x1f7   : > { %v2966_v60 = vpop.f32.mrf.mxu0 }
 0x1f8   : > { %810 = vmatmul.f32.gmra.mxu3 %v770_v41  ;;  %1027 = vmatmul.f32.gmra.mxu0 %v947_v57  ;;  %v951_v41 = vmul.f32 %v3693_v42, %v3693_v42 }
 0x1fb   : > { %v2954_v13 = vpop.f32.mrf.mxu3 }
 0x1fc   : > { %3690 = vst [vmem:[#allocation32_spill] sm:$0xff] %v2954_v13  ;;  %1068 = vmatmul.f32.gmra.mxu1 %v948_v28  ;;  %v3695_v28 = vld [vmem:[#allocation23_spill] sm:$0xff]  ;;  %v2984_v13 = vpop.f32.mrf.mxu1 }
 0x200   : > { %977 = vmatmul.f32.vlgmr.msrb.gmra.mxu3 %v937_v54  ;;  %1030 = vmatmul.f32.gmra.mxu0 %v950_v11  ;;  %v658_v54 = vpop.f32.mrf.mxu0  ;;  %v3696_v11 = vld [vmem:[#allocation25_spill] sm:$0xff] }
 0x201   : > { %v954_v49 = vmul.f32 %v3696_v11, %v3696_v11 }
 0x203   : > { %v602_v59 = vpop.f32.mrf.mxu3 }
 0x204   : > { %v644_v62 = vadd.f32 %v643_v63, %v602_v59  ;;  %1071 = vmatmul.f32.gmra.mxu1 %v951_v41  ;;  %v3694_v63 = vld [vmem:[#allocation18_spill] sm:$0xff]  ;;  %v953_v59 = vmul.f32 %v3695_v28, %v3695_v28  ;;  %v3697_v41 = vld [vmem:[#allocation20_spill] sm:$0xff]  ;;  %v702_v37 = vpop.f32.mrf.mxu1 }
 0x205   : > { %v943_v57 = vmul.f32 %v3694_v63, %v3694_v63  ;;  %v956_v43 = vmul.f32 %v3697_v41, %v3697_v41 }
 0x206   : > { %v2976_v21 = vadd.f32 %v684_v8, %v644_v62 }
 0x208   : > { %980 = vmatmul.f32.gmra.mxu3 %v940_v40  ;;  %1033 = vmatmul.f32.gmra.mxu0 %v953_v59  ;;  %v661_v62 = vpop.f32.mrf.mxu0  ;;  %v946_v40 = vmul.f32 %v2787_v39, %v2787_v39 }
 0x20b   : > { %v2978_v15 = vpop.f32.mrf.mxu3 }
 0x20c   : > { %1074 = vmatmul.f32.gmra.mxu1 %v954_v49  ;;  %v949_v49 = vmul.f32 %v2805_v56, %v2805_v56  ;;  %v705_v51 = vpop.f32.mrf.mxu1  ;;  %v952_v56 = vmul.f32 %v2819_v12, %v2819_v12 }
 0x210   : > { %983 = vmatmul.f32.gmra.mxu3 %v943_v57  ;;  %1036 = vmatmul.f32.gmra.mxu0 %v956_v43  ;;  %v664_v4 = vpop.f32.mrf.mxu0  ;;  %v3699_v57 = vld [vmem:[#allocation22_spill] sm:$0xff]  ;;  %v3701_v43 = vld [vmem:[#allocation40_spill] sm:$0xff] }
 0x211   : > { %v959_v44 = vmul.f32 %v3699_v57, %v3699_v57  ;;  %v1126_v31 = vmul.f32 %v2653_v20, %v3701_v43  ;;  %v1129_v20 = vmul.f32 %v2672_v26, %v3661_v61  ;;  %v1133_v26 = vmul.f32 %v2709_v45, %v3664_v9 }
 0x212   : > { %v1136_v45 = vmul.f32 %v2732_v55, %v3667_v36  ;;  %v1903_v36 = vld [vmem:[%s2302_s5 + $0x18] sm:$0xff] }
 0x213   : > { %v2988_v8 = vpop.f32.mrf.mxu3 }
 0x214   : > { %1077 = vmatmul.f32.gmra.mxu1 %v957_v38  ;;  %v872_v25 = vpop.f32.mrf.mxu1 }
 0x218   : > { %986 = vmatmul.f32.gmra.mxu3 %v946_v40  ;;  %1039 = vmatmul.f32.gmra.mxu0 %v959_v44  ;;  %v831_v38 = vpop.f32.mrf.mxu0 }
 0x21b   : > { %v611_v59 = vpop.f32.mrf.mxu3 }
 0x21c   : > { %1080 = vmatmul.f32.gmra.mxu1 %v960_v33  ;;  %v955_v33 = vmul.f32 %v2830_v3, %v2830_v3  ;;  %v653_v52 = vadd.f32 %v2956_v16, %v611_v59  ;;  %v647_v16 = vadd.f32 %v2932_v46, %v2978_v15  ;;  %v1141_v15 = vmul.f32 %v3695_v28, %v3673_v7 }
 0x21d   : > { %v1144_v7 = vmul.f32 %v3697_v41, %v3677_v27  ;;  %v3708_v27 = vld [vmem:[#allocation59_spill] sm:$0xff] }
 0x21e   : > { %v1148_v41 = vmul.f32 %v3700_v1, %v3708_v27 }
 0x220   : > { %989 = vmatmul.f32.gmra.mxu3 %v949_v49  ;;  %1206 = vmatmul.f32.vlgmr.msra.gmra.mxu0 %v1126_v31  ;;  %v3008_v57 = vpop.f32.mrf.mxu0  ;;  %v3014_v49 = vpop.f32.mrf.mxu1  ;;  %v1132_v31 = vmul.f32 %v2694_v30, %v3663_v0 }
 0x223   : > { %v614_v40 = vpop.f32.mrf.mxu3 }
 0x224   : > { %1247 = vmatmul.f32.vlgmr.msra.gmra.mxu1 %v1127_v58  ;;  %v958_v58 = vmul.f32 %v2845_v5, %v2845_v5  ;;  %v656_v9 = vadd.f32 %v2966_v60, %v614_v40  ;;  %v1128_v60 = vmul.f32 %v1903_v36, %v3691_v34 }
 0x226   : > { %v697_v55 = vadd.f32 %v2972_v17, %v656_v9  ;;  %v1139_v17 = vmul.f32 %v3693_v42, %v3671_v2  ;;  %v3702_v42 = vld [vmem:[#allocation62_spill] sm:$0xff] }
 0x228   : > { %992 = vmatmul.f32.gmra.mxu3 %v952_v56  ;;  %1209 = vmatmul.f32.gmra.mxu0 %v1129_v20  ;;  %v3018_v56 = vpop.f32.mrf.mxu0  ;;  %v3024_v43 = vpop.f32.mrf.mxu1 }
 0x22b   : > { %v617_v44 = vpop.f32.mrf.mxu3 }
 0x22c   : > { %1250 = vmatmul.f32.gmra.mxu1 %v1130_v24  ;;  %v1135_v24 = vmul.f32 %v2716_v47, %v3665_v14  ;;  %v659_v0 = vadd.f32 %v658_v54, %v617_v44  ;;  %v650_v14 = vadd.f32 %v2944_v50, %v2988_v8  ;;  %v694_v54 = vadd.f32 %v2962_v22, %v653_v52  ;;  %v3705_v44 = vld [vmem:[#allocation29_spill] sm:$0xff] }
 0x22e   : > { %v700_v47 = vadd.f32 %v2984_v13, %v659_v0  ;;  %v691_v34 = vadd.f32 %v2950_v53, %v650_v14  ;;  %v1142_v53 = vmul.f32 %v3696_v11, %v3675_v10  ;;  %v3704_v10 = vld [vmem:[#allocation63_spill] sm:$0xff] }
 0x230   : > { %995 = vmatmul.f32.gmra.mxu3 %v955_v33  ;;  %1212 = vmatmul.f32.gmra.mxu0 %v1132_v31  ;;  %v3028_v61 = vpop.f32.mrf.mxu0  ;;  %v3034_v30 = vpop.f32.mrf.mxu1 }
 0x233   : > { %v620_v23 = vpop.f32.mrf.mxu3 }
 0x234   : > { %1253 = vmatmul.f32.gmra.mxu1 %v1133_v26  ;;  %v662_v33 = vadd.f32 %v661_v62, %v620_v23  ;;  %v1905_v62 = vld [vmem:[%s2302_s5 + $0x48] sm:$0xff]  ;;  %v3706_v26 = vld [vmem:[#allocation61_spill] sm:$0xff] }
 0x238   : > { %998 = vmatmul.f32.gmra.mxu3 %v958_v58  ;;  %1215 = vmatmul.f32.gmra.mxu0 %v1135_v24  ;;  %v703_v58 = vadd.f32 %v702_v37, %v662_v33  ;;  %v1138_v37 = vmul.f32 %v3692_v18, %v3669_v48  ;;  %v688_v48 = vadd.f32 %v2938_v35, %v647_v16  ;;  %v1904_v18 = vld [vmem:[%s2302_s5 + $0x30] sm:$0xff]  ;;  %v3709_v33 = vld [vmem:[#allocation64_spill] sm:$0xff]  ;;  %v3710_v24 = vld [vmem:[#allocation54_spill] sm:$0xff] }
 0x239   : > { %v1131_v22 = vmul.f32 %v1904_v18, %v3694_v63  ;;  %v1134_v63 = vmul.f32 %v1905_v62, %v2787_v39  ;;  %v3707_v39 = vld [vmem:[#allocation22_spill] sm:$0xff]  ;;  %v1140_v0 = vmul.f32 %v2819_v12, %v3710_v24 }
 0x23b   : > { %v623_v29 = vpop.f32.mrf.mxu3 }
 0x23c   : > { %v665_v20 = vadd.f32 %v664_v4, %v623_v29  ;;  %1256 = vmatmul.f32.gmra.mxu1 %v1136_v45  ;;  %v3043_v4 = vpop.f32.mrf.mxu0  ;;  %v1147_v29 = vmul.f32 %v3707_v39, %v3706_v26  ;;  %v3711_v45 = vld [vmem:[#allocation65_spill] sm:$0xff] }
 0x23e   : > { %v706_v31 = vadd.f32 %v705_v51, %v665_v20 }
 0x240   : > { %716 = vmatpush.msrb.mxu2 %v706_v31  ;;  %1165 = vmatmul.f32.vlgmr.msra.gmra.mxu3 %v1125_v6 }
 0x241   : > { %v3052_v13 = vpop.f32.mrf.mxu1  ;;  %1218 = vmatmul.f32.gmra.mxu0 %v1138_v37 }
 0x242   : > { %717 = vmatpush.msrb.mxu2 %v703_v58  ;;  %v3712_v58 = vld [vmem:[#allocation57_spill] sm:$0xff] }
 0x243   : > { %v790_v32 = vpop.f32.mrf.mxu3  ;;  %v1143_v52 = vmul.f32 %v2830_v3, %v3712_v58 }
 0x244   : > { %v832_v51 = vadd.f32 %v831_v38, %v790_v32  ;;  %718 = vmatpush.msrb.mxu2 %v700_v47  ;;  %1259 = vmatmul.f32.gmra.mxu1 %v1139_v17  ;;  %v1906_v38 = vld [vmem:[%s2302_s5 + $0x60] sm:$0xff]  ;;  %v3713_v47 = vld [vmem:[#allocation66_spill] sm:$0xff] }
 0x245   : > { %v1137_v23 = vmul.f32 %v1906_v38, %v3705_v44 }
 0x246   : > { %v3054_v50 = vadd.f32 %v872_v25, %v832_v51  ;;  %719 = vmatpush.msrb.mxu2 %v697_v55  ;;  %v846_v25 = vpop.f32.mrf.mxu0  ;;  %v3714_v51 = vld [vmem:[#allocation60_spill] sm:$0xff]  ;;  %v3715_v55 = vld [vmem:[#allocation67_spill] sm:$0xff] }
 0x247   : > { %v1146_v12 = vmul.f32 %v2845_v5, %v3714_v51 }
 0x248   : > { %720 = vmatpush.msrb.mxu2 %v694_v54  ;;  %1168 = vmatmul.f32.gmra.mxu3 %v1128_v60 }
 0x249   : > { %v887_v2 = vpop.f32.mrf.mxu1  ;;  %1221 = vmatmul.f32.gmra.mxu0 %v1141_v15 }
 0x24a   : > { %721 = vmatpush.msrb.mxu2 %v691_v34  ;;  %v3716_v34 = vld [vmem:[#allocation68_spill] sm:$0xff] }
 0x24b   : > { %v3061_v46 = vpop.f32.mrf.mxu3 }
 0x24c   : > { %722 = vmatpush.msrb.mxu2 %v688_v48  ;;  %1262 = vmatmul.f32.gmra.mxu1 %v1142_v53 }
 0x24e   : > { %723 = vmatpush.msrb.mxu2 %v2976_v21  ;;  %v849_v8 = vpop.f32.mrf.mxu0  ;;  %v3703_v21 = vld [vmem:[#allocation27_spill] sm:$0xff] }
 0x24f   : > { %1770 = vmatmul.msk.f32.vlgmr.msrb.gmra.mxu2 %vm519_vm0, %v3702_v42  ;;  %v1145_v59 = vmul.f32 %v3703_v21, %v3679_v19  ;;  %v3717_v21 = vld [vmem:[#allocation19_spill] sm:$0xff] }
 0x250   : > { %1171 = vmatmul.f32.gmra.mxu3 %v1131_v22 }
 0x251   : > { %v890_v28 = vpop.f32.mrf.mxu1  ;;  %1224 = vmatmul.f32.gmra.mxu0 %v1144_v7  ;;  %v835_v7 = vadd.f32 %v3008_v57, %v3061_v46 }
 0x253   : > { %v796_v35 = vpop.f32.mrf.mxu3 }
 0x254   : > { %1265 = vmatmul.f32.gmra.mxu1 %v1145_v59 }
 0x256   : > { %v852_v40 = vpop.f32.mrf.mxu0 }
 0x257   : > { %1771 = vmatmul.msk.f32.gmra.mxu2 %vm519_vm0, %v3704_v10 }
 0x258   : > { %1174 = vmatmul.f32.gmra.mxu3 %v1134_v63  ;;  %v838_v63 = vadd.f32 %v3018_v56, %v796_v35 }
 0x259   : > { %v893_v6 = vpop.f32.mrf.mxu1  ;;  %1227 = vmatmul.f32.gmra.mxu0 %v1147_v29 }
 0x25b   : > { %v799_v11 = vpop.f32.mrf.mxu3 }
 0x25c   : > { %1268 = vmatmul.f32.gmra.mxu1 %v1148_v41  ;;  %v841_v22 = vadd.f32 %v3028_v61, %v799_v11  ;;  %v879_v61 = vadd.f32 %v3024_v43, %v838_v63 }
 0x25e   : > { %v1019_v20 = vpop.f32.mrf.mxu0 }
 0x25f   : > { %1772 = vmatmul.msk.f32.gmra.mxu2 %vm519_vm0, %v3709_v33 }
 0x260   : > { %1177 = vmatmul.f32.gmra.mxu3 %v1137_v23 }
 0x261   : > { %v1060_v31 = vpop.f32.mrf.mxu1 }
 0x263   : > { %v802_v19 = vpop.f32.mrf.mxu3 }
 0x264   : > { %v844_v48 = vadd.f32 %v3043_v4, %v802_v19  ;;  %v882_v4 = vadd.f32 %v3034_v30, %v841_v22 }
 0x266   : > { %v3094_v1 = vpop.f32.mrf.mxu0 }
 0x267   : > { %1773 = vmatmul.msk.f32.gmra.mxu2 %vm519_vm0, %v3711_v45 }
 0x268   : > { %1180 = vmatmul.f32.gmra.mxu3 %v1140_v0 }
 0x269   : > { %v3098_v14 = vpop.f32.mrf.mxu1 }
 0x26b   : > { %v805_v9 = vpop.f32.mrf.mxu3 }
 0x26c   : > { %v847_v54 = vadd.f32 %v846_v25, %v805_v9 }
 0x26e   : > { %v3104_v36 = vpop.f32.mrf.mxu0  ;;  %v888_v15 = vadd.f32 %v887_v2, %v847_v54  ;;  %v876_v2 = vadd.f32 %v3014_v49, %v835_v7 }
 0x26f   : > { %1774 = vmatmul.msk.f32.gmra.mxu2 %vm519_vm0, %v3713_v47 }
 0x270   : > { %1183 = vmatmul.f32.gmra.mxu3 %v1143_v52 }
 0x271   : > { %v3106_v60 = vpop.f32.mrf.mxu1 }
 0x273   : > { %v808_v32 = vpop.f32.mrf.mxu3 }
 0x274   : > { %v850_v37 = vadd.f32 %v849_v8, %v808_v32  ;;  %v885_v8 = vadd.f32 %v3052_v13, %v844_v48 }
 0x276   : > { %v891_v18 = vadd.f32 %v890_v28, %v850_v37  ;;  %v1028_v5 = vpop.f32.mrf.mxu0 }
 0x277   : > { %1775 = vmatmul.msk.f32.gmra.mxu2 %vm519_vm0, %v3715_v55 }
 0x278   : > { %1186 = vmatmul.f32.gmra.mxu3 %v1146_v12 }
 0x279   : > { %v1069_v62 = vpop.f32.mrf.mxu1 }
 0x27b   : > { %v811_v3 = vpop.f32.mrf.mxu3 }
 0x27c   : > { %v853_v16 = vadd.f32 %v852_v40, %v811_v3 }
 0x27e   : > { %v894_v17 = vadd.f32 %v893_v6, %v853_v16  ;;  %v1031_v13 = vpop.f32.mrf.mxu0  ;;  %v1907_v16 = vld [vmem:[#allocation2] sm:$0xff] }
 0x27f   : > { %1776 = vmatmul.msk.f32.gmra.mxu2 %vm519_vm0, %v3716_v34 }
 0x280   : > { %904 = vmatpush.msra.mxu2 %v894_v17 }
 0x281   : > { %v1072_v35 = vpop.f32.mrf.mxu1 }
 0x282   : > { %905 = vmatpush.msra.mxu2 %v891_v18  ;;  %v1908_v18 = vld [vmem:[#allocation2 + $0x8] sm:$0xff] }
 0x283   : > { %v978_v53 = vpop.f32.mrf.mxu3 }
 0x284   : > { %v1020_v25 = vadd.f32 %v1019_v20, %v978_v53  ;;  %906 = vmatpush.msra.mxu2 %v888_v15  ;;  %v1909_v15 = vld [vmem:[#allocation2 + $0x10] sm:$0xff] }
 0x286   : > { %v1061_v28 = vadd.f32 %v1060_v31, %v1020_v25  ;;  %907 = vmatpush.msra.mxu2 %v885_v8  ;;  %v1034_v30 = vpop.f32.mrf.mxu0  ;;  %v1910_v8 = vld [vmem:[#allocation2 + $0x18] sm:$0xff] }
 0x287   : > { %1777 = vmatmul.msk.f32.gmra.mxu2 %vm519_vm0, %v3717_v21 }
 0x288   : > { %908 = vmatpush.msra.mxu2 %v882_v4 }
 0x289   : > { %v1075_v46 = vpop.f32.mrf.mxu1 }
 0x28a   : > { %909 = vmatpush.msra.mxu2 %v879_v61 }
 0x28b   : > { %v981_v56 = vpop.f32.mrf.mxu3 }
 0x28c   : > { %910 = vmatpush.msra.mxu2 %v876_v2  ;;  %v1023_v58 = vadd.f32 %v3094_v1, %v981_v56 }
 0x28e   : > { %911 = vmatpush.msra.mxu2 %v3054_v50  ;;  %v1037_v49 = vpop.f32.mrf.mxu0  ;;  %v1064_v37 = vadd.f32 %v3098_v14, %v1023_v58 }
 0x28f   : > { %1778 = vmatmul.msk.f32.vlgmr.msra.gmra.mxu2 %vm519_vm0, %v3702_v42 }
 0x291   : > { %v1078_v59 = vpop.f32.mrf.mxu1 }
 0x293   : > { %v984_v57 = vpop.f32.mrf.mxu3 }
 0x294   : > { %v1026_v31 = vadd.f32 %v3104_v36, %v984_v57 }
 0x296   : > { %v1040_v50 = vpop.f32.mrf.mxu0  ;;  %v1067_v12 = vadd.f32 %v3106_v60, %v1026_v31 }
 0x297   : > { %1779 = vmatmul.msk.f32.gmra.mxu2 %vm519_vm0, %v3704_v10 }
 0x299   : > { %v1081_v38 = vpop.f32.mrf.mxu1 }
 0x29b   : > { %v987_v43 = vpop.f32.mrf.mxu3 }
 0x29c   : > { %v1029_v20 = vadd.f32 %v1028_v5, %v987_v43 }
 0x29e   : > { %v1207_v44 = vpop.f32.mrf.mxu0  ;;  %v1070_v52 = vadd.f32 %v1069_v62, %v1029_v20  ;;  %v1913_v20 = vld [vmem:[#allocation2 + $0x30] sm:$0xff] }
 0x29f   : > { %1780 = vmatmul.msk.f32.gmra.mxu2 %vm519_vm0, %v3709_v33 }
 0x2a1   : > { %v1248_v10 = vpop.f32.mrf.mxu1 }
 0x2a3   : > { %v990_v11 = vpop.f32.mrf.mxu3 }
 0x2a4   : > { %v1032_v33 = vadd.f32 %v1031_v13, %v990_v11 }
 0x2a6   : > { %v3134_v29 = vpop.f32.mrf.mxu0 }
 0x2a7   : > { %1781 = vmatmul.msk.f32.gmra.mxu2 %vm519_vm0, %v3711_v45  ;;  %v1073_v45 = vadd.f32 %v1072_v35, %v1032_v33  ;;  %v1912_v33 = vld [vmem:[#allocation2 + $0x28] sm:$0xff] }
 0x2a9   : > { %v3138_v41 = vpop.f32.mrf.mxu1 }
 0x2ab   : > { %v993_v40 = vpop.f32.mrf.mxu3 }
 0x2ac   : > { %v1035_v6 = vadd.f32 %v1034_v30, %v993_v40 }
 0x2ae   : > { %v1076_v24 = vadd.f32 %v1075_v46, %v1035_v6  ;;  %v1213_v51 = vpop.f32.mrf.mxu0 }
 0x2af   : > { %1782 = vmatmul.msk.f32.gmra.mxu2 %vm519_vm0, %v3713_v47 }
 0x2b1   : > { %v1254_v3 = vpop.f32.mrf.mxu1 }
 0x2b3   : > { %v996_v42 = vpop.f32.mrf.mxu3 }
 0x2b4   : > { %v1038_v26 = vadd.f32 %v1037_v49, %v996_v42 }
 0x2b6   : > { %v1079_v19 = vadd.f32 %v1078_v59, %v1038_v26  ;;  %v1216_v1 = vpop.f32.mrf.mxu0 }
 0x2b7   : > { %1783 = vmatmul.msk.f32.gmra.mxu2 %vm519_vm0, %v3715_v55 }
 0x2b9   : > { %v1257_v48 = vpop.f32.mrf.mxu1 }
 0x2bb   : > { %v999_v23 = vpop.f32.mrf.mxu3 }
 0x2bc   : > { %v1041_v39 = vadd.f32 %v1040_v50, %v999_v23 }
 0x2be   : > { %v1082_v27 = vadd.f32 %v1081_v38, %v1041_v39  ;;  %v1219_v22 = vpop.f32.mrf.mxu0 }
 0x2bf   : > { %1784 = vmatmul.msk.f32.gmra.mxu2 %vm519_vm0, %v3716_v34 }
 0x2c0   : > { %1092 = vmatpush.msrb.mxu2 %v1082_v27  ;;  %v1911_v27 = vld [vmem:[#allocation2 + $0x20] sm:$0xff] }
 0x2c1   : > { %v1260_v14 = vpop.f32.mrf.mxu1 }
 0x2c2   : > { %1093 = vmatpush.msrb.mxu2 %v1079_v19 }
 0x2c3   : > { %v1166_v0 = vpop.f32.mrf.mxu3 }
 0x2c4   : > { %v1208_v9 = vadd.f32 %v1207_v44, %v1166_v0  ;;  %1094 = vmatpush.msrb.mxu2 %v1076_v24  ;;  %v1914_v0 = vld [vmem:[#allocation2 + $0x38] sm:$0xff] }
 0x2c6   : > { %v3142_v32 = vadd.f32 %v1248_v10, %v1208_v9  ;;  %1095 = vmatpush.msrb.mxu2 %v1073_v45  ;;  %v1222_v63 = vpop.f32.mrf.mxu0  ;;  %v3718_v9 = vld [vmem:[#allocation31_spill] sm:$0xff] }
 0x2c7   : > { %1785 = vmatmul.msk.f32.gmra.mxu2 %vm519_vm0, %v3717_v21  ;;  %v1313_v58 = vmul.f32 %v3718_v9, %v3718_v9 }
 0x2c8   : > { %1096 = vmatpush.msrb.mxu2 %v1070_v52 }
 0x2c9   : > { %v1263_v25 = vpop.f32.mrf.mxu1 }
 0x2ca   : > { %1097 = vmatpush.msrb.mxu2 %v1067_v12 }
 0x2cb   : > { %v1169_v36 = vpop.f32.mrf.mxu3 }
 0x2cc   : > { %1098 = vmatpush.msrb.mxu2 %v1064_v37  ;;  %v1211_v44 = vadd.f32 %v3134_v29, %v1169_v36 }
 0x2ce   : > { %1099 = vmatpush.msrb.mxu2 %v1061_v28  ;;  %v1225_v28 = vpop.f32.mrf.mxu0 }
 0x2cf   : > { %1786 = vmatmul.msk.f32.vlgmr.msrb.gmra.mxu2 %vm519_vm0, %v1907_v16 }
 0x2d1   : > { %v1266_v61 = vpop.f32.mrf.mxu1 }
 0x2d2   : > { %v3149_v54 = vpop.f32.mrf.mxu2 }
 0x2d3   : > { %v1172_v17 = vpop.f32.mrf.mxu3  ;;  %v1321_v45 = vmul.f32 %v3149_v54, %v3149_v54 }
 0x2d5   : > { %v1401_v12 = vadd.f32 %v1321_v45, %v1313_v58 }
 0x2d6   : > { %v1228_v13 = vpop.f32.mrf.mxu0 }
 0x2d7   : > { %1787 = vmatmul.msk.f32.gmra.mxu2 %vm519_vm0, %v1908_v18  ;;  %v1409_v37 = vadd.f32 0.0001, %v1401_v12 }
 0x2d9   : > { %v1269_v30 = vpop.f32.mrf.mxu1 }
 0x2da   : > { %v3152_v60 = vpop.f32.mrf.mxu2 }
 0x2db   : > { %v1175_v5 = vpop.f32.mrf.mxu3 }
 0x2dc   : > { %v1217_v50 = vadd.f32 %v1216_v1, %v1175_v5  ;;  %v3719_v1 = vld [vmem:[#allocation26_spill] sm:$0xff] }
 0x2de   : > { %v1258_v10 = vadd.f32 %v1257_v48, %v1217_v50 }
 0x2df   : > { %1788 = vmatmul.msk.f32.gmra.mxu2 %vm519_vm0, %v1909_v15 }
 0x2e2   : > { %v3155_v53 = vpop.f32.mrf.mxu2 }
 0x2e3   : > { %v1178_v62 = vpop.f32.mrf.mxu3 }
 0x2e7   : > { %1789 = vmatmul.msk.f32.gmra.mxu2 %vm519_vm0, %v1910_v8 }
 0x2ea   : > { %v3158_v7 = vpop.f32.mrf.mxu2 }
 0x2eb   : > { %v1181_v4 = vpop.f32.mrf.mxu3 }
 0x2ec   : > { %v1223_v49 = vadd.f32 %v1222_v63, %v1181_v4 }
 0x2ee   : > { %v1264_v40 = vadd.f32 %v1263_v25, %v1223_v49  ;;  %v3720_v25 = vld [vmem:[#allocation33_spill] sm:$0xff]  ;;  %v1324_v49 = vmul.f32 %v3158_v7, %v3158_v7 }
 0x2ef   : > { %1790 = vmatmul.msk.f32.gmra.mxu2 %vm519_vm0, %v3713_v47  ;;  %v1220_v47 = vadd.f32 %v1219_v22, %v1178_v62  ;;  %v1315_v4 = vmul.f32 %v3720_v25, %v3720_v25 }
 0x2f1   : > { %v1261_v42 = vadd.f32 %v1260_v14, %v1220_v47 }
 0x2f2   : > { %v3162_v2 = vpop.f32.mrf.mxu2 }
 0x2f3   : > { %v1184_v56 = vpop.f32.mrf.mxu3 }
 0x2f4   : > { %v1226_v46 = vadd.f32 %v1225_v28, %v1184_v56 }
 0x2f6   : > { %v1267_v11 = vadd.f32 %v1266_v61, %v1226_v46 }
 0x2f7   : > { %1791 = vmatmul.msk.f32.gmra.mxu2 %vm519_vm0, %v3715_v55  ;;  %v1214_v55 = vadd.f32 %v1213_v51, %v1172_v17  ;;  %v1314_v17 = vmul.f32 %v3719_v1, %v3719_v1 }
 0x2f9   : > { %v1255_v23 = vadd.f32 %v1254_v3, %v1214_v55 }
 0x2fa   : > { %v3166_v35 = vpop.f32.mrf.mxu2 }
 0x2fb   : > { %v1187_v57 = vpop.f32.mrf.mxu3 }
 0x2fc   : > { %v1229_v43 = vadd.f32 %v1228_v13, %v1187_v57 }
 0x2fe   : > { %v1270_v59 = vadd.f32 %v1269_v30, %v1229_v43 }
 0x2ff   : > { %1792 = vmatmul.msk.f32.gmra.mxu2 %vm519_vm0, %v3716_v34  ;;  %v1252_v34 = vadd.f32 %v3138_v41, %v1211_v44 }
 0x300   : > { %1280 = vmatpush.msra.mxu2 %v1270_v59  ;;  %v3721_v59 = vld [vmem:[#allocation28_spill] sm:$0xff] }
 0x301   : > { %v1316_v47 = vmul.f32 %v3721_v59, %v3721_v59 }
 0x302   : > { %v3170_v38 = vpop.f32.mrf.mxu2  ;;  %1281 = vmatpush.msra.mxu2 %v1267_v11 }
 0x304   : > { %1282 = vmatpush.msra.mxu2 %v1264_v40 }
 0x306   : > { %1283 = vmatpush.msra.mxu2 %v1261_v42  ;;  %v1404_v42 = vadd.f32 %v1324_v49, %v1316_v47 }
 0x307   : > { %1793 = vmatmul.msk.f32.gmra.mxu2 %vm519_vm0, %v3717_v21 }
 0x308   : > { %1284 = vmatpush.msra.mxu2 %v1258_v10  ;;  %v1412_v10 = vadd.f32 0.0001, %v1404_v42 }
 0x30a   : > { %v3176_v26 = vpop.f32.mrf.mxu2  ;;  %1285 = vmatpush.msra.mxu2 %v1255_v23 }
 0x30c   : > { %1286 = vmatpush.msra.mxu2 %v1252_v34  ;;  %v1325_v34 = vmul.f32 %v3162_v2, %v3162_v2 }
 0x30e   : > { %1287 = vmatpush.msra.mxu2 %v3142_v32 }
 0x30f   : > { %1794 = vmatmul.msk.f32.vlgmr.msra.gmra.mxu2 %vm519_vm0, %v1907_v16  ;;  %v1322_v16 = vmul.f32 %v3152_v60, %v3152_v60 }
 0x311   : > { %v1402_v14 = vadd.f32 %v1322_v16, %v1314_v17 }
 0x312   : > { %v913_v39 = vpop.f32.mrf.mxu2 }
 0x313   : > { %v1337_v32 = vsub.f32 %v913_v39, %v1313_v58  ;;  %v1410_v62 = vadd.f32 0.0001, %v1402_v14  ;;  %v3722_v39 = vld [vmem:[#allocation35_spill] sm:$0xff] }
 0x317   : > { %1795 = vmatmul.msk.f32.gmra.mxu2 %vm519_vm0, %v1908_v18 }
 0x31a   : > { %v916_v29 = vpop.f32.mrf.mxu2 }
 0x31b   : > { %v1338_v5 = vsub.f32 %v916_v29, %v1314_v17  ;;  %v1317_v29 = vmul.f32 %v3722_v39, %v3722_v39 }
 0x31f   : > { %1796 = vmatmul.msk.f32.gmra.mxu2 %vm519_vm0, %v1909_v15 }
 0x322   : > { %v919_v6 = vpop.f32.mrf.mxu2 }
 0x323   : > { %v1339_v56 = vsub.f32 %v919_v6, %v1315_v4 }
 0x327   : > { %1797 = vmatmul.msk.f32.gmra.mxu2 %vm519_vm0, %v1910_v8  ;;  %v1323_v8 = vmul.f32 %v3155_v53, %v3155_v53 }
 0x329   : > { %v1403_v57 = vadd.f32 %v1323_v8, %v1315_v4 }
 0x32a   : > { %v922_v21 = vpop.f32.mrf.mxu2 }
 0x32b   : > { %v1411_v46 = vadd.f32 0.0001, %v1403_v57  ;;  %v1340_v40 = vsub.f32 %v922_v21, %v1316_v47  ;;  %v1328_v57 = vmul.f32 %v3176_v26, %v3176_v26 }
 0x32f   : > { %1798 = vmatmul.msk.f32.gmra.mxu2 %vm519_vm0, %v1911_v27 }
 0x332   : > { %v925_v41 = vpop.f32.mrf.mxu2 }
 0x337   : > { %1799 = vmatmul.msk.f32.gmra.mxu2 %vm519_vm0, %v1912_v33  ;;  %v1341_v33 = vsub.f32 %v925_v41, %v1317_v29 }
 0x33a   : > { %v3185_v19 = vpop.f32.mrf.mxu2 }
 0x33f   : > { %1800 = vmatmul.msk.f32.gmra.mxu2 %vm519_vm0, %v1913_v20 }
 0x342   : > { %v3188_v24 = vpop.f32.mrf.mxu2 }
 0x347   : > { %1801 = vmatmul.msk.f32.gmra.mxu2 %vm519_vm0, %v1914_v0  ;;  %v1405_v0 = vadd.f32 %v1325_v34, %v1317_v29 }
 0x349   : > { %v1413_v58 = vadd.f32 0.0001, %v1405_v0  ;;  %v1561_v0 = vlaneseq }
 0x34a   : > { %v3191_v31 = vpop.f32.mrf.mxu2 }
 0x352   : > { %v1101_v52 = vpop.f32.mrf.mxu2 }
 0x353   : > { %v1345_v51 = vsub.f32 %v1101_v52, %v1321_v45  ;;  %v1326_v52 = vmul.f32 %v3166_v35, %v3166_v35 }
 0x355   : > { %v1417_v3 = vadd.f32 %v1345_v51, %v1337_v32  ;;  %v3723_v32 = vld [vmem:[#allocation30_spill] sm:$0xff] }
 0x356   : > { %v1318_v51 = vmul.f32 %v3723_v32, %v3723_v32 }
 0x357   : > { %v1425_v36 = vadd.f32 0.0009, %v1417_v3 }
 0x359   : > { %v3201_v48 = vmul.f32 %v1425_v36, %v1409_v37  ;;  %v1342_v37 = vsub.f32 %v3185_v19, %v1318_v51 }
 0x35a   : > { %v1104_v18 = vpop.f32.mrf.mxu2 }
 0x35b   : > { %v1346_v22 = vsub.f32 %v1104_v18, %v1322_v16  ;;  %v1406_v16 = vadd.f32 %v1326_v52, %v1318_v51  ;;  %1887 = vrcp.f32 %v3201_v48  ;;  %v1452_v51 = vand.u32 2147483648, %v3201_v48 }
 0x35c   : > { %vm1446_vm2 = vweird.f32 %v3201_v48 }
 0x35d   : > { %v1418_v15 = vadd.f32 %v1346_v22, %v1338_v5  ;;  %v1414_v41 = vadd.f32 0.0001, %v1406_v16  ;;  %v1327_v5 = vmul.f32 %v3170_v38, %v3170_v38  ;;  %v3724_v22 = vld [vmem:[#allocation38_spill] sm:$0xff] }
 0x35e   : > { %v1319_v14 = vmul.f32 %v3724_v22, %v3724_v22 }
 0x35f   : > { %v1426_v63 = vadd.f32 0.0009, %v1418_v15 }
 0x360   : > { %v1407_v19 = vadd.f32 %v1327_v5, %v1319_v14 }
 0x361   : > { %v3207_v28 = vmul.f32 %v1426_v63, %v1410_v62  ;;  %v1343_v63 = vsub.f32 %v3188_v24, %v1319_v14  ;;  %v1888_v4 = vpop.eup %1887 }
 0x362   : > { %v1107_v61 = vpop.f32.mrf.mxu2  ;;  %vm1447_vm1 = vweird.f32 %v1888_v4 }
 0x363   : > { %v1347_v13 = vsub.f32 %v1107_v61, %v1323_v8  ;;  %1889 = vrcp.f32 %v3207_v28  ;;  %vm1448_vm3 = vmor %vm1446_vm2, %vm1447_vm1  ;;  %vm1461_vm7 = vweird.f32 %v3207_v28 }
 0x365   : > { %v1419_v30 = vadd.f32 %v1347_v13, %v1339_v56  ;;  %v1415_v56 = vadd.f32 0.0001, %v1407_v19 }
 0x367   : > { %v1427_v43 = vadd.f32 0.0009, %v1419_v30  ;;  %v1442_v30 = vmul.f32 %v1888_v4, %v3201_v48 }
 0x369   : > { %v3213_v11 = vmul.f32 %v1427_v43, %v1411_v46  ;;  %v3725_v46 = vld [vmem:[#allocation32_spill] sm:$0xff]  ;;  %v3245_v42 = vpop.eup %1889 }
 0x36a   : > { %v1110_v50 = vpop.f32.mrf.mxu2  ;;  %v1320_v43 = vmul.f32 %v3725_v46, %v3725_v46  ;;  %vm1462_vm6 = vweird.f32 %v3245_v42 }
 0x36b   : > { %v1348_v55 = vsub.f32 %v1110_v50, %v1324_v49  ;;  %1891 = vrcp.f32 %v3213_v11  ;;  %vm1463_vm8 = vmor %vm1461_vm7, %vm1462_vm6  ;;  %vm1476_vm11 = vweird.f32 %v3213_v11 }
 0x36c   : > { %v1344_v24 = vsub.f32 %v3191_v31, %v1320_v43 }
 0x36d   : > { %v1420_v44 = vadd.f32 %v1348_v55, %v1340_v40  ;;  %v1408_v40 = vadd.f32 %v1328_v57, %v1320_v43  ;;  %v1443_v55 = vsub.f32 1.0, %v1442_v30  ;;  %v1331_v43 = vmul.f32 %v3155_v53, %v3720_v25 }
 0x36f   : > { %v1428_v23 = vadd.f32 0.0009, %v1420_v44  ;;  %v1444_v29 = vmul.f32 %v1888_v4, %v1443_v55 }
 0x371   : > { %v3219_v6 = vmul.f32 %v1428_v23, %v1412_v10  ;;  %v1329_v10 = vmul.f32 %v3149_v54, %v3718_v9  ;;  %v1416_v23 = vadd.f32 0.0001, %v1408_v40  ;;  %v1450_v9 = vand.u32 2147483647, %v3201_v48 }
 0x372   : > { %v1113_v27 = vpop.f32.mrf.mxu2 }
 0x373   : > { %v1349_v20 = vsub.f32 %v1113_v27, %v1325_v34  ;;  %v1457_v27 = vmul.f32 %v3245_v42, %v3207_v28  ;;  %1893 = vrcp.f32 %v3219_v6  ;;  %vm1451_vm4 = vcmp.eq.f32.partialorder %v1450_v9, 8.507059e+37 }
 0x374   : > { %vm1491_vm15 = vweird.f32 %v3219_v6 }
 0x375   : > { %v1421_v45 = vadd.f32 %v1349_v20, %v1341_v33  ;;  %v1361_v20 = vmul.f32 2.0, %v1329_v10 }
 0x377   : > { %v1429_v21 = vadd.f32 0.0009, %v1421_v45 }
 0x379   : > { %v3225_v12 = vmul.f32 %v1429_v21, %v1413_v58  ;;  %v1445_v58 = vadd.f32 %v1888_v4, %v1444_v29  ;;  %v1458_v21 = vsub.f32 1.0, %v1457_v27 }
 0x37a   : > { %v1116_v3 = vpop.f32.mrf.mxu2 }
 0x37b   : > { %v1350_v36 = vsub.f32 %v1116_v3, %v1326_v52  ;;  %v3254_v52 = vpop.eup %1891  ;;  %v1369_v3 = vadd.f32 0.0001, %v1361_v20  ;;  %1895 = vrcp.f32 %v3225_v12 }
 0x37c   : > { %vm1477_vm10 = vweird.f32 %v3254_v52 }
 0x37d   : > { %v1422_v17 = vadd.f32 %v1350_v36, %v1342_v37  ;;  %v1330_v37 = vmul.f32 %v3152_v60, %v3719_v1  ;;  %v3262_v36 = vand.u32 127, %v1561_v0  ;;  %v1480_v0 = vand.u32 2147483647, %v3213_v11  ;;  %vm1478_vm12 = vmor %vm1476_vm11, %vm1477_vm10 }
 0x37f   : > { %v1430_v18 = vadd.f32 0.0009, %v1422_v17  ;;  %v1449_v17 = vsel %vm1448_vm3, %v1888_v4, %v1445_v58  ;;  %vm1563_vm5 = vcmp.lt.s32.totalorder %v3262_v36, 16  ;;  %v3270_v4 = vpop.eup %1893  ;;  %v1332_v58 = vmul.f32 %v3158_v7, %v3721_v59 }
 0x380   : > { %v1487_v40 = vmul.f32 %v3270_v4, %v3219_v6  ;;  %vm1481_vm13 = vcmp.eq.f32.partialorder %v1480_v0, 8.507059e+37  ;;  %vm1492_vm14 = vweird.f32 %v3270_v4  ;;  %vm1506_vm3 = vweird.f32 %v3225_v12 }
 0x381   : > { %v3233_v15 = vmul.f32 %v1430_v18, %v1414_v41  ;;  %v1459_v41 = vmul.f32 %v3245_v42, %v1458_v21  ;;  %v1472_v18 = vmul.f32 %v3254_v52, %v3213_v11  ;;  %v3288_v27 = vpop.eup %1895  ;;  %vm1493_vm0 = vmor %vm1491_vm15, %vm1492_vm14 }
 0x382   : > { %v1119_v62 = vpop.f32.mrf.mxu2  ;;  %v1488_v29 = vsub.f32 1.0, %v1487_v40  ;;  %v1502_v9 = vmul.f32 %v3288_v27, %v3225_v12  ;;  %vm1507_vm2 = vweird.f32 %v3288_v27 }
 0x383   : > { %v1351_v8 = vsub.f32 %v1119_v62, %v1327_v5  ;;  %v1453_v5 = vor.u32 1.1754944e-38, %v1452_v51  ;;  %v1362_v62 = vmul.f32 2.0, %v1330_v37  ;;  %v1473_v19 = vsub.f32 1.0, %v1472_v18 }
 0x384   : > { %1897 = vrcp.f32 %v3233_v15  ;;  %v1503_v18 = vsub.f32 1.0, %v1502_v9  ;;  %v1335_v9 = vmul.f32 %v3170_v38, %v3724_v22 }
 0x385   : > { %v1423_v61 = vadd.f32 %v1351_v8, %v1343_v63  ;;  %v1454_v63 = vsel %vm1451_vm4, %v1453_v5, %v1449_v17  ;;  %v1460_v8 = vadd.f32 %v3245_v42, %v1459_v41  ;;  %v1370_v30 = vadd.f32 0.0001, %v1362_v62  ;;  %vm1508_vm4 = vmor %vm1506_vm3, %vm1507_vm2 }
 0x386   : > { %v1495_v62 = vand.u32 2147483647, %v3219_v6  ;;  %vm1599_vm3 = vcmask 130112  }
 0x387   : > { %v1431_v13 = vadd.f32 0.0009, %v1423_v61  ;;  %v1467_v61 = vand.u32 2147483648, %v3207_v28 }
 0x388   : > { %vm1496_vm1 = vcmp.eq.f32.partialorder %v1495_v62, 8.507059e+37 }
 0x389   : > { %v3242_v49 = vmul.f32 %v1431_v13, %v1415_v56  ;;  %v1468_v55 = vor.u32 1.1754944e-38, %v1467_v61 }
 0x38a   : > { %v1122_v47 = vpop.f32.mrf.mxu2  ;;  %v3306_v5 = vpop.eup %1897 }
 0x38b   : > { %v1352_v50 = vsub.f32 %v1122_v47, %v1328_v57  ;;  %v1465_v57 = vand.u32 2147483647, %v3207_v28  ;;  %1899 = vrcp.f32 %v3242_v49  ;;  %v1517_v61 = vmul.f32 %v3306_v5, %v3233_v15 }
 0x38c   : > { %vm1522_vm7 = vweird.f32 %v3306_v5  ;;  %v1540_v62 = vand.u32 2147483647, %v3242_v49 }
 0x38d   : > { %v1424_v44 = vadd.f32 %v1352_v50, %v1344_v24  ;;  %v1464_v24 = vsel %vm1463_vm8, %v3245_v42, %v1460_v8  ;;  %v1474_v50 = vmul.f32 %v3254_v52, %v1473_v19  ;;  %vm1466_vm9 = vcmp.eq.f32.partialorder %v1465_v57, 8.507059e+37 }
 0x38e   : > { %v1482_v42 = vand.u32 2147483648, %v3213_v11  ;;  %v1504_v19 = vmul.f32 %v3288_v27, %v1503_v18  ;;  %vm1521_vm8 = vweird.f32 %v3233_v15  ;;  %vm1541_vm14 = vcmp.eq.f32.partialorder %v1540_v62, 8.507059e+37 }
 0x38f   : > { %v1432_v34 = vadd.f32 0.0009, %v1424_v44 }
 0x391   : > { %v3252_v33 = vmul.f32 %v1432_v34, %v1416_v23  ;;  %v1469_v23 = vsel %vm1466_vm9, %v1468_v55, %v1464_v24  ;;  %v1475_v34 = vadd.f32 %v3254_v52, %v1474_v50  ;;  %v3324_v24 = vpop.eup %1899  ;;  %v1510_v55 = vand.u32 2147483647, %v3225_v12  ;;  %vm1523_vm9 = vmor %vm1521_vm8, %vm1522_vm7 }
 0x392   : > { %v1289_v31 = vpop.f32.mrf.mxu2  ;;  %vm1537_vm11 = vweird.f32 %v3324_v24  ;;  %vm1617_vm7 = vcmask 125952  }
 0x393   : > { %v1353_v45 = vsub.f32 %v1289_v31, %v1329_v10  ;;  %v1363_v10 = vmul.f32 2.0, %v1331_v43  ;;  %v1479_v51 = vsel %vm1478_vm12, %v3254_v52, %v1475_v34  ;;  %v1497_v52 = vand.u32 2147483648, %v3219_v6 }
 0x394   : > { %1901 = vrcp.f32 %v3252_v33  ;;  %vm1511_vm6 = vcmp.eq.f32.partialorder %v1510_v55, 8.507059e+37  ;;  %vm1536_vm12 = vweird.f32 %v3242_v49 }
 0x395   : > { %v1377_v54 = vmul.f32 2.0, %v1353_v45  ;;  %v1371_v45 = vadd.f32 0.0001, %v1363_v10 }
 0x397   : > { %v1385_v16 = vadd.f32 0.0009, %v1377_v54  ;;  %v1489_v54 = vmul.f32 %v3270_v4, %v1488_v29 }
 0x399   : > { %v1393_v14 = vmul.f32 %v1385_v16, %v1369_v3  ;;  %v1483_v3 = vor.u32 1.1754944e-38, %v1482_v42  ;;  %v1364_v16 = vmul.f32 2.0, %v1332_v58  ;;  %v1490_v41 = vadd.f32 %v3270_v4, %v1489_v54 }
 0x39a   : > { %v1292_v48 = vpop.f32.mrf.mxu2 }
 0x39b   : > { %v1354_v60 = vsub.f32 %v1292_v48, %v1330_v37  ;;  %v1455_v1 = vmul.f32 %v1454_v63, %v1393_v14  ;;  %v1484_v17 = vsel %vm1481_vm13, %v1483_v3, %v1479_v51  ;;  %v1372_v63 = vadd.f32 0.0001, %v1364_v16  ;;  %vm1538_vm13 = vmor %vm1536_vm12, %vm1537_vm11 }
 0x39c   : > { %v1494_v8 = vsel %vm1493_vm0, %v3270_v4, %v1490_v41  ;;  %v1512_v4 = vand.u32 2147483648, %v3225_v12  ;;  %v1525_v51 = vand.u32 2147483647, %v3233_v15  ;;  %v1367_v41 = vmul.f32 2.0, %v1335_v9 }
 0x39d   : > { %v1378_v56 = vmul.f32 2.0, %v1354_v60  ;;  %v1564_v13 = vsel %vm1563_vm5, %v1455_v1, 0.0  ;;  %v1333_v60 = vmul.f32 %v3162_v2, %v3722_v39  ;;  %vm1551_vm0 = vweird.f32 %v3252_v33 }
 0x39e   : > { %1572 = vadd.xlane.f32.xlu0 %v1564_v13  ;;  %v1513_v34 = vor.u32 1.1754944e-38, %v1512_v4  ;;  %vm1526_vm10 = vcmp.eq.f32.partialorder %v1525_v51, 8.507059e+37 }
 0x39f   : > { %v1386_v47 = vadd.f32 0.0009, %v1378_v56  ;;  %v1498_v56 = vor.u32 1.1754944e-38, %v1497_v52  ;;  %v1365_v57 = vmul.f32 2.0, %v1333_v60 }
 0x3a1   : > { %v1394_v28 = vmul.f32 %v1386_v47, %v1370_v30  ;;  %v1499_v30 = vsel %vm1496_vm1, %v1498_v56, %v1494_v8  ;;  %v1518_v47 = vsub.f32 1.0, %v1517_v61 }
 0x3a2   : > { %v1295_v44 = vpop.f32.mrf.mxu2 }
 0x3a3   : > { %v1355_v53 = vsub.f32 %v1295_v44, %v1331_v43  ;;  %v1470_v25 = vmul.f32 %v1469_v23, %v1394_v28  ;;  %v1505_v43 = vadd.f32 %v3288_v27, %v1504_v19  ;;  %v1373_v28 = vadd.f32 0.0001, %v1365_v57 }
 0x3a4   : > { %v1334_v44 = vmul.f32 %v3166_v35, %v3723_v32 }
 0x3a5   : > { %v1379_v31 = vmul.f32 2.0, %v1355_v53  ;;  %v1565_v20 = vsel %vm1563_vm5, %v1470_v25, 0.0  ;;  %v1509_v23 = vsel %vm1508_vm4, %v3288_v27, %v1505_v43  ;;  %v1519_v53 = vmul.f32 %v3306_v5, %v1518_v47 }
 0x3a6   : > { %1574 = vadd.xlane.f32.xlu0 %v1565_v20  ;;  %v1532_v25 = vmul.f32 %v3324_v24, %v3242_v49  ;;  %v1366_v42 = vmul.f32 2.0, %v1334_v44  ;;  %v1527_v27 = vand.u32 2147483648, %v3233_v15  ;;  %vm1612_vm4 = vcmask 1042434  }
 0x3a7   : > { %v1387_v21 = vadd.f32 0.0009, %v1379_v31  ;;  %v1514_v31 = vsel %vm1511_vm6, %v1513_v34, %v1509_v23  ;;  %v1520_v20 = vadd.f32 %v3306_v5, %v1519_v53  ;;  %vm1614_vm6 = vcmask 1043459  }
 0x3a8   : > { %v1533_v0 = vsub.f32 1.0, %v1532_v25  ;;  %v1374_v54 = vadd.f32 0.0001, %v1366_v42 }
 0x3a9   : > { %v1395_v11 = vmul.f32 %v1387_v21, %v1371_v45  ;;  %v1902_v45 = vpop.eup %1901 }
 0x3aa   : > { %v1298_v37 = vpop.f32.mrf.mxu2  ;;  %v1547_v16 = vmul.f32 %v1902_v45, %v3252_v33  ;;  %vm1552_vm15 = vweird.f32 %v1902_v45 }
 0x3ab   : > { %v1356_v7 = vsub.f32 %v1298_v37, %v1332_v58  ;;  %v1485_v59 = vmul.f32 %v1484_v17, %v1395_v11  ;;  %v1524_v11 = vsel %vm1523_vm9, %v3306_v5, %v1520_v20  ;;  %v1534_v37 = vmul.f32 %v3324_v24, %v1533_v0  ;;  %vm1553_vm1 = vmor %vm1551_vm0, %vm1552_vm15 }
 0x3ac   : > { %v1528_v17 = vor.u32 1.1754944e-38, %v1527_v27  ;;  %v1548_v22 = vsub.f32 1.0, %v1547_v16 }
 0x3ad   : > { %v1380_v14 = vmul.f32 2.0, %v1356_v7  ;;  %v1566_v48 = vsel %vm1563_vm5, %v1485_v59, 0.0  ;;  %v1535_v38 = vadd.f32 %v3324_v24, %v1534_v37 }
 0x3ae   : > { %1576 = vadd.xlane.f32.xlu1 %v1566_v48  ;;  %v1529_v18 = vsel %vm1526_vm10, %v1528_v17, %v1524_v11  ;;  %v1549_v19 = vmul.f32 %v1902_v45, %v1548_v22 }
 0x3af   : > { %v1388_v1 = vadd.f32 0.0009, %v1380_v14  ;;  %v1542_v14 = vand.u32 2147483648, %v3242_v49  ;;  %v1539_v8 = vsel %vm1538_vm13, %v3324_v24, %v1535_v38  ;;  %v1557_v49 = vand.u32 2147483648, %v3252_v33 }
 0x3b1   : > { %v1396_v6 = vmul.f32 %v1388_v1, %v1372_v63  ;;  %v1336_v63 = vmul.f32 %v3176_v26, %v3725_v46  ;;  %v1543_v61 = vor.u32 1.1754944e-38, %v1542_v14  ;;  %v1555_v46 = vand.u32 2147483647, %v3252_v33 }
 0x3b2   : > { %v1301_v13 = vpop.f32.mrf.mxu2  ;;  %v1597_v33 = vadd.s32 4294967288, %v3262_v36 }
 0x3b3   : > { %v1357_v2 = vsub.f32 %v1301_v13, %v1333_v60  ;;  %v1500_v39 = vmul.f32 %v1499_v30, %v1396_v6  ;;  %v1375_v60 = vadd.f32 0.0001, %v1367_v41  ;;  %v1368_v13 = vmul.f32 2.0, %v1336_v63 }
 0x3b4   : > { %v1544_v57 = vsel %vm1541_vm14, %v1543_v61, %v1539_v8  ;;  %vm1556_vm2 = vcmp.eq.f32.partialorder %v1555_v46, 8.507059e+37 }
 0x3b5   : > { %v1381_v50 = vmul.f32 2.0, %v1357_v2  ;;  %v1567_v40 = vsel %vm1563_vm5, %v1500_v39, 0.0  ;;  %v1550_v39 = vadd.f32 %v1902_v45, %v1549_v19  ;;  %v1376_v47 = vadd.f32 0.0001, %v1368_v13 }
 0x3b6   : > { %1578 = vadd.xlane.f32.xlu1 %v1567_v40 }
 0x3b7   : > { %v1389_v10 = vadd.f32 0.0009, %v1381_v50  ;;  %v1554_v4 = vsel %vm1553_vm1, %v1902_v45, %v1550_v39  ;;  %v1558_v50 = vor.u32 1.1754944e-38, %v1557_v49 }
 0x3b9   : > { %v1397_v12 = vmul.f32 %v1389_v10, %v1373_v28  ;;  %v1559_v55 = vsel %vm1556_vm2, %v1558_v50, %v1554_v4 }
 0x3ba   : > { %v1304_v29 = vpop.f32.mrf.mxu2 }
 0x3bb   : > { %v1358_v35 = vsub.f32 %v1304_v29, %v1334_v44  ;;  %v1515_v32 = vmul.f32 %v1514_v31, %v1397_v12 }
 0x3bd   : > { %v1382_v58 = vmul.f32 2.0, %v1358_v35  ;;  %v1568_v21 = vsel %vm1563_vm5, %v1515_v32, 0.0 }
 0x3be   : > { %1580 = vadd.xlane.f32.xlu2 %v1568_v21 }
 0x3bf   : > { %v1390_v3 = vadd.f32 0.0009, %v1382_v58 }
 0x3c1   : > { %v1398_v7 = vmul.f32 %v1390_v3, %v1374_v54 }
 0x3c2   : > { %v1307_v59 = vpop.f32.mrf.mxu2 }
 0x3c3   : > { %v1359_v15 = vsub.f32 %v1307_v59, %v1335_v9  ;;  %v1530_v52 = vmul.f32 %v1529_v18, %v1398_v7 }
 0x3c5   : > { %v1383_v5 = vmul.f32 2.0, %v1359_v15  ;;  %v1569_v48 = vsel %vm1563_vm5, %v1530_v52, 0.0 }
 0x3c6   : > { %1582 = vadd.xlane.f32.xlu2 %v1569_v48 }
 0x3c7   : > { %v1391_v1 = vadd.f32 0.0009, %v1383_v5 }
 0x3c9   : > { %v1399_v56 = vmul.f32 %v1391_v1, %v1375_v60 }
 0x3ca   : > { %v1310_v6 = vpop.f32.mrf.mxu2 }
 0x3cb   : > { %v1360_v30 = vsub.f32 %v1310_v6, %v1336_v63  ;;  %v1545_v2 = vmul.f32 %v1544_v57, %v1399_v56 }
 0x3cd   : > { %v1384_v43 = vmul.f32 2.0, %v1360_v30  ;;  %v1570_v26 = vsel %vm1563_vm5, %v1545_v2, 0.0 }
 0x3ce   : > { %1584 = vadd.xlane.f32.xlu0 %v1570_v26 }
 0x3cf   : > { %v1392_v24 = vadd.f32 0.0009, %v1384_v43 }
 0x3d1   : > { %v1400_v40 = vmul.f32 %v1392_v24, %v1376_v47 }
 0x3d3   : > { %v1560_v28 = vmul.f32 %v1559_v55, %v1400_v40 }
 0x3d5   : > { %v1571_v44 = vsel %vm1563_vm5, %v1560_v28, 0.0  ;;  %vm1610_vm5 = vcmask 1041409  }
 0x3d6   : > { %1586 = vadd.xlane.f32.xlu1 %v1571_v44 }
 0x411   : > { %v1573_v10 = vpop.xlane.xlu0 %1572 }
 0x412   : > { %v1596_v0 = vperm.slane %v1573_v10, %v3262_v36 }
 0x419   : > { %v1575_v25 = vpop.xlane.xlu0 %1574 }
 0x41a   : > { %v1598_v31 = vperm.slane %v1575_v25, %v1597_v33 }
 0x41c   : > { %v1600_v21 = vsel %vm1599_vm3, %v1598_v31, %v1596_v0 }
 0x421   : > { %v1577_v23 = vpop.xlane.xlu1 %1576 }
 0x422   : > { %v1601_v35 = vperm.slane %v1577_v23, %v3262_v36 }
 0x429   : > { %v1579_v34 = vpop.xlane.xlu1 %1578 }
 0x42a   : > { %v1602_v29 = vperm.slane %v1579_v34, %v1597_v33 }
 0x42c   : > { %v1603_v45 = vsel %vm1599_vm3, %v1602_v29, %v1601_v35 }
 0x42d   : > { %v1611_v9 = vsel %vm1610_vm5, %v1603_v45, %v1600_v21 }
 0x431   : > { %v1581_v53 = vpop.xlane.xlu2 %1580 }
 0x432   : > { %v1604_v32 = vperm.slane %v1581_v53, %v3262_v36 }
 0x439   : > { %v1583_v12 = vpop.xlane.xlu2 %1582 }
 0x43a   : > { %v1605_v42 = vperm.slane %v1583_v12, %v1597_v33 }
 0x43c   : > { %v1606_v27 = vsel %vm1599_vm3, %v1605_v42, %v1604_v32 }
 0x43d   : > { %v1613_v11 = vsel %vm1612_vm4, %v1606_v27, %v1611_v9 }
 0x441   : > { %v1585_v20 = vpop.xlane.xlu0 %1584 }
 0x442   : > { %v1607_v51 = vperm.slane %v1585_v20, %v3262_v36 }
 0x449   : > { %v1587_v58 = vpop.xlane.xlu1 %1586 }
 0x44a   : > { %v1608_v54 = vperm.slane %v1587_v58, %v1597_v33 }
 0x44c   : > { %v1609_v3 = vsel %vm1599_vm3, %v1608_v54, %v1607_v51 }
 0x44d   : > { %v1615_v37 = vsel %vm1614_vm6, %v1609_v3, %v1613_v11 }
 0x44e   : > { %v1618_v16 = vsel %vm1617_vm7, %v1615_v37, 0.0 }
 0x44f   : > { %1619 = vadd.xlane.f32.xlu2 %v1618_v16 }
 0x4c2   : > { %v1620_v36 = vpop.xlane.xlu2 %1619 }
 0x4c3   : > { %1621 = vst [vmem:[%s289_s0] sm:$0xf] %v1620_v36 }
 0x4c4   : > { %2062 = shalt.err (!%p2059_p0)
}
 0x4c5   : > { %1823 = dma.vmem_to_hbm [thread:$0]  (%p2218_p7), %s1636_s24, 64, %s1638_s25, %s1623_s27  }
 0x4c6 PF: > { %s1649_s23 = sand.u32 1, %s2097_s15   ;;  %p3726_p3 = scmp.ge.s32.totalorder %s2109_s18, 2 }
 0x4c7   : > { %s1650_s2 = scalar_lea.sflag [#allocation4], %s1649_s23 }
 0x4c8   : > { %p1840_p12 = pnand %p3726_p3, %p2177_p6 }
 0x4ca   : > { %p1841_p5 = pneg %p1840_p12 }
 0x4cc   : > { %2092 = dma.done.wait (%p1841_p5), %s1650_s2, 64  }
 0x4cd   : > { %2094 = vsyncadd (%p1841_p5), %s1650_s2, 4294967232  ;;  %s3727_s1 = sld [smem:[#allocation14_spill]]  ;;  %p16_p1 = scmp.ge.s32.totalorder %s2199_s30, 4  }
 0x4ce   : > { %s3728_s17 = sld [smem:[#allocation15_spill]]  ;;  %s3729_s15 = smov %s2101_s16 }
 0x4cf   : > { %s3731_s18 = smov %s2199_s30  ;;  %18 = sbr.rel (!%p16_p1) target bundleno = 9 (0x9), region = 99 }
 0x4d3   : > { %s3730_s16 = smov %s3727_s1 }
 0x4d4   :  { %1656 = vsyncpa [#allocation3], 1 }
 0x4d5   :  { %1658 = vsyncpa [#allocation3 + $0x1], 1 }
 0x4d6   :  { %1659 = vsyncpa [#allocation6], 1 }
 0x4d7   :  { %1660 = vsyncpa [#allocation4], 1 }
 0x4d8   :  { %1662 = vsyncpa [#allocation4 + $0x1], 1 }

// kernel: tpu_custom_call.1
= control target key start
LH: loop header
LB: loop body
LE: loop exit
PB: predicated region body
PF: predicated region fallthrough
CT: control target
= control target key end

     0   :  { %s3408_s0 = inlined_call_operand.hbm [shape: f32[64,64], index: 0, kind: input, shape index: {}]   ;;  %s3409_s1 = inlined_call_operand.hbm [shape: f32[384,128], index: 1, kind: input, shape index: {}]   ;;  %s3410_s2 = inlined_call_operand.hbm [shape: f32[8,16,384], index: 2, kind: input, shape index: {}]   ;;  %s3411_s3 = inlined_call_operand.hbm [shape: f32[8,16,384], index: 3, kind: input, shape index: {}]   ;;  %s3412_s4 = inlined_call_operand.hbm [shape: f32[2,4,128], index: 4, kind: output, shape index: {}]  }
   0x1   :  { %3551 = sst [smem:[#allocation69_spill]] %s3408_s0 }
   0x2   :  { %3552 = sst [smem:[#allocation70_spill]] %s3409_s1 }
   0x3   :  { %3553 = sst [smem:[#allocation71_spill]] %s3410_s2 }
   0x4   :  { %9 = vsyncpa [#allocation3], 0 }
   0x5   :  { %10 = vsyncpa [#allocation6], 0 }
   0x6   :  { %11 = vsyncpa [#allocation4], 0 }
   0x7   :  { %13 = vsyncpa [#allocation4 + $0x1], 0  ;;  %s2142_s15 = smov 0   ;;  %s2144_s16 = smov 0  }
   0x8   :  { %s2146_s17 = smov 0   ;;  %s2148_s18 = smov 0  }
   0x9 LB: > { %3554 = sst [smem:[#allocation14_spill]] %s2105_s17  ;;  %s2163_s19 = sadd.s32 4294967295, %s2109_s18   ;;  %s2109_s18 = sphi %s2148_s18, %s3731_s18   ;;  %s2105_s17 = sphi %s2146_s17, %s3728_s17   ;;  %s2101_s16 = sphi %s2144_s16, %s3730_s16   ;;  %s2097_s15 = sphi %s2142_s15, %s3729_s15  }
   0xa   : > { %s1747_s20 = sadd.s32 4294967294, %s2109_s18   ;;  %p81_p0 = scmp.ne.s32.totalorder %s2101_s16, %s2097_s15 }
   0xb   : > { %p3416_p1 = scmp.eq.s32.totalorder %s2163_s19, 0  ;;  %p131_p2 = scmp.eq.s32.totalorder %s2163_s19, 1 }
   0xc   : > { %p137_p3 = scmp.eq.s32.totalorder %s1747_s20, 1  ;;  %p1748_p5 = scmp.ge.s32.totalorder %s2109_s18, 1 }
   0xd   : > { %p2172_p4 = por %p3416_p1, %p81_p0  ;;  %p144_p7 = scmp.lt.s32.totalorder %s2109_s18, 3 }
   0xe   : > { %p2177_p6 = por %p137_p3, %p81_p0  ;;  %s3557_s0 = sld [smem:[#allocation69_spill]] }
   0xf   : > { %p2185_p8 = pnand %p1748_p5, %p144_p7  ;;  %s2111_s27 = smov [#allocation2]  }
  0x10   : > { %s157_s28 = sshll.u32 %s2111_s27, 4  ;;  %s2199_s30 = sadd.s32 1, %s2109_s18   ;;  %s158_s28 = int_to_ptr.vmem [resolvable:$true] %s157_s28 }
  0x11   : > { %p1825_p9 = pneg %p2185_p8  ;;  %s3413_s5 = smov 128  }
  0x12   : > { %s3414_s6 = smov 8   ;;  %s65_s7 = ssub.s32 %s2109_s18, %s2199_s30 }
  0x13   : > { %p2193_p10 = pnand %p1825_p9, %p3416_p1  ;;  %s68_s8 = sadd.s32 1, %s2105_s17 }
  0x14   : > { %s155_s25 = sshll.u32 %s3557_s0, 4  ;;  %p66_p12 = scmp.eq.s32.totalorder %s65_s7, 0  ;;  %s156_s25 = int_to_ptr.hbm [resolvable:$true] %s155_s25 }
  0x15   : > { %1828 = dma.hbm_to_vmem [thread:$0]  (!%p2193_p10), %s156_s25, 1024, %s158_s28, [#allocation3], %s3413_s5, %s3413_s5, %s3414_s6  }
  0x16   : > { %p75_p13 = scmp.ne.s32.totalorder %s2105_s17, %s2101_s16  ;;  %p76_p0 = scmp.eq.s32.totalorder %s2109_s18, 0 }
  0x17   : > { %p1845_p3 = scmp.lt.s32.totalorder %s2109_s18, 2  ;;  %s185_s11 = sand.u32 1, %s2109_s18  }
  0x18   : > { %s2214_s9 = scalar_select %p66_p12, %s2105_s17, %s68_s8  }
  0x19   : > { %p77_p5 = por %p76_p0, %p75_p13  ;;  %p2218_p7 = por %p131_p2, %p75_p13 }
  0x1a   : > { %3560 = sst [smem:[#allocation15_spill]] %s2214_s9  ;;  %s187_s12 = sand.u32 1, %s2105_s17  }
  0x1b   : > { %s2224_s13 = smul.u32 192, %s187_s12  ;;  %p2227_p9 = pnand %p1845_p3, %p77_p5 }
  0x1c   : > { %s3415_s14 = smul.u32 192, %s2109_s18  ;;  %s3563_s2 = sld [smem:[#allocation71_spill]] }
  0x1d   : > { %s189_s27 = scalar_lea.vmem [#allocation7], %s2224_s13  ;;  %s3564_s1 = sld [smem:[#allocation70_spill]] }
  0x1e   : > { %s198_s28 = sshll.u32 %s189_s27, 4  ;;  %s2240_s6 = scalar_lea.sflag [#allocation3], %s185_s11  ;;  %s199_s28 = int_to_ptr.vmem [resolvable:$true] %s198_s28 }
  0x1f   : > { %p1949_p12 = pneg %p2227_p9 }
  0x22   : > { %s195_s25 = scalar_lea.hbm %s3563_s2, %s3415_s14 }
  0x23   : > { %s196_s7 = sshll.u32 %s195_s25, 4  ;;  %s169_s5 = sshll.u32 %s3564_s1, 4  ;;  %s197_s7 = int_to_ptr.hbm [resolvable:$true] %s196_s7  ;;  %s170_s5 = int_to_ptr.hbm [resolvable:$true] %s169_s5 }
  0x24   : > { %s1945_s0 = sshra.s32 %s197_s7, 4  ;;  %s1952_s25 = scalar_lea.hbm %s3563_s2, 384  ;;  %s1946_s0 = int_to_ptr.hbm [resolvable:$true] %s1945_s0 }
  0x25   : > { %s1947_s9 = scalar_lea.hbm %s1946_s0, 192  ;;  %p1953_p3 = scmp.lt.s32.totalorder %s1946_s0, %s3563_s2 }
  0x26   : > { %p1948_p2 = scmp.ne.s32.totalorder %s1946_s0, %s1947_s9  ;;  %p1954_p5 = scmp.lt.s32.totalorder %s1952_s25, %s1947_s9 }
  0x28   : > { %p1950_p13 = pnand %p1949_p12, %p1948_p2  ;;  %p1955_p11 = por %p1954_p5, %p1953_p3 }
  0x2a   : > { %p1951_p0 = pneg %p1950_p13 }
  0x2c   : > { %p1956_p1 = pnand %p1955_p11, %p1951_p0 }
  0x2e   : > { %1959 = shalt.err (!%p1956_p1)
}
  0x2f   : > { %s2114_s11 = smov 384   ;;  %s2115_s8 = smov 24  }
  0x30   : > { %1835 = dma.hbm_to_vmem [thread:$0]  (!%p2227_p9), %s197_s7, 3072, %s199_s28, %s2240_s6, %s2114_s11, %s2114_s11, %s2115_s8  }
  0x31   : > { %s2116_s14 = smov [#allocation5]   ;;  %s3565_s9 = smul.u32 192, %s2109_s18 }
  0x32   : > { %s171_s0 = sshll.u32 %s2116_s14, 4  ;;  %s3566_s25 = smov 8   ;;  %s172_s0 = int_to_ptr.vmem [resolvable:$true] %s171_s0 }
  0x33   : > { %s218_s24 = scalar_lea.hbm %s3411_s3, %s3565_s9  ;;  %s3567_s27 = smov 128  }
  0x34   : > { %1831 = dma.hbm_to_vmem [thread:$0]  (!%p2193_p10), %s170_s5, 6144, %s172_s0, [#allocation6], %s3567_s27, %s3567_s27, %s3566_s25  }
  0x35   : > { %s219_s1 = sshll.u32 %s218_s24, 4  ;;  %s212_s2 = scalar_lea.vmem [#allocation8], %s2224_s13  ;;  %s220_s1 = int_to_ptr.hbm [resolvable:$true] %s219_s1 }
  0x36   : > { %s221_s17 = sshll.u32 %s212_s2, 4  ;;  %s2005_s28 = sshra.s32 %s220_s1, 4  ;;  %s222_s17 = int_to_ptr.vmem [resolvable:$true] %s221_s17  ;;  %s2006_s28 = int_to_ptr.hbm [resolvable:$true] %s2005_s28 }
  0x37   : > { %s2007_s7 = scalar_lea.hbm %s2006_s28, 192  ;;  %s2012_s29 = scalar_lea.hbm %s3411_s3, 384 }
  0x38   : > { %p2008_p1 = scmp.ne.s32.totalorder %s2006_s28, %s2007_s7  ;;  %p2013_p10 = scmp.lt.s32.totalorder %s2006_s28, %s3411_s3 }
  0x39   : > { %p2014_p13 = scmp.lt.s32.totalorder %s2012_s29, %s2007_s7 }
  0x3a   : > { %p2010_p11 = pnand %p2008_p1, %p1949_p12 }
  0x3b   : > { %p2015_p0 = por %p2014_p13, %p2013_p10 }
  0x3c   : > { %p2011_p2 = pneg %p2010_p11 }
  0x3e   : > { %p2016_p3 = pnand %p2015_p0, %p2011_p2 }
  0x40   : > { %2019 = shalt.err (!%p2016_p3)
}
  0x41   : > { %1838 = dma.hbm_to_vmem [thread:$0]  (!%p2227_p9), %s220_s1, 3072, %s222_s17, %s2240_s6, %s2114_s11, %s2114_s11, %s2115_s8  }
  0x42   : > { %233 = sbr.rel (%p2185_p8) target bundleno = 1222 (0x4c6), region = 36 }
  0x47   : > { %p3568_p12 = scmp.eq.s32.totalorder %s2163_s19, 0 }
  0x49   : > { %2080 = dma.done.wait (%p3568_p12), [#allocation3], 1024   ;;  %p3569_p5 = pmov %p3568_p12 }
  0x4b   : > { %2082 = vsyncadd (%p3569_p5), [#allocation3], 4294966272  ;;  %p3570_p1 = pmov %p3569_p5 }
  0x4d   : > { %2084 = dma.done.wait (%p3570_p1), [#allocation6], 6144   ;;  %p3571_p11 = pmov %p3570_p1 }
  0x4e   : > { %s245_s2 = sand.u32 1, %s2163_s19   ;;  %s2297_s1 = sand.u32 1, %s2101_s16  }
  0x4f   : > { %2086 = vsyncadd (%p3571_p11), [#allocation6], 4294961152  ;;  %s1810_s17 = smul.u32 192, %s2297_s1  ;;  %s246_s26 = scalar_lea.sflag [#allocation3], %s245_s2 }
  0x51   : > { %s2302_s5 = scalar_lea.vmem [#allocation7], %s1810_s17 }
  0x52   : > { %2088 = dma.done.wait (%p2172_p4), %s246_s26, 6144  }
  0x53   : > { %2090 = vsyncadd (%p2172_p4), %s246_s26, 4294961152  ;;  %v2308_v0 = vld [vmem:[#allocation5 + $0x178] sm:$0xff]  ;;  %v2310_v1 = vld [vmem:[#allocation5 + $0x170] sm:$0xff]  ;;  %vm519_vm0 = vcmask 523264   ;;  %s2650_s21 = scalar_lea.vmem [#allocation8], %s1810_s17  ;;  %s1761_s6 = sshll.u32 %s2297_s1, 2 }
  0x54   : > { %v2312_v2 = vld [vmem:[#allocation5 + $0x78] sm:$0xff]  ;;  %478 = vmatpush.msra.mxu2 %v2308_v0  ;;  %v2318_v4 = vld [vmem:[#allocation5 + $0x70] sm:$0xff]  ;;  %v2321_v5 = vld [vmem:[#allocation5 + $0x168] sm:$0xff]  ;;  %s1803_s13 = sshll.u32 %s2163_s19, 2  ;;  %s289_s0 = scalar_lea.vmem [#allocation9], %s1761_s6 }
  0x55   : > { %396 = vmatpush.msra.mxu0 %v2312_v2  ;;  %v2316_v3 = vld [vmem:[#allocation5 + $0xf8] sm:$0xff]  ;;  %v2323_v6 = vld [vmem:[#allocation5 + $0xf0] sm:$0xff]  ;;  %v2325_v7 = vld [vmem:[#allocation5 + $0x68] sm:$0xff]  ;;  %s1633_s8 = scalar_lea.hbm %s3412_s4, %s1803_s13  ;;  %s1635_s24 = sshll.u32 %s289_s0, 4  ;;  %s1636_s24 = int_to_ptr.vmem [resolvable:$true] %s1635_s24 }
  0x56   : > { %437 = vmatpush.msra.mxu1 %v2316_v3  ;;  %479 = vmatpush.msra.mxu2 %v2310_v1  ;;  %v2329_v8 = vld [vmem:[#allocation5 + $0xe8] sm:$0xff]  ;;  %v2332_v9 = vld [vmem:[#allocation5 + $0x160] sm:$0xff]  ;;  %v2341_v12 = vld [vmem:[#allocation5 + $0x158] sm:$0xff]  ;;  %s1637_s25 = sshll.u32 %s1633_s8, 4  ;;  %s1623_s27 = scalar_lea.sflag [#allocation4], %s2297_s1  ;;  %s1638_s25 = int_to_ptr.hbm [resolvable:$true] %s1637_s25 }
  0x57   : > { %397 = vmatpush.msra.mxu0 %v2318_v4  ;;  %v2334_v10 = vld [vmem:[#allocation5 + $0x60] sm:$0xff]  ;;  %3572 = vst [vmem:[#allocation16_spill] sm:$0xff] %v2341_v12  ;;  %v2343_v13 = vld [vmem:[#allocation5 + $0x58] sm:$0xff]  ;;  %v2350_v15 = vld [vmem:[#allocation5 + $0x150] sm:$0xff]  ;;  %s2049_s28 = sshra.s32 %s1638_s25, 4  ;;  %s2055_s9 = scalar_lea.hbm %s3412_s4, 8  ;;  %s2050_s28 = int_to_ptr.hbm [resolvable:$true] %s2049_s28 }
  0x58   : > { %438 = vmatpush.msra.mxu1 %v2323_v6  ;;  %480 = vmatpush.msra.mxu2 %v2321_v5  ;;  %v2338_v11 = vld [vmem:[#allocation5 + $0xe0] sm:$0xff]  ;;  %v2347_v14 = vld [vmem:[#allocation5 + $0xd8] sm:$0xff]  ;;  %3573 = vst [vmem:[#allocation17_spill] sm:$0xff] %v2350_v15  ;;  %v2352_v16 = vld [vmem:[#allocation5 + $0x50] sm:$0xff]  ;;  %s2051_s7 = scalar_lea.hbm %s2050_s28, 4  ;;  %p2056_p2 = scmp.lt.s32.totalorder %s2050_s28, %s3412_s4 }
  0x59   : > { %398 = vmatpush.msra.mxu0 %v2325_v7  ;;  %v2356_v17 = vld [vmem:[#allocation5 + $0xd0] sm:$0xff]  ;;  %v2359_v18 = vld [vmem:[#allocation5 + $0x148] sm:$0xff]  ;;  %v2368_v21 = vld [vmem:[#allocation5 + $0x140] sm:$0xff]  ;;  %p2052_p4 = scmp.ne.s32.totalorder %s2050_s28, %s2051_s7  ;;  %p2057_p10 = scmp.lt.s32.totalorder %s2055_s9, %s2051_s7 }
  0x5a   : > { %439 = vmatpush.msra.mxu1 %v2329_v8  ;;  %481 = vmatpush.msra.mxu2 %v2332_v9  ;;  %3574 = vst [vmem:[#allocation18_spill] sm:$0xff] %v2359_v18  ;;  %v2361_v19 = vld [vmem:[#allocation5 + $0x48] sm:$0xff]  ;;  %v2370_v22 = vld [vmem:[#allocation5 + $0x40] sm:$0xff]  ;;  %v2377_v24 = vld [vmem:[#allocation5 + $0x138] sm:$0xff] }
  0x5b   : > { %399 = vmatpush.msra.mxu0 %v2334_v10  ;;  %v2365_v20 = vld [vmem:[#allocation5 + $0xc8] sm:$0xff]  ;;  %3576 = vst [vmem:[#allocation20_spill] sm:$0xff] %v2368_v21  ;;  %v2374_v23 = vld [vmem:[#allocation5 + $0xc0] sm:$0xff]  ;;  %v2379_v25 = vld [vmem:[#allocation5 + $0x38] sm:$0xff]  ;;  %p2053_p8 = pnand %p2052_p4, %p2218_p7  ;;  %p2058_p13 = por %p2057_p10, %p2056_p2 }
  0x5c   : > { %440 = vmatpush.msra.mxu1 %v2338_v11  ;;  %482 = vmatpush.msra.mxu2 %v2341_v12  ;;  %3575 = vst [vmem:[#allocation19_spill] sm:$0xff] %v2365_v20  ;;  %v2383_v26 = vld [vmem:[#allocation5 + $0xb8] sm:$0xff]  ;;  %v2386_v27 = vld [vmem:[#allocation5 + $0x130] sm:$0xff]  ;;  %v2395_v30 = vld [vmem:[#allocation5 + $0x128] sm:$0xff] }
  0x5d   : > { %400 = vmatpush.msra.mxu0 %v2343_v13  ;;  %3577 = vst [vmem:[#allocation21_spill] sm:$0xff] %v2374_v23  ;;  %v2388_v28 = vld [vmem:[#allocation5 + $0x30] sm:$0xff]  ;;  %v2397_v31 = vld [vmem:[#allocation5 + $0x28] sm:$0xff]  ;;  %v2404_v33 = vld [vmem:[#allocation5 + $0x120] sm:$0xff]  ;;  %p2054_p9 = pneg %p2053_p8 }
  0x5e   : > { %441 = vmatpush.msra.mxu1 %v2347_v14  ;;  %483 = vmatpush.msra.mxu2 %v2350_v15  ;;  %3578 = vst [vmem:[#allocation22_spill] sm:$0xff] %v2377_v24  ;;  %v2392_v29 = vld [vmem:[#allocation5 + $0xb0] sm:$0xff]  ;;  %v2401_v32 = vld [vmem:[#allocation5 + $0xa8] sm:$0xff]  ;;  %v2406_v34 = vld [vmem:[#allocation5 + $0x20] sm:$0xff] }
  0x5f   : > { %401 = vmatpush.msra.mxu0 %v2352_v16  ;;  %3579 = vst [vmem:[#allocation23_spill] sm:$0xff] %v2383_v26  ;;  %v2410_v35 = vld [vmem:[#allocation5 + $0xa0] sm:$0xff]  ;;  %v2413_v36 = vld [vmem:[#allocation5 + $0x118] sm:$0xff]  ;;  %v2422_v39 = vld [vmem:[#allocation5 + $0x110] sm:$0xff]  ;;  %p2059_p0 = pnand %p2058_p13, %p2054_p9 }
  0x60   : > { %442 = vmatpush.msra.mxu1 %v2356_v17  ;;  %484 = vmatpush.msra.mxu2 %v2359_v18  ;;  %3580 = vst [vmem:[#allocation24_spill] sm:$0xff] %v2386_v27  ;;  %v2415_v37 = vld [vmem:[#allocation5 + $0x18] sm:$0xff]  ;;  %v2424_v40 = vld [vmem:[#allocation5 + $0x10] sm:$0xff]  ;;  %v2431_v42 = vld [vmem:[#allocation5 + $0x108] sm:$0xff] }
  0x61   : > { %402 = vmatpush.msra.mxu0 %v2361_v19  ;;  %3581 = vst [vmem:[#allocation25_spill] sm:$0xff] %v2392_v29  ;;  %v2419_v38 = vld [vmem:[#allocation5 + $0x98] sm:$0xff]  ;;  %v2428_v41 = vld [vmem:[#allocation5 + $0x90] sm:$0xff]  ;;  %v2433_v43 = vld [vmem:[#allocation5 + $0x8] sm:$0xff] }
  0x62   : > { %443 = vmatpush.msra.mxu1 %v2365_v20  ;;  %485 = vmatpush.msra.mxu2 %v2368_v21  ;;  %3582 = vst [vmem:[#allocation26_spill] sm:$0xff] %v2395_v30  ;;  %v2437_v44 = vld [vmem:[#allocation5 + $0x88] sm:$0xff]  ;;  %v2440_v45 = vld [vmem:[#allocation5 + $0x100] sm:$0xff]  ;;  %v2446_v47 = vld [vmem:[%s2302_s5 + $0x10] sm:$0xff] }
  0x63   : > { %403 = vmatpush.msra.mxu0 %v2370_v22  ;;  %3583 = vst [vmem:[#allocation27_spill] sm:$0xff] %v2401_v32  ;;  %v2442_v46 = vld [vmem:[#allocation5] sm:$0xff]  ;;  %v2456_v50 = vld [vmem:[%s2302_s5 + $0x8] sm:$0xff]  ;;  %v2472_v52 = vld [vmem:[%s2302_s5 + $0x18] sm:$0xff] }
  0x64   : > { %444 = vmatpush.msra.mxu1 %v2374_v23  ;;  %486 = vmatpush.msra.mxu2 %v2377_v24  ;;  %3584 = vst [vmem:[#allocation28_spill] sm:$0xff] %v2404_v33  ;;  %v2449_v48 = vld [vmem:[#allocation5 + $0x80] sm:$0xff]  ;;  %v2469_v51 = vld [vmem:[%s2302_s5 + $0x28] sm:$0xff]  ;;  %v2491_v55 = vld [vmem:[%s2302_s5 + $0x30] sm:$0xff] }
  0x65   : > { %404 = vmatpush.msra.mxu0 %v2379_v25  ;;  %3585 = vst [vmem:[#allocation29_spill] sm:$0xff] %v2410_v35  ;;  %v2453_v49 = vld [vmem:[%s2302_s5] sm:$0xff]  ;;  %v2494_v56 = vld [vmem:[%s2302_s5 + $0x38] sm:$0xff]  ;;  %v2510_v58 = vld [vmem:[%s2302_s5 + $0x48] sm:$0xff] }
  0x66   : > { %445 = vmatpush.msra.mxu1 %v2383_v26  ;;  %487 = vmatpush.msra.mxu2 %v2386_v27  ;;  %3586 = vst [vmem:[#allocation30_spill] sm:$0xff] %v2413_v36  ;;  %v2475_v53 = vld [vmem:[%s2302_s5 + $0x20] sm:$0xff]  ;;  %v2507_v57 = vld [vmem:[%s2302_s5 + $0x58] sm:$0xff]  ;;  %v2513_v59 = vld [vmem:[%s2302_s5 + $0x50] sm:$0xff] }
  0x67   : > { %405 = vmatpush.msra.mxu0 %v2388_v28  ;;  %3587 = vst [vmem:[#allocation31_spill] sm:$0xff] %v2419_v38  ;;  %v2488_v54 = vld [vmem:[%s2302_s5 + $0x40] sm:$0xff]  ;;  %v2526_v60 = vld [vmem:[%s2302_s5 + $0x70] sm:$0xff]  ;;  %v2532_v62 = vld [vmem:[%s2302_s5 + $0x68] sm:$0xff] }
  0x68   : > { %446 = vmatpush.msra.mxu1 %v2392_v29  ;;  %488 = vmatpush.msra.mxu2 %v2395_v30  ;;  %3588 = vst [vmem:[#allocation32_spill] sm:$0xff] %v2422_v39  ;;  %v2529_v61 = vld [vmem:[%s2302_s5 + $0x60] sm:$0xff]  ;;  %v2545_v63 = vld [vmem:[%s2302_s5 + $0x88] sm:$0xff] }
  0x69   : > { %406 = vmatpush.msra.mxu0 %v2397_v31  ;;  %3589 = vst [vmem:[#allocation33_spill] sm:$0xff] %v2428_v41 }
  0x6a   : > { %447 = vmatpush.msra.mxu1 %v2401_v32  ;;  %489 = vmatpush.msra.mxu2 %v2404_v33  ;;  %3590 = vst [vmem:[#allocation34_spill] sm:$0xff] %v2431_v42 }
  0x6b   : > { %407 = vmatpush.msra.mxu0 %v2406_v34  ;;  %3591 = vst [vmem:[#allocation35_spill] sm:$0xff] %v2437_v44 }
  0x6c   : > { %448 = vmatpush.msra.mxu1 %v2410_v35  ;;  %490 = vmatpush.msra.mxu2 %v2413_v36  ;;  %3592 = vst [vmem:[#allocation36_spill] sm:$0xff] %v2440_v45 }
  0x6d   : > { %408 = vmatpush.msra.mxu0 %v2415_v37  ;;  %3593 = vst [vmem:[#allocation37_spill] sm:$0xff] %v2446_v47 }
  0x6e   : > { %449 = vmatpush.msra.mxu1 %v2419_v38  ;;  %491 = vmatpush.msra.mxu2 %v2422_v39  ;;  %3594 = vst [vmem:[#allocation38_spill] sm:$0xff] %v2449_v48 }
  0x6f   : > { %409 = vmatpush.msra.mxu0 %v2424_v40  ;;  %3595 = vst [vmem:[#allocation39_spill] sm:$0xff] %v2453_v49 }
  0x70   : > { %450 = vmatpush.msra.mxu1 %v2428_v41  ;;  %492 = vmatpush.msra.mxu2 %v2431_v42  ;;  %3596 = vst [vmem:[#allocation40_spill] sm:$0xff] %v2456_v50 }
  0x71   : > { %410 = vmatpush.msra.mxu0 %v2433_v43  ;;  %3597 = vst [vmem:[#allocation41_spill] sm:$0xff] %v2469_v51 }
  0x72   : > { %451 = vmatpush.msra.mxu1 %v2437_v44  ;;  %493 = vmatpush.msra.mxu2 %v2440_v45  ;;  %3598 = vst [vmem:[#allocation42_spill] sm:$0xff] %v2472_v52 }
  0x73   : > { %411 = vmatpush.msra.mxu0 %v2442_v46  ;;  %494 = vmatmul.f32.vlgmr.msra.gmra.mxu2 %v2446_v47  ;;  %3599 = vst [vmem:[#allocation43_spill] sm:$0xff] %v2475_v53 }
  0x74   : > { %452 = vmatpush.msra.mxu1 %v2449_v48  ;;  %412 = vmatmul.f32.vlgmr.msra.gmra.mxu0 %v2453_v49  ;;  %3600 = vst [vmem:[#allocation44_spill] sm:$0xff] %v2488_v54 }
  0x75   : > { %453 = vmatmul.f32.vlgmr.msra.gmra.mxu1 %v2456_v50  ;;  %626 = vmatpush.msrb.mxu0 %v2316_v3  ;;  %3601 = vst [vmem:[#allocation45_spill] sm:$0xff] %v2491_v55 }
  0x76   : > { %667 = vmatpush.msrb.mxu1 %v2308_v0  ;;  %3602 = vst [vmem:[#allocation46_spill] sm:$0xff] %v2494_v56 }
  0x77   : > { %627 = vmatpush.msrb.mxu0 %v2323_v6  ;;  %3603 = vst [vmem:[#allocation47_spill] sm:$0xff] %v2507_v57 }
  0x78   : > { %668 = vmatpush.msrb.mxu1 %v2310_v1  ;;  %3604 = vst [vmem:[#allocation48_spill] sm:$0xff] %v2510_v58 }
  0x79   : > { %628 = vmatpush.msrb.mxu0 %v2329_v8  ;;  %3605 = vst [vmem:[#allocation49_spill] sm:$0xff] %v2513_v59 }
  0x7a   : > { %669 = vmatpush.msrb.mxu1 %v2321_v5  ;;  %3606 = vst [vmem:[#allocation50_spill] sm:$0xff] %v2526_v60 }
  0x7b   : > { %497 = vmatmul.f32.gmra.mxu2 %v2469_v51  ;;  %629 = vmatpush.msrb.mxu0 %v2338_v11  ;;  %3607 = vst [vmem:[#allocation51_spill] sm:$0xff] %v2529_v61 }
  0x7c   : > { %415 = vmatmul.f32.gmra.mxu0 %v2472_v52  ;;  %670 = vmatpush.msrb.mxu1 %v2332_v9  ;;  %3608 = vst [vmem:[#allocation52_spill] sm:$0xff] %v2532_v62  ;;  %v2590_v52 = vld [vmem:[%s2302_s5 + $0xb0] sm:$0xff] }
  0x7d   : > { %456 = vmatmul.f32.gmra.mxu1 %v2475_v53  ;;  %630 = vmatpush.msrb.mxu0 %v2347_v14  ;;  %3609 = vst [vmem:[#allocation53_spill] sm:$0xff] %v2545_v63 }
  0x7e   : > { %671 = vmatpush.msrb.mxu1 %v2341_v12  ;;  %3617 = vst [vmem:[#allocation61_spill] sm:$0xff] %v2590_v52 }
  0x7f   : > { %631 = vmatpush.msrb.mxu0 %v2356_v17 }
  0x80   : > { %672 = vmatpush.msrb.mxu1 %v2350_v15 }
  0x81   : > { %632 = vmatpush.msrb.mxu0 %v2365_v20 }
  0x82   : > { %673 = vmatpush.msrb.mxu1 %v2359_v18 }
  0x83   : > { %500 = vmatmul.f32.gmra.mxu2 %v2488_v54  ;;  %633 = vmatpush.msrb.mxu0 %v2374_v23 }
  0x84   : > { %418 = vmatmul.f32.gmra.mxu0 %v2491_v55  ;;  %674 = vmatpush.msrb.mxu1 %v2368_v21  ;;  %v2565_v55 = vld [vmem:[%s2302_s5 + $0xa0] sm:$0xff] }
  0x85   : > { %459 = vmatmul.f32.gmra.mxu1 %v2494_v56  ;;  %634 = vmatpush.msrb.mxu0 %v2383_v26  ;;  %3612 = vst [vmem:[#allocation56_spill] sm:$0xff] %v2565_v55 }
  0x86   : > { %675 = vmatpush.msrb.mxu1 %v2377_v24 }
  0x87   : > { %635 = vmatpush.msrb.mxu0 %v2392_v29 }
  0x88   : > { %676 = vmatpush.msrb.mxu1 %v2386_v27 }
  0x89   : > { %636 = vmatpush.msrb.mxu0 %v2401_v32 }
  0x8a   : > { %677 = vmatpush.msrb.mxu1 %v2395_v30 }
  0x8b   : > { %503 = vmatmul.f32.gmra.mxu2 %v2507_v57  ;;  %637 = vmatpush.msrb.mxu0 %v2410_v35 }
  0x8c   : > { %421 = vmatmul.f32.gmra.mxu0 %v2510_v58  ;;  %678 = vmatpush.msrb.mxu1 %v2404_v33  ;;  %v2549_v58 = vld [vmem:[%s2302_s5 + $0x78] sm:$0xff] }
  0x8d   : > { %462 = vmatmul.f32.gmra.mxu1 %v2513_v59  ;;  %638 = vmatpush.msrb.mxu0 %v2419_v38  ;;  %3610 = vst [vmem:[#allocation54_spill] sm:$0xff] %v2549_v58 }
  0x8e   : > { %679 = vmatpush.msrb.mxu1 %v2413_v36 }
  0x8f   : > { %639 = vmatpush.msrb.mxu0 %v2428_v41 }
  0x90   : > { %680 = vmatpush.msrb.mxu1 %v2422_v39 }
  0x91   : > { %640 = vmatpush.msrb.mxu0 %v2437_v44 }
  0x92   : > { %681 = vmatpush.msrb.mxu1 %v2431_v42 }
  0x93   : > { %506 = vmatmul.f32.gmra.mxu2 %v2526_v60  ;;  %641 = vmatpush.msrb.mxu0 %v2449_v48  ;;  %v2568_v60 = vld [vmem:[%s2302_s5 + $0x90] sm:$0xff] }
  0x94   : > { %424 = vmatmul.f32.gmra.mxu0 %v2529_v61  ;;  %v2552_v61 = vld [vmem:[%s2302_s5 + $0x80] sm:$0xff]  ;;  %682 = vmatpush.msrb.mxu1 %v2440_v45  ;;  %3613 = vst [vmem:[#allocation57_spill] sm:$0xff] %v2568_v60 }
  0x95   : > { %465 = vmatmul.f32.gmra.mxu1 %v2532_v62  ;;  %814 = vmatpush.msra.mxu0 %v2316_v3  ;;  %3611 = vst [vmem:[#allocation55_spill] sm:$0xff] %v2552_v61 }
  0x96   : > { %855 = vmatpush.msra.mxu1 %v2308_v0 }
  0x97   : > { %815 = vmatpush.msra.mxu0 %v2323_v6 }
  0x98   : > { %856 = vmatpush.msra.mxu1 %v2310_v1 }
  0x99   : > { %816 = vmatpush.msra.mxu0 %v2329_v8 }
  0x9a   : > { %857 = vmatpush.msra.mxu1 %v2321_v5 }
  0x9b   : > { %509 = vmatmul.f32.gmra.mxu2 %v2545_v63  ;;  %817 = vmatpush.msra.mxu0 %v2338_v11  ;;  %v2571_v63 = vld [vmem:[%s2302_s5 + $0x98] sm:$0xff] }
  0x9c   : > { %427 = vmatmul.f32.gmra.mxu0 %v2549_v58  ;;  %3614 = vst [vmem:[#allocation58_spill] sm:$0xff] %v2571_v63  ;;  %858 = vmatpush.msra.mxu1 %v2332_v9  ;;  %v2584_v58 = vld [vmem:[%s2302_s5 + $0xb8] sm:$0xff] }
  0x9d   : > { %468 = vmatmul.f32.gmra.mxu1 %v2552_v61  ;;  %818 = vmatpush.msra.mxu0 %v2347_v14  ;;  %3615 = vst [vmem:[#allocation59_spill] sm:$0xff] %v2584_v58  ;;  %v2587_v61 = vld [vmem:[%s2302_s5 + $0xa8] sm:$0xff] }
  0x9e   : > { %859 = vmatpush.msra.mxu1 %v2341_v12  ;;  %3616 = vst [vmem:[#allocation60_spill] sm:$0xff] %v2587_v61 }
  0x9f   : > { %819 = vmatpush.msra.mxu0 %v2356_v17 }
  0xa0   : > { %860 = vmatpush.msra.mxu1 %v2350_v15 }
  0xa1   : > { %820 = vmatpush.msra.mxu0 %v2365_v20 }
  0xa2   : > { %861 = vmatpush.msra.mxu1 %v2359_v18 }
  0xa3   : > { %512 = vmatmul.f32.gmra.mxu2 %v2565_v55  ;;  %821 = vmatpush.msra.mxu0 %v2374_v23 }
  0xa4   : > { %430 = vmatmul.f32.gmra.mxu0 %v2568_v60  ;;  %862 = vmatpush.msra.mxu1 %v2368_v21 }
  0xa5   : > { %471 = vmatmul.f32.gmra.mxu1 %v2571_v63  ;;  %822 = vmatpush.msra.mxu0 %v2383_v26 }
  0xa6   : > { %863 = vmatpush.msra.mxu1 %v2377_v24 }
  0xa7   : > { %823 = vmatpush.msra.mxu0 %v2392_v29 }
  0xa8   : > { %864 = vmatpush.msra.mxu1 %v2386_v27 }
  0xa9   : > { %824 = vmatpush.msra.mxu0 %v2401_v32 }
  0xaa   : > { %865 = vmatpush.msra.mxu1 %v2395_v30 }
  0xab   : > { %515 = vmatmul.f32.gmra.mxu2 %v2584_v58  ;;  %825 = vmatpush.msra.mxu0 %v2410_v35 }
  0xac   : > { %433 = vmatmul.f32.gmra.mxu0 %v2587_v61  ;;  %866 = vmatpush.msra.mxu1 %v2404_v33 }
  0xad   : > { %474 = vmatmul.f32.gmra.mxu1 %v2590_v52  ;;  %826 = vmatpush.msra.mxu0 %v2419_v38 }
  0xae   : > { %867 = vmatpush.msra.mxu1 %v2413_v36 }
  0xaf   : > { %827 = vmatpush.msra.mxu0 %v2428_v41 }
  0xb0   : > { %868 = vmatpush.msra.mxu1 %v2422_v39 }
  0xb1   : > { %828 = vmatpush.msra.mxu0 %v2437_v44 }
  0xb2   : > { %869 = vmatpush.msra.mxu1 %v2431_v42 }
  0xb3   : > { %829 = vmatpush.msra.mxu0 %v2449_v48 }
  0xb4   : > { %870 = vmatpush.msra.mxu1 %v2440_v45 }
  0xf1   : > { %v413_v61 = vpop.f32.mrf.mxu0 }
  0xf2   : > { %v454_v60 = vpop.f32.mrf.mxu1 }
  0xf3   : > { %v455_v12 = vadd.f32 %v454_v60, %v413_v61  ;;  %v3641_v60 = vld [vmem:[#allocation33_spill] sm:$0xff]  ;;  %v2748_v61 = vld [vmem:[%s2650_s21 + $0x18] sm:$0xff] }
  0xf6   : > { %v495_v58 = vpop.f32.mrf.mxu2 }
  0xf9   : > { %v416_v52 = vpop.f32.mrf.mxu0 }
  0xfa   : > { %v457_v55 = vpop.f32.mrf.mxu1 }
  0xfb   : > { %v458_v15 = vadd.f32 %v457_v55, %v416_v52  ;;  %v2726_v52 = vld [vmem:[%s2650_s21] sm:$0xff]  ;;  %v2732_v55 = vld [vmem:[%s2650_s21 + $0x58] sm:$0xff] }
  0xfe   : > { %v498_v63 = vpop.f32.mrf.mxu2 }
 0x101   : > { %v419_v62 = vpop.f32.mrf.mxu0 }
 0x102   : > { %v460_v57 = vpop.f32.mrf.mxu1 }
 0x103   : > { %v461_v18 = vadd.f32 %v460_v57, %v419_v62  ;;  %v3638_v57 = vld [vmem:[#allocation24_spill] sm:$0xff] }
 0x104   : > { %v3643_v62 = vld [vmem:[#allocation28_spill] sm:$0xff] }
 0x106   : > { %v501_v49 = vpop.f32.mrf.mxu2 }
 0x107   : > { %v502_v20 = vadd.f32 %v501_v49, %v461_v18  ;;  %v2642_v18 = vld [vmem:[#allocation2 + $0x20] sm:$0xff]  ;;  %v3632_v49 = vld [vmem:[#allocation25_spill] sm:$0xff] }
 0x108   : > { %3622 = vst [vmem:[#allocation66_spill] sm:$0xff] %v2642_v18 }
 0x109   : > { %v422_v59 = vpop.f32.mrf.mxu0 }
 0x10a   : > { %v463_v54 = vpop.f32.mrf.mxu1 }
 0x10b   : > { %v464_v21 = vadd.f32 %v463_v54, %v422_v59  ;;  %v3636_v54 = vld [vmem:[#allocation29_spill] sm:$0xff]  ;;  %v3640_v59 = vld [vmem:[#allocation26_spill] sm:$0xff] }
 0x10e   : > { %v504_v56 = vpop.f32.mrf.mxu2 }
 0x10f   : > { %v505_v23 = vadd.f32 %v504_v56, %v464_v21  ;;  %v2660_v21 = vld [vmem:[#allocation2 + $0x28] sm:$0xff] }
 0x110   : > { %3623 = vst [vmem:[#allocation67_spill] sm:$0xff] %v2660_v21  ;;  %v2738_v56 = vld [vmem:[%s2650_s21 + $0x68] sm:$0xff] }
 0x111   : > { %v425_v51 = vpop.f32.mrf.mxu0 }
 0x112   : > { %v466_v53 = vpop.f32.mrf.mxu1 }
 0x113   : > { %v467_v24 = vadd.f32 %v466_v53, %v425_v51  ;;  %v3634_v51 = vld [vmem:[#allocation27_spill] sm:$0xff]  ;;  %v3635_v53 = vld [vmem:[#allocation22_spill] sm:$0xff] }
 0x116   : > { %v507_v47 = vpop.f32.mrf.mxu2 }
 0x117   : > { %v508_v26 = vadd.f32 %v507_v47, %v467_v24  ;;  %v2618_v24 = vld [vmem:[#allocation2 + $0x8] sm:$0xff]  ;;  %v2716_v47 = vld [vmem:[%s2650_s21 + $0x50] sm:$0xff] }
 0x118   : > { %3619 = vst [vmem:[#allocation63_spill] sm:$0xff] %v2618_v24 }
 0x119   : > { %v428_v50 = vpop.f32.mrf.mxu0 }
 0x11a   : > { %v469_v39 = vpop.f32.mrf.mxu1 }
 0x11b   : > { %v470_v27 = vadd.f32 %v469_v39, %v428_v50  ;;  %v496_v39 = vadd.f32 %v495_v58, %v455_v12  ;;  %v2626_v12 = vld [vmem:[#allocation2 + $0x10] sm:$0xff]  ;;  %v3633_v50 = vld [vmem:[#allocation20_spill] sm:$0xff]  ;;  %v3639_v58 = vld [vmem:[#allocation31_spill] sm:$0xff] }
 0x11c   : > { %3620 = vst [vmem:[#allocation64_spill] sm:$0xff] %v2626_v12 }
 0x11e   : > { %v510_v42 = vpop.f32.mrf.mxu2 }
 0x11f   : > { %v511_v29 = vadd.f32 %v510_v42, %v470_v27  ;;  %v2681_v27 = vld [vmem:[#allocation2 + $0x30] sm:$0xff] }
 0x120   : > { %3624 = vst [vmem:[#allocation68_spill] sm:$0xff] %v2681_v27  ;;  %v3629_v42 = vld [vmem:[#allocation17_spill] sm:$0xff] }
 0x121   : > { %v431_v48 = vpop.f32.mrf.mxu0 }
 0x122   : > { %v472_v45 = vpop.f32.mrf.mxu1 }
 0x123   : > { %v473_v30 = vadd.f32 %v472_v45, %v431_v48  ;;  %v2709_v45 = vld [vmem:[%s2650_s21 + $0x40] sm:$0xff]  ;;  %v3631_v48 = vld [vmem:[#allocation18_spill] sm:$0xff] }
 0x126   : > { %v513_v36 = vpop.f32.mrf.mxu2 }
 0x127   : > { %v514_v32 = vadd.f32 %v513_v36, %v473_v30  ;;  %v2694_v30 = vld [vmem:[%s2650_s21 + $0x38] sm:$0xff]  ;;  %v3627_v36 = vld [vmem:[#allocation21_spill] sm:$0xff] }
 0x128   : > { %3642 = vst [vmem:[#allocation21_spill] sm:$0xff] %v2748_v61 }
 0x129   : > { %v434_v44 = vpop.f32.mrf.mxu0 }
 0x12a   : > { %v475_v33 = vpop.f32.mrf.mxu1 }
 0x12b   : > { %v476_v41 = vadd.f32 %v475_v33, %v434_v44  ;;  %v499_v33 = vadd.f32 %v498_v63, %v458_v15  ;;  %v2634_v15 = vld [vmem:[#allocation2 + $0x18] sm:$0xff]  ;;  %v3630_v44 = vld [vmem:[#allocation23_spill] sm:$0xff] }
 0x12c   : > { %3621 = vst [vmem:[#allocation65_spill] sm:$0xff] %v2634_v15  ;;  %v3644_v63 = vld [vmem:[#allocation35_spill] sm:$0xff] }
 0x12e   : > { %v516_v38 = vpop.f32.mrf.mxu2 }
 0x12f   : > { %v517_v35 = vadd.f32 %v516_v38, %v476_v41  ;;  %v2612_v38 = vld [vmem:[#allocation2] sm:$0xff]  ;;  %v2703_v41 = vld [vmem:[#allocation2 + $0x38] sm:$0xff] }
 0x130   : > { %3618 = vst [vmem:[#allocation62_spill] sm:$0xff] %v2612_v38 }
 0x131   : > { %552 = vmatpush.msra.mxu3 %v517_v35  ;;  %v3626_v35 = vld [vmem:[#allocation16_spill] sm:$0xff] }
 0x132   : > { %3637 = vst [vmem:[#allocation16_spill] sm:$0xff] %v2738_v56 }
 0x133   : > { %553 = vmatpush.msra.mxu3 %v514_v32  ;;  %v3625_v32 = vld [vmem:[#allocation19_spill] sm:$0xff] }
 0x134   : > { %3628 = vst [vmem:[#allocation19_spill] sm:$0xff] %v2703_v41 }
 0x135   : > { %554 = vmatpush.msra.mxu3 %v511_v29  ;;  %v2687_v29 = vld [vmem:[%s2650_s21 + $0x28] sm:$0xff] }
 0x137   : > { %555 = vmatpush.msra.mxu3 %v508_v26  ;;  %v2672_v26 = vld [vmem:[%s2650_s21 + $0x20] sm:$0xff] }
 0x139   : > { %556 = vmatpush.msra.mxu3 %v505_v23  ;;  %v2665_v23 = vld [vmem:[%s2650_s21 + $0x10] sm:$0xff] }
 0x13a   : > { %683 = vmatmul.f32.vlgmr.msrb.gmra.mxu1 %v2665_v23 }
 0x13b   : > { %557 = vmatpush.msra.mxu3 %v502_v20  ;;  %v2653_v20 = vld [vmem:[%s2650_s21 + $0x8] sm:$0xff]  ;;  %1043 = vmatpush.msrb.mxu1 %v2308_v0 }
 0x13c   : > { %642 = vmatmul.f32.vlgmr.msrb.gmra.mxu0 %v2653_v20 }
 0x13d   : > { %558 = vmatpush.msra.mxu3 %v499_v33  ;;  %1002 = vmatpush.msrb.mxu0 %v2316_v3  ;;  %v2754_v33 = vld [vmem:[%s2650_s21 + $0x70] sm:$0xff] }
 0x13e   : > { %1044 = vmatpush.msrb.mxu1 %v2310_v1  ;;  %3645 = vst [vmem:[#allocation17_spill] sm:$0xff] %v2754_v33 }
 0x13f   : > { %559 = vmatpush.msra.mxu3 %v496_v39  ;;  %1003 = vmatpush.msrb.mxu0 %v2323_v6  ;;  %v2760_v39 = vld [vmem:[%s2650_s21 + $0x80] sm:$0xff] }
 0x140   : > { %1762 = vmatmul.msk.f32.vlgmr.msra.gmra.mxu3 %vm519_vm0, %v2612_v38  ;;  %1045 = vmatpush.msrb.mxu1 %v2321_v5  ;;  %3646 = vst [vmem:[#allocation23_spill] sm:$0xff] %v2760_v39  ;;  %v3654_v38 = vld [vmem:[#allocation36_spill] sm:$0xff] }
 0x141   : > { %585 = vmatpush.msrb.mxu3 %v2312_v2  ;;  %1004 = vmatpush.msrb.mxu0 %v2329_v8 }
 0x142   : > { %686 = vmatmul.f32.gmra.mxu1 %v2687_v29 }
 0x143   : > { %586 = vmatpush.msrb.mxu3 %v2318_v4  ;;  %1005 = vmatpush.msrb.mxu0 %v2338_v11 }
 0x144   : > { %645 = vmatmul.f32.gmra.mxu0 %v2672_v26  ;;  %1046 = vmatpush.msrb.mxu1 %v2332_v9 }
 0x145   : > { %587 = vmatpush.msrb.mxu3 %v2325_v7  ;;  %1006 = vmatpush.msrb.mxu0 %v2347_v14 }
 0x146   : > { %1047 = vmatpush.msrb.mxu1 %v3626_v35 }
 0x147   : > { %588 = vmatpush.msrb.mxu3 %v2334_v10  ;;  %1007 = vmatpush.msrb.mxu0 %v2356_v17 }
 0x148   : > { %1763 = vmatmul.msk.f32.gmra.mxu3 %vm519_vm0, %v2618_v24  ;;  %1048 = vmatpush.msrb.mxu1 %v3629_v42  ;;  %v2780_v24 = vld [vmem:[%s2650_s21 + $0x98] sm:$0xff] }
 0x149   : > { %589 = vmatpush.msrb.mxu3 %v2343_v13  ;;  %1008 = vmatpush.msrb.mxu0 %v3625_v32  ;;  %3653 = vst [vmem:[#allocation20_spill] sm:$0xff] %v2780_v24 }
 0x14a   : > { %689 = vmatmul.f32.gmra.mxu1 %v2709_v45 }
 0x14b   : > { %590 = vmatpush.msrb.mxu3 %v2352_v16  ;;  %1009 = vmatpush.msrb.mxu0 %v3627_v36 }
 0x14c   : > { %648 = vmatmul.f32.gmra.mxu0 %v2694_v30  ;;  %1049 = vmatpush.msrb.mxu1 %v3631_v48 }
 0x14d   : > { %591 = vmatpush.msrb.mxu3 %v2361_v19  ;;  %1010 = vmatpush.msrb.mxu0 %v3630_v44 }
 0x14e   : > { %1050 = vmatpush.msrb.mxu1 %v3633_v50 }
 0x14f   : > { %592 = vmatpush.msrb.mxu3 %v2370_v22  ;;  %1011 = vmatpush.msrb.mxu0 %v3632_v49 }
 0x150   : > { %1764 = vmatmul.msk.f32.gmra.mxu3 %vm519_vm0, %v2626_v12  ;;  %1051 = vmatpush.msrb.mxu1 %v3635_v53  ;;  %v2774_v12 = vld [vmem:[%s2650_s21 + $0x88] sm:$0xff] }
 0x151   : > { %593 = vmatpush.msrb.mxu3 %v2379_v25  ;;  %1012 = vmatpush.msrb.mxu0 %v3634_v51  ;;  %3652 = vst [vmem:[#allocation25_spill] sm:$0xff] %v2774_v12 }
 0x152   : > { %692 = vmatmul.f32.gmra.mxu1 %v2732_v55 }
 0x153   : > { %594 = vmatpush.msrb.mxu3 %v2388_v28  ;;  %1013 = vmatpush.msrb.mxu0 %v3636_v54 }
 0x154   : > { %651 = vmatmul.f32.gmra.mxu0 %v2716_v47  ;;  %1052 = vmatpush.msrb.mxu1 %v3638_v57 }
 0x155   : > { %595 = vmatpush.msrb.mxu3 %v2397_v31  ;;  %1014 = vmatpush.msrb.mxu0 %v3639_v58 }
 0x156   : > { %1053 = vmatpush.msrb.mxu1 %v3640_v59 }
 0x157   : > { %596 = vmatpush.msrb.mxu3 %v2406_v34  ;;  %1015 = vmatpush.msrb.mxu0 %v3641_v60 }
 0x158   : > { %1765 = vmatmul.msk.f32.gmra.mxu3 %vm519_vm0, %v2634_v15  ;;  %1054 = vmatpush.msrb.mxu1 %v3643_v62  ;;  %v3651_v15 = vld [vmem:[#allocation34_spill] sm:$0xff] }
 0x159   : > { %597 = vmatpush.msrb.mxu3 %v2415_v37  ;;  %1016 = vmatpush.msrb.mxu0 %v3644_v63 }
 0x15a   : > { %695 = vmatmul.f32.gmra.mxu1 %v2754_v33  ;;  %v2791_v33 = vld [vmem:[%s2650_s21 + $0xa0] sm:$0xff] }
 0x15b   : > { %598 = vmatpush.msrb.mxu3 %v2424_v40  ;;  %3655 = vst [vmem:[#allocation27_spill] sm:$0xff] %v2791_v33 }
 0x15c   : > { %654 = vmatmul.f32.gmra.mxu0 %v2738_v56  ;;  %v2805_v56 = vld [vmem:[%s2650_s21 + $0x60] sm:$0xff] }
 0x15d   : > { %599 = vmatpush.msrb.mxu3 %v2433_v43  ;;  %3658 = vst [vmem:[#allocation29_spill] sm:$0xff] %v2805_v56 }
 0x15f   : > { %600 = vmatpush.msrb.mxu3 %v2442_v46 }
 0x160   : > { %1766 = vmatmul.msk.f32.gmra.mxu3 %vm519_vm0, %v2642_v18  ;;  %v2769_v18 = vld [vmem:[%s2650_s21 + $0x30] sm:$0xff] }
 0x161   : > { %773 = vmatpush.msra.mxu3 %v2312_v2  ;;  %3650 = vst [vmem:[#allocation18_spill] sm:$0xff] %v2769_v18 }
 0x162   : > { %698 = vmatmul.f32.gmra.mxu1 %v2774_v12  ;;  %v3657_v12 = vld [vmem:[#allocation40_spill] sm:$0xff] }
 0x163   : > { %774 = vmatpush.msra.mxu3 %v2318_v4 }
 0x164   : > { %657 = vmatmul.f32.gmra.mxu0 %v2760_v39  ;;  %v2787_v39 = vld [vmem:[%s2650_s21 + $0x48] sm:$0xff] }
 0x165   : > { %775 = vmatpush.msra.mxu3 %v2325_v7 }
 0x167   : > { %776 = vmatpush.msra.mxu3 %v2334_v10 }
 0x168   : > { %1767 = vmatmul.msk.f32.gmra.mxu3 %vm519_vm0, %v2660_v21  ;;  %v3649_v21 = vld [vmem:[#allocation32_spill] sm:$0xff] }
 0x169   : > { %777 = vmatpush.msra.mxu3 %v2343_v13 }
 0x16a   : > { %701 = vmatmul.f32.gmra.mxu1 %v2791_v33 }
 0x16b   : > { %778 = vmatpush.msra.mxu3 %v2352_v16 }
 0x16c   : > { %660 = vmatmul.f32.gmra.mxu0 %v2780_v24  ;;  %v2797_v24 = vld [vmem:[%s2650_s21 + $0xb0] sm:$0xff] }
 0x16d   : > { %779 = vmatpush.msra.mxu3 %v2361_v19  ;;  %3656 = vst [vmem:[#allocation22_spill] sm:$0xff] %v2797_v24 }
 0x16f   : > { %780 = vmatpush.msra.mxu3 %v2370_v22 }
 0x170   : > { %1768 = vmatmul.msk.f32.gmra.mxu3 %vm519_vm0, %v2681_v27  ;;  %v3648_v27 = vld [vmem:[#allocation38_spill] sm:$0xff] }
 0x171   : > { %781 = vmatpush.msra.mxu3 %v2379_v25  ;;  %1017 = vmatpush.msrb.mxu0 %v3648_v27 }
 0x173   : > { %782 = vmatpush.msra.mxu3 %v2388_v28 }
 0x174   : > { %663 = vmatmul.f32.gmra.mxu0 %v2797_v24  ;;  %v3660_v24 = vld [vmem:[#allocation37_spill] sm:$0xff] }
 0x175   : > { %783 = vmatpush.msra.mxu3 %v2397_v31  ;;  %v751_v33 = vmul.f32 %v3660_v24, %v3660_v24 }
 0x177   : > { %784 = vmatpush.msra.mxu3 %v2406_v34 }
 0x178   : > { %1769 = vmatmul.msk.f32.gmra.mxu3 %vm519_vm0, %v2703_v41  ;;  %v3647_v41 = vld [vmem:[#allocation30_spill] sm:$0xff] }
 0x179   : > { %785 = vmatpush.msra.mxu3 %v2415_v37  ;;  %1055 = vmatpush.msrb.mxu1 %v3647_v41 }
 0x17b   : > { %786 = vmatpush.msra.mxu3 %v2424_v40  ;;  %1056 = vmatpush.msrb.mxu1 %v3649_v21 }
 0x17d   : > { %787 = vmatpush.msra.mxu3 %v2433_v43  ;;  %1057 = vmatpush.msrb.mxu1 %v3651_v15 }
 0x17f   : > { %788 = vmatpush.msra.mxu3 %v2442_v46  ;;  %1058 = vmatpush.msrb.mxu1 %v3654_v38 }
 0x180   : > { %601 = vmatmul.f32.vlgmr.msrb.gmra.mxu3 %v2726_v52 }
 0x181   : > { %961 = vmatpush.msrb.mxu3 %v2312_v2 }
 0x183   : > { %962 = vmatpush.msrb.mxu3 %v2318_v4 }
 0x185   : > { %963 = vmatpush.msrb.mxu3 %v2325_v7 }
 0x187   : > { %964 = vmatpush.msrb.mxu3 %v2334_v10 }
 0x188   : > { %604 = vmatmul.f32.gmra.mxu3 %v2748_v61  ;;  %v2808_v61 = vld [vmem:[%s2650_s21 + $0xb8] sm:$0xff] }
 0x189   : > { %965 = vmatpush.msrb.mxu3 %v2343_v13  ;;  %3659 = vst [vmem:[#allocation24_spill] sm:$0xff] %v2808_v61  ;;  %704 = vmatmul.f32.gmra.mxu1 %v2808_v61  ;;  %v3661_v61 = vld [vmem:[#allocation43_spill] sm:$0xff] }
 0x18b   : > { %966 = vmatpush.msrb.mxu3 %v2352_v16 }
 0x18d   : > { %967 = vmatpush.msrb.mxu3 %v2361_v19 }
 0x18f   : > { %968 = vmatpush.msrb.mxu3 %v2370_v22 }
 0x190   : > { %607 = vmatmul.f32.gmra.mxu3 %v2769_v18  ;;  %v750_v18 = vmul.f32 %v3657_v12, %v3657_v12  ;;  %v2819_v12 = vld [vmem:[%s2650_s21 + $0x78] sm:$0xff] }
 0x191   : > { %969 = vmatpush.msrb.mxu3 %v2379_v25  ;;  %871 = vmatmul.f32.vlgmr.msra.gmra.mxu1 %v751_v33  ;;  %v3685_v33 = vld [vmem:[#allocation54_spill] sm:$0xff] }
 0x192   : > { %830 = vmatmul.f32.vlgmr.msra.gmra.mxu0 %v750_v18  ;;  %1231 = vmatpush.msra.mxu1 %v2308_v0  ;;  %v753_v18 = vmul.f32 %v3661_v61, %v3661_v61  ;;  %v3663_v0 = vld [vmem:[#allocation46_spill] sm:$0xff] }
 0x193   : > { %970 = vmatpush.msrb.mxu3 %v2388_v28  ;;  %1190 = vmatpush.msra.mxu0 %v2316_v3  ;;  %v2830_v3 = vld [vmem:[%s2650_s21 + $0x90] sm:$0xff] }
 0x194   : > { %1232 = vmatpush.msra.mxu1 %v2310_v1  ;;  %v756_v1 = vmul.f32 %v3663_v0, %v3663_v0 }
 0x195   : > { %971 = vmatpush.msrb.mxu3 %v2397_v31  ;;  %1191 = vmatpush.msra.mxu0 %v2323_v6  ;;  %v3662_v6 = vld [vmem:[#allocation41_spill] sm:$0xff] }
 0x196   : > { %1233 = vmatpush.msra.mxu1 %v2321_v5  ;;  %v2845_v5 = vld [vmem:[%s2650_s21 + $0xa8] sm:$0xff] }
 0x197   : > { %972 = vmatpush.msrb.mxu3 %v2406_v34  ;;  %1192 = vmatpush.msra.mxu0 %v2329_v8  ;;  %v754_v8 = vmul.f32 %v3662_v6, %v3662_v6 }
 0x198   : > { %610 = vmatmul.f32.gmra.mxu3 %v2787_v39  ;;  %1234 = vmatpush.msra.mxu1 %v2332_v9  ;;  %v3664_v9 = vld [vmem:[#allocation44_spill] sm:$0xff] }
 0x199   : > { %973 = vmatpush.msrb.mxu3 %v2415_v37  ;;  %1193 = vmatpush.msra.mxu0 %v2338_v11  ;;  %v757_v11 = vmul.f32 %v3664_v9, %v3664_v9 }
 0x19a   : > { %833 = vmatmul.f32.gmra.mxu0 %v753_v18  ;;  %874 = vmatmul.f32.gmra.mxu1 %v754_v8  ;;  %v764_v18 = vmul.f32 %v3685_v33, %v3685_v33 }
 0x19b   : > { %974 = vmatpush.msrb.mxu3 %v2424_v40  ;;  %1194 = vmatpush.msra.mxu0 %v2347_v14  ;;  %v3665_v14 = vld [vmem:[#allocation49_spill] sm:$0xff] }
 0x19c   : > { %1235 = vmatpush.msra.mxu1 %v3626_v35 }
 0x19d   : > { %975 = vmatpush.msrb.mxu3 %v2433_v43  ;;  %1195 = vmatpush.msra.mxu0 %v2356_v17  ;;  %v759_v17 = vmul.f32 %v3665_v14, %v3665_v14 }
 0x19e   : > { %1236 = vmatpush.msra.mxu1 %v3629_v42 }
 0x19f   : > { %976 = vmatpush.msrb.mxu3 %v2442_v46  ;;  %1196 = vmatpush.msra.mxu0 %v3625_v32  ;;  %v3666_v32 = vld [vmem:[#allocation39_spill] sm:$0xff] }
 0x1a0   : > { %613 = vmatmul.f32.gmra.mxu3 %v2805_v56  ;;  %1237 = vmatpush.msra.mxu1 %v3631_v48  ;;  %v749_v35 = vmul.f32 %v3666_v32, %v3666_v32  ;;  %v3669_v48 = vld [vmem:[#allocation52_spill] sm:$0xff] }
 0x1a1   : > { %1197 = vmatpush.msra.mxu0 %v3627_v36  ;;  %v3667_v36 = vld [vmem:[#allocation47_spill] sm:$0xff] }
 0x1a2   : > { %836 = vmatmul.f32.gmra.mxu0 %v756_v1  ;;  %1238 = vmatpush.msra.mxu1 %v3633_v50  ;;  %v760_v42 = vmul.f32 %v3667_v36, %v3667_v36  ;;  %v3670_v50 = vld [vmem:[#allocation42_spill] sm:$0xff]  ;;  %v3687_v1 = vld [vmem:[#allocation57_spill] sm:$0xff] }
 0x1a3   : > { %1198 = vmatpush.msra.mxu0 %v3630_v44  ;;  %877 = vmatmul.f32.gmra.mxu1 %v757_v11  ;;  %v767_v11 = vmul.f32 %v3687_v1, %v3687_v1  ;;  %v3700_v1 = vld [vmem:[#allocation24_spill] sm:$0xff] }
 0x1a4   : > { %1239 = vmatpush.msra.mxu1 %v3635_v53  ;;  %v3674_v53 = vld [vmem:[#allocation45_spill] sm:$0xff]  ;;  %v960_v33 = vmul.f32 %v3700_v1, %v3700_v1 }
 0x1a5   : > { %1199 = vmatpush.msra.mxu0 %v3632_v49  ;;  %v762_v49 = vmul.f32 %v3669_v48, %v3669_v48 }
 0x1a6   : > { %1240 = vmatpush.msra.mxu1 %v3638_v57 }
 0x1a7   : > { %1200 = vmatpush.msra.mxu0 %v3634_v51  ;;  %v752_v51 = vmul.f32 %v3670_v50, %v3670_v50 }
 0x1a8   : > { %616 = vmatmul.f32.gmra.mxu3 %v2819_v12  ;;  %1241 = vmatpush.msra.mxu1 %v3640_v59  ;;  %v3682_v59 = vld [vmem:[#allocation51_spill] sm:$0xff] }
 0x1a9   : > { %1201 = vmatpush.msra.mxu0 %v3636_v54  ;;  %v3678_v54 = vld [vmem:[#allocation48_spill] sm:$0xff] }
 0x1aa   : > { %839 = vmatmul.f32.gmra.mxu0 %v759_v17  ;;  %1242 = vmatpush.msra.mxu1 %v3643_v62  ;;  %v758_v57 = vmul.f32 %v3678_v54, %v3678_v54  ;;  %v941_v17 = vmul.f32 %v2672_v26, %v2672_v26  ;;  %v937_v54 = vmul.f32 %v2726_v52, %v2726_v52 }
 0x1ab   : > { %880 = vmatmul.f32.gmra.mxu1 %v760_v42  ;;  %1202 = vmatpush.msra.mxu0 %v3639_v58  ;;  %v3681_v58 = vld [vmem:[#allocation61_spill] sm:$0xff]  ;;  %v942_v42 = vmul.f32 %v2687_v29, %v2687_v29 }
 0x1ac   : > { %1243 = vmatpush.msra.mxu1 %v3647_v41 }
 0x1ad   : > { %1203 = vmatpush.msra.mxu0 %v3641_v60  ;;  %v761_v60 = vmul.f32 %v3682_v59, %v3682_v59 }
 0x1ae   : > { %1244 = vmatpush.msra.mxu1 %v3649_v21 }
 0x1af   : > { %1204 = vmatpush.msra.mxu0 %v3644_v63 }
 0x1b0   : > { %619 = vmatmul.f32.gmra.mxu3 %v2830_v3  ;;  %1245 = vmatpush.msra.mxu1 %v3651_v15  ;;  %v755_v15 = vmul.f32 %v3674_v53, %v3674_v53 }
 0x1b1   : > { %1205 = vmatpush.msra.mxu0 %v3648_v27  ;;  %v3677_v27 = vld [vmem:[#allocation58_spill] sm:$0xff] }
 0x1b2   : > { %842 = vmatmul.f32.gmra.mxu0 %v762_v49  ;;  %1246 = vmatpush.msra.mxu1 %v3654_v38 }
 0x1b7   : > { %v684_v8 = vpop.f32.mrf.mxu1 }
 0x1b8   : > { %622 = vmatmul.f32.gmra.mxu3 %v2845_v5 }
 0x1b9   : > { %v643_v63 = vpop.f32.mrf.mxu0 }
 0x1c0   : > { %789 = vmatmul.f32.vlgmr.msra.gmra.mxu3 %v749_v35  ;;  %v2938_v35 = vpop.f32.mrf.mxu1 }
 0x1c1   : > { %1149 = vmatpush.msra.mxu3 %v2312_v2  ;;  %v3671_v2 = vld [vmem:[#allocation50_spill] sm:$0xff] }
 0x1c2   : > { %v763_v41 = vmul.f32 %v3671_v2, %v3671_v2 }
 0x1c3   : > { %v2869_v44 = vpop.f32.mrf.mxu3  ;;  %1150 = vmatpush.msra.mxu3 %v2318_v4 }
 0x1c4   : > { %3668 = vst [vmem:[#allocation31_spill] sm:$0xff] %v2869_v44  ;;  %883 = vmatmul.f32.gmra.mxu1 %v763_v41 }
 0x1c5   : > { %1151 = vmatpush.msra.mxu3 %v2325_v7  ;;  %v3673_v7 = vld [vmem:[#allocation55_spill] sm:$0xff] }
 0x1c6   : > { %v765_v21 = vmul.f32 %v3673_v7, %v3673_v7 }
 0x1c7   : > { %1152 = vmatpush.msra.mxu3 %v2334_v10  ;;  %v3675_v10 = vld [vmem:[#allocation53_spill] sm:$0xff] }
 0x1c8   : > { %792 = vmatmul.f32.gmra.mxu3 %v752_v51  ;;  %845 = vmatmul.f32.gmra.mxu0 %v765_v21  ;;  %v3689_v51 = vld [vmem:[#allocation60_spill] sm:$0xff]  ;;  %v944_v21 = vmul.f32 %v2694_v30, %v2694_v30  ;;  %v2950_v53 = vpop.f32.mrf.mxu1 }
 0x1c9   : > { %1153 = vmatpush.msra.mxu3 %v2343_v13  ;;  %v766_v13 = vmul.f32 %v3675_v10, %v3675_v10  ;;  %v770_v41 = vmul.f32 %v3689_v51, %v3689_v51 }
 0x1cb   : > { %v2887_v4 = vpop.f32.mrf.mxu3  ;;  %1154 = vmatpush.msra.mxu3 %v2352_v16  ;;  %v768_v16 = vmul.f32 %v3677_v27, %v3677_v27 }
 0x1cc   : > { %3672 = vst [vmem:[#allocation26_spill] sm:$0xff] %v2887_v4  ;;  %886 = vmatmul.f32.gmra.mxu1 %v766_v13 }
 0x1cd   : > { %1155 = vmatpush.msra.mxu3 %v2361_v19  ;;  %v3679_v19 = vld [vmem:[#allocation56_spill] sm:$0xff] }
 0x1cf   : > { %1156 = vmatpush.msra.mxu3 %v2370_v22  ;;  %v769_v22 = vmul.f32 %v3679_v19, %v3679_v19 }
 0x1d0   : > { %795 = vmatmul.f32.gmra.mxu3 %v755_v15  ;;  %848 = vmatmul.f32.gmra.mxu0 %v768_v16  ;;  %v945_v15 = vmul.f32 %v2709_v45, %v2709_v45 }
 0x1d1   : > { %1157 = vmatpush.msra.mxu3 %v2379_v25 }
 0x1d3   : > { %v2899_v38 = vpop.f32.mrf.mxu3  ;;  %1158 = vmatpush.msra.mxu3 %v2388_v28  ;;  %v771_v28 = vmul.f32 %v3681_v58, %v3681_v58  ;;  %v1127_v58 = vmul.f32 %v2665_v23, %v3660_v24  ;;  %v1130_v24 = vmul.f32 %v2687_v29, %v3662_v6  ;;  %v1125_v6 = vmul.f32 %v2726_v52, %v3666_v32 }
 0x1d4   : > { %3676 = vst [vmem:[#allocation33_spill] sm:$0xff] %v2899_v38  ;;  %889 = vmatmul.f32.gmra.mxu1 %v769_v22  ;;  %v2962_v22 = vpop.f32.mrf.mxu1 }
 0x1d5   : > { %1159 = vmatpush.msra.mxu3 %v2397_v31  ;;  %v3683_v31 = vld [vmem:[#allocation59_spill] sm:$0xff] }
 0x1d6   : > { %v772_v62 = vmul.f32 %v3683_v31, %v3683_v31 }
 0x1d7   : > { %1160 = vmatpush.msra.mxu3 %v2406_v34  ;;  %v938_v34 = vmul.f32 %v2653_v20, %v2653_v20 }
 0x1d8   : > { %798 = vmatmul.f32.gmra.mxu3 %v758_v57  ;;  %851 = vmatmul.f32.gmra.mxu0 %v771_v28  ;;  %v947_v57 = vmul.f32 %v2716_v47, %v2716_v47  ;;  %v948_v28 = vmul.f32 %v2732_v55, %v2732_v55 }
 0x1d9   : > { %1161 = vmatpush.msra.mxu3 %v2415_v37 }
 0x1db   : > { %v2911_v25 = vpop.f32.mrf.mxu3  ;;  %1162 = vmatpush.msra.mxu3 %v2424_v40  ;;  %v939_v40 = vmul.f32 %v2665_v23, %v2665_v23 }
 0x1dc   : > { %3680 = vst [vmem:[#allocation28_spill] sm:$0xff] %v2911_v25  ;;  %892 = vmatmul.f32.gmra.mxu1 %v772_v62  ;;  %v3698_v25 = vld [vmem:[#allocation27_spill] sm:$0xff] }
 0x1dd   : > { %1163 = vmatpush.msra.mxu3 %v2433_v43  ;;  %v957_v38 = vmul.f32 %v3698_v25, %v3698_v25 }
 0x1df   : > { %1164 = vmatpush.msra.mxu3 %v2442_v46  ;;  %v2932_v46 = vpop.f32.mrf.mxu0 }
 0x1e0   : > { %801 = vmatmul.f32.gmra.mxu3 %v761_v60  ;;  %1018 = vmatmul.f32.vlgmr.msrb.gmra.mxu0 %v938_v34  ;;  %v3691_v34 = vld [vmem:[#allocation21_spill] sm:$0xff] }
 0x1e3   : > { %v2924_v37 = vpop.f32.mrf.mxu3 }
 0x1e4   : > { %3684 = vst [vmem:[#allocation35_spill] sm:$0xff] %v2924_v37  ;;  %1059 = vmatmul.f32.vlgmr.msrb.gmra.mxu1 %v939_v40  ;;  %v940_v40 = vmul.f32 %v3691_v34, %v3691_v34 }
 0x1e7   : > { %v2944_v50 = vpop.f32.mrf.mxu0 }
 0x1e8   : > { %804 = vmatmul.f32.gmra.mxu3 %v764_v18  ;;  %1021 = vmatmul.f32.gmra.mxu0 %v941_v17  ;;  %v3692_v18 = vld [vmem:[#allocation16_spill] sm:$0xff]  ;;  %v2972_v17 = vpop.f32.mrf.mxu1 }
 0x1eb   : > { %v2930_v43 = vpop.f32.mrf.mxu3 }
 0x1ec   : > { %3686 = vst [vmem:[#allocation30_spill] sm:$0xff] %v2930_v43  ;;  %1062 = vmatmul.f32.gmra.mxu1 %v942_v42  ;;  %v3693_v42 = vld [vmem:[#allocation17_spill] sm:$0xff] }
 0x1ef   : > { %v2956_v16 = vpop.f32.mrf.mxu0 }
 0x1f0   : > { %807 = vmatmul.f32.gmra.mxu3 %v767_v11  ;;  %1024 = vmatmul.f32.gmra.mxu0 %v944_v21  ;;  %v950_v11 = vmul.f32 %v3692_v18, %v3692_v18 }
 0x1f3   : > { %v2942_v49 = vpop.f32.mrf.mxu3 }
 0x1f4   : > { %3688 = vst [vmem:[#allocation38_spill] sm:$0xff] %v2942_v49  ;;  %1065 = vmatmul.f32.gmra.mxu1 %v945_v15 }
 0x1f7   : > { %v2966_v60 = vpop.f32.mrf.mxu0 }
 0x1f8   : > { %810 = vmatmul.f32.gmra.mxu3 %v770_v41  ;;  %1027 = vmatmul.f32.gmra.mxu0 %v947_v57  ;;  %v951_v41 = vmul.f32 %v3693_v42, %v3693_v42 }
 0x1fb   : > { %v2954_v13 = vpop.f32.mrf.mxu3 }
 0x1fc   : > { %3690 = vst [vmem:[#allocation32_spill] sm:$0xff] %v2954_v13  ;;  %1068 = vmatmul.f32.gmra.mxu1 %v948_v28  ;;  %v3695_v28 = vld [vmem:[#allocation23_spill] sm:$0xff]  ;;  %v2984_v13 = vpop.f32.mrf.mxu1 }
 0x200   : > { %977 = vmatmul.f32.vlgmr.msrb.gmra.mxu3 %v937_v54  ;;  %1030 = vmatmul.f32.gmra.mxu0 %v950_v11  ;;  %v658_v54 = vpop.f32.mrf.mxu0  ;;  %v3696_v11 = vld [vmem:[#allocation25_spill] sm:$0xff] }
 0x201   : > { %v954_v49 = vmul.f32 %v3696_v11, %v3696_v11 }
 0x203   : > { %v602_v59 = vpop.f32.mrf.mxu3 }
 0x204   : > { %v644_v62 = vadd.f32 %v643_v63, %v602_v59  ;;  %1071 = vmatmul.f32.gmra.mxu1 %v951_v41  ;;  %v3694_v63 = vld [vmem:[#allocation18_spill] sm:$0xff]  ;;  %v953_v59 = vmul.f32 %v3695_v28, %v3695_v28  ;;  %v3697_v41 = vld [vmem:[#allocation20_spill] sm:$0xff]  ;;  %v702_v37 = vpop.f32.mrf.mxu1 }
 0x205   : > { %v943_v57 = vmul.f32 %v3694_v63, %v3694_v63  ;;  %v956_v43 = vmul.f32 %v3697_v41, %v3697_v41 }
 0x206   : > { %v2976_v21 = vadd.f32 %v684_v8, %v644_v62 }
 0x208   : > { %980 = vmatmul.f32.gmra.mxu3 %v940_v40  ;;  %1033 = vmatmul.f32.gmra.mxu0 %v953_v59  ;;  %v661_v62 = vpop.f32.mrf.mxu0  ;;  %v946_v40 = vmul.f32 %v2787_v39, %v2787_v39 }
 0x20b   : > { %v2978_v15 = vpop.f32.mrf.mxu3 }
 0x20c   : > { %1074 = vmatmul.f32.gmra.mxu1 %v954_v49  ;;  %v949_v49 = vmul.f32 %v2805_v56, %v2805_v56  ;;  %v705_v51 = vpop.f32.mrf.mxu1  ;;  %v952_v56 = vmul.f32 %v2819_v12, %v2819_v12 }
 0x210   : > { %983 = vmatmul.f32.gmra.mxu3 %v943_v57  ;;  %1036 = vmatmul.f32.gmra.mxu0 %v956_v43  ;;  %v664_v4 = vpop.f32.mrf.mxu0  ;;  %v3699_v57 = vld [vmem:[#allocation22_spill] sm:$0xff]  ;;  %v3701_v43 = vld [vmem:[#allocation40_spill] sm:$0xff] }
 0x211   : > { %v959_v44 = vmul.f32 %v3699_v57, %v3699_v57  ;;  %v1126_v31 = vmul.f32 %v2653_v20, %v3701_v43  ;;  %v1129_v20 = vmul.f32 %v2672_v26, %v3661_v61  ;;  %v1133_v26 = vmul.f32 %v2709_v45, %v3664_v9 }
 0x212   : > { %v1136_v45 = vmul.f32 %v2732_v55, %v3667_v36  ;;  %v1903_v36 = vld [vmem:[%s2302_s5 + $0x18] sm:$0xff] }
 0x213   : > { %v2988_v8 = vpop.f32.mrf.mxu3 }
 0x214   : > { %1077 = vmatmul.f32.gmra.mxu1 %v957_v38  ;;  %v872_v25 = vpop.f32.mrf.mxu1 }
 0x218   : > { %986 = vmatmul.f32.gmra.mxu3 %v946_v40  ;;  %1039 = vmatmul.f32.gmra.mxu0 %v959_v44  ;;  %v831_v38 = vpop.f32.mrf.mxu0 }
 0x21b   : > { %v611_v59 = vpop.f32.mrf.mxu3 }
 0x21c   : > { %1080 = vmatmul.f32.gmra.mxu1 %v960_v33  ;;  %v955_v33 = vmul.f32 %v2830_v3, %v2830_v3  ;;  %v653_v52 = vadd.f32 %v2956_v16, %v611_v59  ;;  %v647_v16 = vadd.f32 %v2932_v46, %v2978_v15  ;;  %v1141_v15 = vmul.f32 %v3695_v28, %v3673_v7 }
 0x21d   : > { %v1144_v7 = vmul.f32 %v3697_v41, %v3677_v27  ;;  %v3708_v27 = vld [vmem:[#allocation59_spill] sm:$0xff] }
 0x21e   : > { %v1148_v41 = vmul.f32 %v3700_v1, %v3708_v27 }
 0x220   : > { %989 = vmatmul.f32.gmra.mxu3 %v949_v49  ;;  %1206 = vmatmul.f32.vlgmr.msra.gmra.mxu0 %v1126_v31  ;;  %v3008_v57 = vpop.f32.mrf.mxu0  ;;  %v3014_v49 = vpop.f32.mrf.mxu1  ;;  %v1132_v31 = vmul.f32 %v2694_v30, %v3663_v0 }
 0x223   : > { %v614_v40 = vpop.f32.mrf.mxu3 }
 0x224   : > { %1247 = vmatmul.f32.vlgmr.msra.gmra.mxu1 %v1127_v58  ;;  %v958_v58 = vmul.f32 %v2845_v5, %v2845_v5  ;;  %v656_v9 = vadd.f32 %v2966_v60, %v614_v40  ;;  %v1128_v60 = vmul.f32 %v1903_v36, %v3691_v34 }
 0x226   : > { %v697_v55 = vadd.f32 %v2972_v17, %v656_v9  ;;  %v1139_v17 = vmul.f32 %v3693_v42, %v3671_v2  ;;  %v3702_v42 = vld [vmem:[#allocation62_spill] sm:$0xff] }
 0x228   : > { %992 = vmatmul.f32.gmra.mxu3 %v952_v56  ;;  %1209 = vmatmul.f32.gmra.mxu0 %v1129_v20  ;;  %v3018_v56 = vpop.f32.mrf.mxu0  ;;  %v3024_v43 = vpop.f32.mrf.mxu1 }
 0x22b   : > { %v617_v44 = vpop.f32.mrf.mxu3 }
 0x22c   : > { %1250 = vmatmul.f32.gmra.mxu1 %v1130_v24  ;;  %v1135_v24 = vmul.f32 %v2716_v47, %v3665_v14  ;;  %v659_v0 = vadd.f32 %v658_v54, %v617_v44  ;;  %v650_v14 = vadd.f32 %v2944_v50, %v2988_v8  ;;  %v694_v54 = vadd.f32 %v2962_v22, %v653_v52  ;;  %v3705_v44 = vld [vmem:[#allocation29_spill] sm:$0xff] }
 0x22e   : > { %v700_v47 = vadd.f32 %v2984_v13, %v659_v0  ;;  %v691_v34 = vadd.f32 %v2950_v53, %v650_v14  ;;  %v1142_v53 = vmul.f32 %v3696_v11, %v3675_v10  ;;  %v3704_v10 = vld [vmem:[#allocation63_spill] sm:$0xff] }
 0x230   : > { %995 = vmatmul.f32.gmra.mxu3 %v955_v33  ;;  %1212 = vmatmul.f32.gmra.mxu0 %v1132_v31  ;;  %v3028_v61 = vpop.f32.mrf.mxu0  ;;  %v3034_v30 = vpop.f32.mrf.mxu1 }
 0x233   : > { %v620_v23 = vpop.f32.mrf.mxu3 }
 0x234   : > { %1253 = vmatmul.f32.gmra.mxu1 %v1133_v26  ;;  %v662_v33 = vadd.f32 %v661_v62, %v620_v23  ;;  %v1905_v62 = vld [vmem:[%s2302_s5 + $0x48] sm:$0xff]  ;;  %v3706_v26 = vld [vmem:[#allocation61_spill] sm:$0xff] }
 0x238   : > { %998 = vmatmul.f32.gmra.mxu3 %v958_v58  ;;  %1215 = vmatmul.f32.gmra.mxu0 %v1135_v24  ;;  %v703_v58 = vadd.f32 %v702_v37, %v662_v33  ;;  %v1138_v37 = vmul.f32 %v3692_v18, %v3669_v48  ;;  %v688_v48 = vadd.f32 %v2938_v35, %v647_v16  ;;  %v1904_v18 = vld [vmem:[%s2302_s5 + $0x30] sm:$0xff]  ;;  %v3709_v33 = vld [vmem:[#allocation64_spill] sm:$0xff]  ;;  %v3710_v24 = vld [vmem:[#allocation54_spill] sm:$0xff] }
 0x239   : > { %v1131_v22 = vmul.f32 %v1904_v18, %v3694_v63  ;;  %v1134_v63 = vmul.f32 %v1905_v62, %v2787_v39  ;;  %v3707_v39 = vld [vmem:[#allocation22_spill] sm:$0xff]  ;;  %v1140_v0 = vmul.f32 %v2819_v12, %v3710_v24 }
 0x23b   : > { %v623_v29 = vpop.f32.mrf.mxu3 }
 0x23c   : > { %v665_v20 = vadd.f32 %v664_v4, %v623_v29  ;;  %1256 = vmatmul.f32.gmra.mxu1 %v1136_v45  ;;  %v3043_v4 = vpop.f32.mrf.mxu0  ;;  %v1147_v29 = vmul.f32 %v3707_v39, %v3706_v26  ;;  %v3711_v45 = vld [vmem:[#allocation65_spill] sm:$0xff] }
 0x23e   : > { %v706_v31 = vadd.f32 %v705_v51, %v665_v20 }
 0x240   : > { %716 = vmatpush.msrb.mxu2 %v706_v31  ;;  %1165 = vmatmul.f32.vlgmr.msra.gmra.mxu3 %v1125_v6 }
 0x241   : > { %v3052_v13 = vpop.f32.mrf.mxu1  ;;  %1218 = vmatmul.f32.gmra.mxu0 %v1138_v37 }
 0x242   : > { %717 = vmatpush.msrb.mxu2 %v703_v58  ;;  %v3712_v58 = vld [vmem:[#allocation57_spill] sm:$0xff] }
 0x243   : > { %v790_v32 = vpop.f32.mrf.mxu3  ;;  %v1143_v52 = vmul.f32 %v2830_v3, %v3712_v58 }
 0x244   : > { %v832_v51 = vadd.f32 %v831_v38, %v790_v32  ;;  %718 = vmatpush.msrb.mxu2 %v700_v47  ;;  %1259 = vmatmul.f32.gmra.mxu1 %v1139_v17  ;;  %v1906_v38 = vld [vmem:[%s2302_s5 + $0x60] sm:$0xff]  ;;  %v3713_v47 = vld [vmem:[#allocation66_spill] sm:$0xff] }
 0x245   : > { %v1137_v23 = vmul.f32 %v1906_v38, %v3705_v44 }
 0x246   : > { %v3054_v50 = vadd.f32 %v872_v25, %v832_v51  ;;  %719 = vmatpush.msrb.mxu2 %v697_v55  ;;  %v846_v25 = vpop.f32.mrf.mxu0  ;;  %v3714_v51 = vld [vmem:[#allocation60_spill] sm:$0xff]  ;;  %v3715_v55 = vld [vmem:[#allocation67_spill] sm:$0xff] }
 0x247   : > { %v1146_v12 = vmul.f32 %v2845_v5, %v3714_v51 }
 0x248   : > { %720 = vmatpush.msrb.mxu2 %v694_v54  ;;  %1168 = vmatmul.f32.gmra.mxu3 %v1128_v60 }
 0x249   : > { %v887_v2 = vpop.f32.mrf.mxu1  ;;  %1221 = vmatmul.f32.gmra.mxu0 %v1141_v15 }
 0x24a   : > { %721 = vmatpush.msrb.mxu2 %v691_v34  ;;  %v3716_v34 = vld [vmem:[#allocation68_spill] sm:$0xff] }
 0x24b   : > { %v3061_v46 = vpop.f32.mrf.mxu3 }
 0x24c   : > { %722 = vmatpush.msrb.mxu2 %v688_v48  ;;  %1262 = vmatmul.f32.gmra.mxu1 %v1142_v53 }
 0x24e   : > { %723 = vmatpush.msrb.mxu2 %v2976_v21  ;;  %v849_v8 = vpop.f32.mrf.mxu0  ;;  %v3703_v21 = vld [vmem:[#allocation27_spill] sm:$0xff] }
 0x24f   : > { %1770 = vmatmul.msk.f32.vlgmr.msrb.gmra.mxu2 %vm519_vm0, %v3702_v42  ;;  %v1145_v59 = vmul.f32 %v3703_v21, %v3679_v19  ;;  %v3717_v21 = vld [vmem:[#allocation19_spill] sm:$0xff] }
 0x250   : > { %1171 = vmatmul.f32.gmra.mxu3 %v1131_v22 }
 0x251   : > { %v890_v28 = vpop.f32.mrf.mxu1  ;;  %1224 = vmatmul.f32.gmra.mxu0 %v1144_v7  ;;  %v835_v7 = vadd.f32 %v3008_v57, %v3061_v46 }
 0x253   : > { %v796_v35 = vpop.f32.mrf.mxu3 }
 0x254   : > { %1265 = vmatmul.f32.gmra.mxu1 %v1145_v59 }
 0x256   : > { %v852_v40 = vpop.f32.mrf.mxu0 }
 0x257   : > { %1771 = vmatmul.msk.f32.gmra.mxu2 %vm519_vm0, %v3704_v10 }
 0x258   : > { %1174 = vmatmul.f32.gmra.mxu3 %v1134_v63  ;;  %v838_v63 = vadd.f32 %v3018_v56, %v796_v35 }
 0x259   : > { %v893_v6 = vpop.f32.mrf.mxu1  ;;  %1227 = vmatmul.f32.gmra.mxu0 %v1147_v29 }
 0x25b   : > { %v799_v11 = vpop.f32.mrf.mxu3 }
 0x25c   : > { %1268 = vmatmul.f32.gmra.mxu1 %v1148_v41  ;;  %v841_v22 = vadd.f32 %v3028_v61, %v799_v11  ;;  %v879_v61 = vadd.f32 %v3024_v43, %v838_v63 }
 0x25e   : > { %v1019_v20 = vpop.f32.mrf.mxu0 }
 0x25f   : > { %1772 = vmatmul.msk.f32.gmra.mxu2 %vm519_vm0, %v3709_v33 }
 0x260   : > { %1177 = vmatmul.f32.gmra.mxu3 %v1137_v23 }
 0x261   : > { %v1060_v31 = vpop.f32.mrf.mxu1 }
 0x263   : > { %v802_v19 = vpop.f32.mrf.mxu3 }
 0x264   : > { %v844_v48 = vadd.f32 %v3043_v4, %v802_v19  ;;  %v882_v4 = vadd.f32 %v3034_v30, %v841_v22 }
 0x266   : > { %v3094_v1 = vpop.f32.mrf.mxu0 }
 0x267   : > { %1773 = vmatmul.msk.f32.gmra.mxu2 %vm519_vm0, %v3711_v45 }
 0x268   : > { %1180 = vmatmul.f32.gmra.mxu3 %v1140_v0 }
 0x269   : > { %v3098_v14 = vpop.f32.mrf.mxu1 }
 0x26b   : > { %v805_v9 = vpop.f32.mrf.mxu3 }
 0x26c   : > { %v847_v54 = vadd.f32 %v846_v25, %v805_v9 }
 0x26e   : > { %v3104_v36 = vpop.f32.mrf.mxu0  ;;  %v888_v15 = vadd.f32 %v887_v2, %v847_v54  ;;  %v876_v2 = vadd.f32 %v3014_v49, %v835_v7 }
 0x26f   : > { %1774 = vmatmul.msk.f32.gmra.mxu2 %vm519_vm0, %v3713_v47 }
 0x270   : > { %1183 = vmatmul.f32.gmra.mxu3 %v1143_v52 }
 0x271   : > { %v3106_v60 = vpop.f32.mrf.mxu1 }
 0x273   : > { %v808_v32 = vpop.f32.mrf.mxu3 }
 0x274   : > { %v850_v37 = vadd.f32 %v849_v8, %v808_v32  ;;  %v885_v8 = vadd.f32 %v3052_v13, %v844_v48 }
 0x276   : > { %v891_v18 = vadd.f32 %v890_v28, %v850_v37  ;;  %v1028_v5 = vpop.f32.mrf.mxu0 }
 0x277   : > { %1775 = vmatmul.msk.f32.gmra.mxu2 %vm519_vm0, %v3715_v55 }
 0x278   : > { %1186 = vmatmul.f32.gmra.mxu3 %v1146_v12 }
 0x279   : > { %v1069_v62 = vpop.f32.mrf.mxu1 }
 0x27b   : > { %v811_v3 = vpop.f32.mrf.mxu3 }
 0x27c   : > { %v853_v16 = vadd.f32 %v852_v40, %v811_v3 }
 0x27e   : > { %v894_v17 = vadd.f32 %v893_v6, %v853_v16  ;;  %v1031_v13 = vpop.f32.mrf.mxu0  ;;  %v1907_v16 = vld [vmem:[#allocation2] sm:$0xff] }
 0x27f   : > { %1776 = vmatmul.msk.f32.gmra.mxu2 %vm519_vm0, %v3716_v34 }
 0x280   : > { %904 = vmatpush.msra.mxu2 %v894_v17 }
 0x281   : > { %v1072_v35 = vpop.f32.mrf.mxu1 }
 0x282   : > { %905 = vmatpush.msra.mxu2 %v891_v18  ;;  %v1908_v18 = vld [vmem:[#allocation2 + $0x8] sm:$0xff] }
 0x283   : > { %v978_v53 = vpop.f32.mrf.mxu3 }
 0x284   : > { %v1020_v25 = vadd.f32 %v1019_v20, %v978_v53  ;;  %906 = vmatpush.msra.mxu2 %v888_v15  ;;  %v1909_v15 = vld [vmem:[#allocation2 + $0x10] sm:$0xff] }
 0x286   : > { %v1061_v28 = vadd.f32 %v1060_v31, %v1020_v25  ;;  %907 = vmatpush.msra.mxu2 %v885_v8  ;;  %v1034_v30 = vpop.f32.mrf.mxu0  ;;  %v1910_v8 = vld [vmem:[#allocation2 + $0x18] sm:$0xff] }
 0x287   : > { %1777 = vmatmul.msk.f32.gmra.mxu2 %vm519_vm0, %v3717_v21 }
 0x288   : > { %908 = vmatpush.msra.mxu2 %v882_v4 }
 0x289   : > { %v1075_v46 = vpop.f32.mrf.mxu1 }
 0x28a   : > { %909 = vmatpush.msra.mxu2 %v879_v61 }
 0x28b   : > { %v981_v56 = vpop.f32.mrf.mxu3 }
 0x28c   : > { %910 = vmatpush.msra.mxu2 %v876_v2  ;;  %v1023_v58 = vadd.f32 %v3094_v1, %v981_v56 }
 0x28e   : > { %911 = vmatpush.msra.mxu2 %v3054_v50  ;;  %v1037_v49 = vpop.f32.mrf.mxu0  ;;  %v1064_v37 = vadd.f32 %v3098_v14, %v1023_v58 }
 0x28f   : > { %1778 = vmatmul.msk.f32.vlgmr.msra.gmra.mxu2 %vm519_vm0, %v3702_v42 }
 0x291   : > { %v1078_v59 = vpop.f32.mrf.mxu1 }
 0x293   : > { %v984_v57 = vpop.f32.mrf.mxu3 }
 0x294   : > { %v1026_v31 = vadd.f32 %v3104_v36, %v984_v57 }
 0x296   : > { %v1040_v50 = vpop.f32.mrf.mxu0  ;;  %v1067_v12 = vadd.f32 %v3106_v60, %v1026_v31 }
 0x297   : > { %1779 = vmatmul.msk.f32.gmra.mxu2 %vm519_vm0, %v3704_v10 }
 0x299   : > { %v1081_v38 = vpop.f32.mrf.mxu1 }
 0x29b   : > { %v987_v43 = vpop.f32.mrf.mxu3 }
 0x29c   : > { %v1029_v20 = vadd.f32 %v1028_v5, %v987_v43 }
 0x29e   : > { %v1207_v44 = vpop.f32.mrf.mxu0  ;;  %v1070_v52 = vadd.f32 %v1069_v62, %v1029_v20  ;;  %v1913_v20 = vld [vmem:[#allocation2 + $0x30] sm:$0xff] }
 0x29f   : > { %1780 = vmatmul.msk.f32.gmra.mxu2 %vm519_vm0, %v3709_v33 }
 0x2a1   : > { %v1248_v10 = vpop.f32.mrf.mxu1 }
 0x2a3   : > { %v990_v11 = vpop.f32.mrf.mxu3 }
 0x2a4   : > { %v1032_v33 = vadd.f32 %v1031_v13, %v990_v11 }
 0x2a6   : > { %v3134_v29 = vpop.f32.mrf.mxu0 }
 0x2a7   : > { %1781 = vmatmul.msk.f32.gmra.mxu2 %vm519_vm0, %v3711_v45  ;;  %v1073_v45 = vadd.f32 %v1072_v35, %v1032_v33  ;;  %v1912_v33 = vld [vmem:[#allocation2 + $0x28] sm:$0xff] }
 0x2a9   : > { %v3138_v41 = vpop.f32.mrf.mxu1 }
 0x2ab   : > { %v993_v40 = vpop.f32.mrf.mxu3 }
 0x2ac   : > { %v1035_v6 = vadd.f32 %v1034_v30, %v993_v40 }
 0x2ae   : > { %v1076_v24 = vadd.f32 %v1075_v46, %v1035_v6  ;;  %v1213_v51 = vpop.f32.mrf.mxu0 }
 0x2af   : > { %1782 = vmatmul.msk.f32.gmra.mxu2 %vm519_vm0, %v3713_v47 }
 0x2b1   : > { %v1254_v3 = vpop.f32.mrf.mxu1 }
 0x2b3   : > { %v996_v42 = vpop.f32.mrf.mxu3 }
 0x2b4   : > { %v1038_v26 = vadd.f32 %v1037_v49, %v996_v42 }
 0x2b6   : > { %v1079_v19 = vadd.f32 %v1078_v59, %v1038_v26  ;;  %v1216_v1 = vpop.f32.mrf.mxu0 }
 0x2b7   : > { %1783 = vmatmul.msk.f32.gmra.mxu2 %vm519_vm0, %v3715_v55 }
 0x2b9   : > { %v1257_v48 = vpop.f32.mrf.mxu1 }
 0x2bb   : > { %v999_v23 = vpop.f32.mrf.mxu3 }
 0x2bc   : > { %v1041_v39 = vadd.f32 %v1040_v50, %v999_v23 }
 0x2be   : > { %v1082_v27 = vadd.f32 %v1081_v38, %v1041_v39  ;;  %v1219_v22 = vpop.f32.mrf.mxu0 }
 0x2bf   : > { %1784 = vmatmul.msk.f32.gmra.mxu2 %vm519_vm0, %v3716_v34 }
 0x2c0   : > { %1092 = vmatpush.msrb.mxu2 %v1082_v27  ;;  %v1911_v27 = vld [vmem:[#allocation2 + $0x20] sm:$0xff] }
 0x2c1   : > { %v1260_v14 = vpop.f32.mrf.mxu1 }
 0x2c2   : > { %1093 = vmatpush.msrb.mxu2 %v1079_v19 }
 0x2c3   : > { %v1166_v0 = vpop.f32.mrf.mxu3 }
 0x2c4   : > { %v1208_v9 = vadd.f32 %v1207_v44, %v1166_v0  ;;  %1094 = vmatpush.msrb.mxu2 %v1076_v24  ;;  %v1914_v0 = vld [vmem:[#allocation2 + $0x38] sm:$0xff] }
 0x2c6   : > { %v3142_v32 = vadd.f32 %v1248_v10, %v1208_v9  ;;  %1095 = vmatpush.msrb.mxu2 %v1073_v45  ;;  %v1222_v63 = vpop.f32.mrf.mxu0  ;;  %v3718_v9 = vld [vmem:[#allocation31_spill] sm:$0xff] }
 0x2c7   : > { %1785 = vmatmul.msk.f32.gmra.mxu2 %vm519_vm0, %v3717_v21  ;;  %v1313_v58 = vmul.f32 %v3718_v9, %v3718_v9 }
 0x2c8   : > { %1096 = vmatpush.msrb.mxu2 %v1070_v52 }
 0x2c9   : > { %v1263_v25 = vpop.f32.mrf.mxu1 }
 0x2ca   : > { %1097 = vmatpush.msrb.mxu2 %v1067_v12 }
 0x2cb   : > { %v1169_v36 = vpop.f32.mrf.mxu3 }
 0x2cc   : > { %1098 = vmatpush.msrb.mxu2 %v1064_v37  ;;  %v1211_v44 = vadd.f32 %v3134_v29, %v1169_v36 }
 0x2ce   : > { %1099 = vmatpush.msrb.mxu2 %v1061_v28  ;;  %v1225_v28 = vpop.f32.mrf.mxu0 }
 0x2cf   : > { %1786 = vmatmul.msk.f32.vlgmr.msrb.gmra.mxu2 %vm519_vm0, %v1907_v16 }
 0x2d1   : > { %v1266_v61 = vpop.f32.mrf.mxu1 }
 0x2d2   : > { %v3149_v54 = vpop.f32.mrf.mxu2 }
 0x2d3   : > { %v1172_v17 = vpop.f32.mrf.mxu3  ;;  %v1321_v45 = vmul.f32 %v3149_v54, %v3149_v54 }
 0x2d5   : > { %v1401_v12 = vadd.f32 %v1321_v45, %v1313_v58 }
 0x2d6   : > { %v1228_v13 = vpop.f32.mrf.mxu0 }
 0x2d7   : > { %1787 = vmatmul.msk.f32.gmra.mxu2 %vm519_vm0, %v1908_v18  ;;  %v1409_v37 = vadd.f32 0.0001, %v1401_v12 }
 0x2d9   : > { %v1269_v30 = vpop.f32.mrf.mxu1 }
 0x2da   : > { %v3152_v60 = vpop.f32.mrf.mxu2 }
 0x2db   : > { %v1175_v5 = vpop.f32.mrf.mxu3 }
 0x2dc   : > { %v1217_v50 = vadd.f32 %v1216_v1, %v1175_v5  ;;  %v3719_v1 = vld [vmem:[#allocation26_spill] sm:$0xff] }
 0x2de   : > { %v1258_v10 = vadd.f32 %v1257_v48, %v1217_v50 }
 0x2df   : > { %1788 = vmatmul.msk.f32.gmra.mxu2 %vm519_vm0, %v1909_v15 }
 0x2e2   : > { %v3155_v53 = vpop.f32.mrf.mxu2 }
 0x2e3   : > { %v1178_v62 = vpop.f32.mrf.mxu3 }
 0x2e7   : > { %1789 = vmatmul.msk.f32.gmra.mxu2 %vm519_vm0, %v1910_v8 }
 0x2ea   : > { %v3158_v7 = vpop.f32.mrf.mxu2 }
 0x2eb   : > { %v1181_v4 = vpop.f32.mrf.mxu3 }
 0x2ec   : > { %v1223_v49 = vadd.f32 %v1222_v63, %v1181_v4 }
 0x2ee   : > { %v1264_v40 = vadd.f32 %v1263_v25, %v1223_v49  ;;  %v3720_v25 = vld [vmem:[#allocation33_spill] sm:$0xff]  ;;  %v1324_v49 = vmul.f32 %v3158_v7, %v3158_v7 }
 0x2ef   : > { %1790 = vmatmul.msk.f32.gmra.mxu2 %vm519_vm0, %v3713_v47  ;;  %v1220_v47 = vadd.f32 %v1219_v22, %v1178_v62  ;;  %v1315_v4 = vmul.f32 %v3720_v25, %v3720_v25 }
 0x2f1   : > { %v1261_v42 = vadd.f32 %v1260_v14, %v1220_v47 }
 0x2f2   : > { %v3162_v2 = vpop.f32.mrf.mxu2 }
 0x2f3   : > { %v1184_v56 = vpop.f32.mrf.mxu3 }
 0x2f4   : > { %v1226_v46 = vadd.f32 %v1225_v28, %v1184_v56 }
 0x2f6   : > { %v1267_v11 = vadd.f32 %v1266_v61, %v1226_v46 }
 0x2f7   : > { %1791 = vmatmul.msk.f32.gmra.mxu2 %vm519_vm0, %v3715_v55  ;;  %v1214_v55 = vadd.f32 %v1213_v51, %v1172_v17  ;;  %v1314_v17 = vmul.f32 %v3719_v1, %v3719_v1 }
 0x2f9   : > { %v1255_v23 = vadd.f32 %v1254_v3, %v1214_v55 }
 0x2fa   : > { %v3166_v35 = vpop.f32.mrf.mxu2 }
 0x2fb   : > { %v1187_v57 = vpop.f32.mrf.mxu3 }
 0x2fc   : > { %v1229_v43 = vadd.f32 %v1228_v13, %v1187_v57 }
 0x2fe   : > { %v1270_v59 = vadd.f32 %v1269_v30, %v1229_v43 }
 0x2ff   : > { %1792 = vmatmul.msk.f32.gmra.mxu2 %vm519_vm0, %v3716_v34  ;;  %v1252_v34 = vadd.f32 %v3138_v41, %v1211_v44 }
 0x300   : > { %1280 = vmatpush.msra.mxu2 %v1270_v59  ;;  %v3721_v59 = vld [vmem:[#allocation28_spill] sm:$0xff] }
 0x301   : > { %v1316_v47 = vmul.f32 %v3721_v59, %v3721_v59 }
 0x302   : > { %v3170_v38 = vpop.f32.mrf.mxu2  ;;  %1281 = vmatpush.msra.mxu2 %v1267_v11 }
 0x304   : > { %1282 = vmatpush.msra.mxu2 %v1264_v40 }
 0x306   : > { %1283 = vmatpush.msra.mxu2 %v1261_v42  ;;  %v1404_v42 = vadd.f32 %v1324_v49, %v1316_v47 }
 0x307   : > { %1793 = vmatmul.msk.f32.gmra.mxu2 %vm519_vm0, %v3717_v21 }
 0x308   : > { %1284 = vmatpush.msra.mxu2 %v1258_v10  ;;  %v1412_v10 = vadd.f32 0.0001, %v1404_v42 }
 0x30a   : > { %v3176_v26 = vpop.f32.mrf.mxu2  ;;  %1285 = vmatpush.msra.mxu2 %v1255_v23 }
 0x30c   : > { %1286 = vmatpush.msra.mxu2 %v1252_v34  ;;  %v1325_v34 = vmul.f32 %v3162_v2, %v3162_v2 }
 0x30e   : > { %1287 = vmatpush.msra.mxu2 %v3142_v32 }
 0x30f   : > { %1794 = vmatmul.msk.f32.vlgmr.msra.gmra.mxu2 %vm519_vm0, %v1907_v16  ;;  %v1322_v16 = vmul.f32 %v3152_v60, %v3152_v60 }
 0x311   : > { %v1402_v14 = vadd.f32 %v1322_v16, %v1314_v17 }
 0x312   : > { %v913_v39 = vpop.f32.mrf.mxu2 }
 0x313   : > { %v1337_v32 = vsub.f32 %v913_v39, %v1313_v58  ;;  %v1410_v62 = vadd.f32 0.0001, %v1402_v14  ;;  %v3722_v39 = vld [vmem:[#allocation35_spill] sm:$0xff] }
 0x317   : > { %1795 = vmatmul.msk.f32.gmra.mxu2 %vm519_vm0, %v1908_v18 }
 0x31a   : > { %v916_v29 = vpop.f32.mrf.mxu2 }
 0x31b   : > { %v1338_v5 = vsub.f32 %v916_v29, %v1314_v17  ;;  %v1317_v29 = vmul.f32 %v3722_v39, %v3722_v39 }
 0x31f   : > { %1796 = vmatmul.msk.f32.gmra.mxu2 %vm519_vm0, %v1909_v15 }
 0x322   : > { %v919_v6 = vpop.f32.mrf.mxu2 }
 0x323   : > { %v1339_v56 = vsub.f32 %v919_v6, %v1315_v4 }
 0x327   : > { %1797 = vmatmul.msk.f32.gmra.mxu2 %vm519_vm0, %v1910_v8  ;;  %v1323_v8 = vmul.f32 %v3155_v53, %v3155_v53 }
 0x329   : > { %v1403_v57 = vadd.f32 %v1323_v8, %v1315_v4 }
 0x32a   : > { %v922_v21 = vpop.f32.mrf.mxu2 }
 0x32b   : > { %v1411_v46 = vadd.f32 0.0001, %v1403_v57  ;;  %v1340_v40 = vsub.f32 %v922_v21, %v1316_v47  ;;  %v1328_v57 = vmul.f32 %v3176_v26, %v3176_v26 }
 0x32f   : > { %1798 = vmatmul.msk.f32.gmra.mxu2 %vm519_vm0, %v1911_v27 }
 0x332   : > { %v925_v41 = vpop.f32.mrf.mxu2 }
 0x337   : > { %1799 = vmatmul.msk.f32.gmra.mxu2 %vm519_vm0, %v1912_v33  ;;  %v1341_v33 = vsub.f32 %v925_v41, %v1317_v29 }
 0x33a   : > { %v3185_v19 = vpop.f32.mrf.mxu2 }
 0x33f   : > { %1800 = vmatmul.msk.f32.gmra.mxu2 %vm519_vm0, %v1913_v20 }
 0x342   : > { %v3188_v24 = vpop.f32.mrf.mxu2 }
 0x347   : > { %1801 = vmatmul.msk.f32.gmra.mxu2 %vm519_vm0, %v1914_v0  ;;  %v1405_v0 = vadd.f32 %v1325_v34, %v1317_v29 }
 0x349   : > { %v1413_v58 = vadd.f32 0.0001, %v1405_v0  ;;  %v1561_v0 = vlaneseq }
 0x34a   : > { %v3191_v31 = vpop.f32.mrf.mxu2 }
 0x352   : > { %v1101_v52 = vpop.f32.mrf.mxu2 }
 0x353   : > { %v1345_v51 = vsub.f32 %v1101_v52, %v1321_v45  ;;  %v1326_v52 = vmul.f32 %v3166_v35, %v3166_v35 }
 0x355   : > { %v1417_v3 = vadd.f32 %v1345_v51, %v1337_v32  ;;  %v3723_v32 = vld [vmem:[#allocation30_spill] sm:$0xff] }
 0x356   : > { %v1318_v51 = vmul.f32 %v3723_v32, %v3723_v32 }
 0x357   : > { %v1425_v36 = vadd.f32 0.0009, %v1417_v3 }
 0x359   : > { %v3201_v48 = vmul.f32 %v1425_v36, %v1409_v37  ;;  %v1342_v37 = vsub.f32 %v3185_v19, %v1318_v51 }
 0x35a   : > { %v1104_v18 = vpop.f32.mrf.mxu2 }
 0x35b   : > { %v1346_v22 = vsub.f32 %v1104_v18, %v1322_v16  ;;  %v1406_v16 = vadd.f32 %v1326_v52, %v1318_v51  ;;  %1887 = vrcp.f32 %v3201_v48  ;;  %v1452_v51 = vand.u32 2147483648, %v3201_v48 }
 0x35c   : > { %vm1446_vm2 = vweird.f32 %v3201_v48 }
 0x35d   : > { %v1418_v15 = vadd.f32 %v1346_v22, %v1338_v5  ;;  %v1414_v41 = vadd.f32 0.0001, %v1406_v16  ;;  %v1327_v5 = vmul.f32 %v3170_v38, %v3170_v38  ;;  %v3724_v22 = vld [vmem:[#allocation38_spill] sm:$0xff] }
 0x35e   : > { %v1319_v14 = vmul.f32 %v3724_v22, %v3724_v22 }
 0x35f   : > { %v1426_v63 = vadd.f32 0.0009, %v1418_v15 }
 0x360   : > { %v1407_v19 = vadd.f32 %v1327_v5, %v1319_v14 }
 0x361   : > { %v3207_v28 = vmul.f32 %v1426_v63, %v1410_v62  ;;  %v1343_v63 = vsub.f32 %v3188_v24, %v1319_v14  ;;  %v1888_v4 = vpop.eup %1887 }
 0x362   : > { %v1107_v61 = vpop.f32.mrf.mxu2  ;;  %vm1447_vm1 = vweird.f32 %v1888_v4 }
 0x363   : > { %v1347_v13 = vsub.f32 %v1107_v61, %v1323_v8  ;;  %1889 = vrcp.f32 %v3207_v28  ;;  %vm1448_vm3 = vmor %vm1446_vm2, %vm1447_vm1  ;;  %vm1461_vm7 = vweird.f32 %v3207_v28 }
 0x365   : > { %v1419_v30 = vadd.f32 %v1347_v13, %v1339_v56  ;;  %v1415_v56 = vadd.f32 0.0001, %v1407_v19 }
 0x367   : > { %v1427_v43 = vadd.f32 0.0009, %v1419_v30  ;;  %v1442_v30 = vmul.f32 %v1888_v4, %v3201_v48 }
 0x369   : > { %v3213_v11 = vmul.f32 %v1427_v43, %v1411_v46  ;;  %v3725_v46 = vld [vmem:[#allocation32_spill] sm:$0xff]  ;;  %v3245_v42 = vpop.eup %1889 }
 0x36a   : > { %v1110_v50 = vpop.f32.mrf.mxu2  ;;  %v1320_v43 = vmul.f32 %v3725_v46, %v3725_v46  ;;  %vm1462_vm6 = vweird.f32 %v3245_v42 }
 0x36b   : > { %v1348_v55 = vsub.f32 %v1110_v50, %v1324_v49  ;;  %1891 = vrcp.f32 %v3213_v11  ;;  %vm1463_vm8 = vmor %vm1461_vm7, %vm1462_vm6  ;;  %vm1476_vm11 = vweird.f32 %v3213_v11 }
 0x36c   : > { %v1344_v24 = vsub.f32 %v3191_v31, %v1320_v43 }
 0x36d   : > { %v1420_v44 = vadd.f32 %v1348_v55, %v1340_v40  ;;  %v1408_v40 = vadd.f32 %v1328_v57, %v1320_v43  ;;  %v1443_v55 = vsub.f32 1.0, %v1442_v30  ;;  %v1331_v43 = vmul.f32 %v3155_v53, %v3720_v25 }
 0x36f   : > { %v1428_v23 = vadd.f32 0.0009, %v1420_v44  ;;  %v1444_v29 = vmul.f32 %v1888_v4, %v1443_v55 }
 0x371   : > { %v3219_v6 = vmul.f32 %v1428_v23, %v1412_v10  ;;  %v1329_v10 = vmul.f32 %v3149_v54, %v3718_v9  ;;  %v1416_v23 = vadd.f32 0.0001, %v1408_v40  ;;  %v1450_v9 = vand.u32 2147483647, %v3201_v48 }
 0x372   : > { %v1113_v27 = vpop.f32.mrf.mxu2 }
 0x373   : > { %v1349_v20 = vsub.f32 %v1113_v27, %v1325_v34  ;;  %v1457_v27 = vmul.f32 %v3245_v42, %v3207_v28  ;;  %1893 = vrcp.f32 %v3219_v6  ;;  %vm1451_vm4 = vcmp.eq.f32.partialorder %v1450_v9, 8.507059e+37 }
 0x374   : > { %vm1491_vm15 = vweird.f32 %v3219_v6 }
 0x375   : > { %v1421_v45 = vadd.f32 %v1349_v20, %v1341_v33  ;;  %v1361_v20 = vmul.f32 2.0, %v1329_v10 }
 0x377   : > { %v1429_v21 = vadd.f32 0.0009, %v1421_v45 }
 0x379   : > { %v3225_v12 = vmul.f32 %v1429_v21, %v1413_v58  ;;  %v1445_v58 = vadd.f32 %v1888_v4, %v1444_v29  ;;  %v1458_v21 = vsub.f32 1.0, %v1457_v27 }
 0x37a   : > { %v1116_v3 = vpop.f32.mrf.mxu2 }
 0x37b   : > { %v1350_v36 = vsub.f32 %v1116_v3, %v1326_v52  ;;  %v3254_v52 = vpop.eup %1891  ;;  %v1369_v3 = vadd.f32 0.0001, %v1361_v20  ;;  %1895 = vrcp.f32 %v3225_v12 }
 0x37c   : > { %vm1477_vm10 = vweird.f32 %v3254_v52 }
 0x37d   : > { %v1422_v17 = vadd.f32 %v1350_v36, %v1342_v37  ;;  %v1330_v37 = vmul.f32 %v3152_v60, %v3719_v1  ;;  %v3262_v36 = vand.u32 127, %v1561_v0  ;;  %v1480_v0 = vand.u32 2147483647, %v3213_v11  ;;  %vm1478_vm12 = vmor %vm1476_vm11, %vm1477_vm10 }
 0x37f   : > { %v1430_v18 = vadd.f32 0.0009, %v1422_v17  ;;  %v1449_v17 = vsel %vm1448_vm3, %v1888_v4, %v1445_v58  ;;  %vm1563_vm5 = vcmp.lt.s32.totalorder %v3262_v36, 16  ;;  %v3270_v4 = vpop.eup %1893  ;;  %v1332_v58 = vmul.f32 %v3158_v7, %v3721_v59 }
 0x380   : > { %v1487_v40 = vmul.f32 %v3270_v4, %v3219_v6  ;;  %vm1481_vm13 = vcmp.eq.f32.partialorder %v1480_v0, 8.507059e+37  ;;  %vm1492_vm14 = vweird.f32 %v3270_v4  ;;  %vm1506_vm3 = vweird.f32 %v3225_v12 }
 0x381   : > { %v3233_v15 = vmul.f32 %v1430_v18, %v1414_v41  ;;  %v1459_v41 = vmul.f32 %v3245_v42, %v1458_v21  ;;  %v1472_v18 = vmul.f32 %v3254_v52, %v3213_v11  ;;  %v3288_v27 = vpop.eup %1895  ;;  %vm1493_vm0 = vmor %vm1491_vm15, %vm1492_vm14 }
 0x382   : > { %v1119_v62 = vpop.f32.mrf.mxu2  ;;  %v1488_v29 = vsub.f32 1.0, %v1487_v40  ;;  %v1502_v9 = vmul.f32 %v3288_v27, %v3225_v12  ;;  %vm1507_vm2 = vweird.f32 %v3288_v27 }
 0x383   : > { %v1351_v8 = vsub.f32 %v1119_v62, %v1327_v5  ;;  %v1453_v5 = vor.u32 1.1754944e-38, %v1452_v51  ;;  %v1362_v62 = vmul.f32 2.0, %v1330_v37  ;;  %v1473_v19 = vsub.f32 1.0, %v1472_v18 }
 0x384   : > { %1897 = vrcp.f32 %v3233_v15  ;;  %v1503_v18 = vsub.f32 1.0, %v1502_v9  ;;  %v1335_v9 = vmul.f32 %v3170_v38, %v3724_v22 }
 0x385   : > { %v1423_v61 = vadd.f32 %v1351_v8, %v1343_v63  ;;  %v1454_v63 = vsel %vm1451_vm4, %v1453_v5, %v1449_v17  ;;  %v1460_v8 = vadd.f32 %v3245_v42, %v1459_v41  ;;  %v1370_v30 = vadd.f32 0.0001, %v1362_v62  ;;  %vm1508_vm4 = vmor %vm1506_vm3, %vm1507_vm2 }
 0x386   : > { %v1495_v62 = vand.u32 2147483647, %v3219_v6  ;;  %vm1599_vm3 = vcmask 130112  }
 0x387   : > { %v1431_v13 = vadd.f32 0.0009, %v1423_v61  ;;  %v1467_v61 = vand.u32 2147483648, %v3207_v28 }
 0x388   : > { %vm1496_vm1 = vcmp.eq.f32.partialorder %v1495_v62, 8.507059e+37 }
 0x389   : > { %v3242_v49 = vmul.f32 %v1431_v13, %v1415_v56  ;;  %v1468_v55 = vor.u32 1.1754944e-38, %v1467_v61 }
 0x38a   : > { %v1122_v47 = vpop.f32.mrf.mxu2  ;;  %v3306_v5 = vpop.eup %1897 }
 0x38b   : > { %v1352_v50 = vsub.f32 %v1122_v47, %v1328_v57  ;;  %v1465_v57 = vand.u32 2147483647, %v3207_v28  ;;  %1899 = vrcp.f32 %v3242_v49  ;;  %v1517_v61 = vmul.f32 %v3306_v5, %v3233_v15 }
 0x38c   : > { %vm1522_vm7 = vweird.f32 %v3306_v5  ;;  %v1540_v62 = vand.u32 2147483647, %v3242_v49 }
 0x38d   : > { %v1424_v44 = vadd.f32 %v1352_v50, %v1344_v24  ;;  %v1464_v24 = vsel %vm1463_vm8, %v3245_v42, %v1460_v8  ;;  %v1474_v50 = vmul.f32 %v3254_v52, %v1473_v19  ;;  %vm1466_vm9 = vcmp.eq.f32.partialorder %v1465_v57, 8.507059e+37 }
 0x38e   : > { %v1482_v42 = vand.u32 2147483648, %v3213_v11  ;;  %v1504_v19 = vmul.f32 %v3288_v27, %v1503_v18  ;;  %vm1521_vm8 = vweird.f32 %v3233_v15  ;;  %vm1541_vm14 = vcmp.eq.f32.partialorder %v1540_v62, 8.507059e+37 }
 0x38f   : > { %v1432_v34 = vadd.f32 0.0009, %v1424_v44 }
 0x391   : > { %v3252_v33 = vmul.f32 %v1432_v34, %v1416_v23  ;;  %v1469_v23 = vsel %vm1466_vm9, %v1468_v55, %v1464_v24  ;;  %v1475_v34 = vadd.f32 %v3254_v52, %v1474_v50  ;;  %v3324_v24 = vpop.eup %1899  ;;  %v1510_v55 = vand.u32 2147483647, %v3225_v12  ;;  %vm1523_vm9 = vmor %vm1521_vm8, %vm1522_vm7 }
 0x392   : > { %v1289_v31 = vpop.f32.mrf.mxu2  ;;  %vm1537_vm11 = vweird.f32 %v3324_v24  ;;  %vm1617_vm7 = vcmask 125952  }
 0x393   : > { %v1353_v45 = vsub.f32 %v1289_v31, %v1329_v10  ;;  %v1363_v10 = vmul.f32 2.0, %v1331_v43  ;;  %v1479_v51 = vsel %vm1478_vm12, %v3254_v52, %v1475_v34  ;;  %v1497_v52 = vand.u32 2147483648, %v3219_v6 }
 0x394   : > { %1901 = vrcp.f32 %v3252_v33  ;;  %vm1511_vm6 = vcmp.eq.f32.partialorder %v1510_v55, 8.507059e+37  ;;  %vm1536_vm12 = vweird.f32 %v3242_v49 }
 0x395   : > { %v1377_v54 = vmul.f32 2.0, %v1353_v45  ;;  %v1371_v45 = vadd.f32 0.0001, %v1363_v10 }
 0x397   : > { %v1385_v16 = vadd.f32 0.0009, %v1377_v54  ;;  %v1489_v54 = vmul.f32 %v3270_v4, %v1488_v29 }
 0x399   : > { %v1393_v14 = vmul.f32 %v1385_v16, %v1369_v3  ;;  %v1483_v3 = vor.u32 1.1754944e-38, %v1482_v42  ;;  %v1364_v16 = vmul.f32 2.0, %v1332_v58  ;;  %v1490_v41 = vadd.f32 %v3270_v4, %v1489_v54 }
 0x39a   : > { %v1292_v48 = vpop.f32.mrf.mxu2 }
 0x39b   : > { %v1354_v60 = vsub.f32 %v1292_v48, %v1330_v37  ;;  %v1455_v1 = vmul.f32 %v1454_v63, %v1393_v14  ;;  %v1484_v17 = vsel %vm1481_vm13, %v1483_v3, %v1479_v51  ;;  %v1372_v63 = vadd.f32 0.0001, %v1364_v16  ;;  %vm1538_vm13 = vmor %vm1536_vm12, %vm1537_vm11 }
 0x39c   : > { %v1494_v8 = vsel %vm1493_vm0, %v3270_v4, %v1490_v41  ;;  %v1512_v4 = vand.u32 2147483648, %v3225_v12  ;;  %v1525_v51 = vand.u32 2147483647, %v3233_v15  ;;  %v1367_v41 = vmul.f32 2.0, %v1335_v9 }
 0x39d   : > { %v1378_v56 = vmul.f32 2.0, %v1354_v60  ;;  %v1564_v13 = vsel %vm1563_vm5, %v1455_v1, 0.0  ;;  %v1333_v60 = vmul.f32 %v3162_v2, %v3722_v39  ;;  %vm1551_vm0 = vweird.f32 %v3252_v33 }
 0x39e   : > { %1572 = vadd.xlane.f32.xlu0 %v1564_v13  ;;  %v1513_v34 = vor.u32 1.1754944e-38, %v1512_v4  ;;  %vm1526_vm10 = vcmp.eq.f32.partialorder %v1525_v51, 8.507059e+37 }
 0x39f   : > { %v1386_v47 = vadd.f32 0.0009, %v1378_v56  ;;  %v1498_v56 = vor.u32 1.1754944e-38, %v1497_v52  ;;  %v1365_v57 = vmul.f32 2.0, %v1333_v60 }
 0x3a1   : > { %v1394_v28 = vmul.f32 %v1386_v47, %v1370_v30  ;;  %v1499_v30 = vsel %vm1496_vm1, %v1498_v56, %v1494_v8  ;;  %v1518_v47 = vsub.f32 1.0, %v1517_v61 }
 0x3a2   : > { %v1295_v44 = vpop.f32.mrf.mxu2 }
 0x3a3   : > { %v1355_v53 = vsub.f32 %v1295_v44, %v1331_v43  ;;  %v1470_v25 = vmul.f32 %v1469_v23, %v1394_v28  ;;  %v1505_v43 = vadd.f32 %v3288_v27, %v1504_v19  ;;  %v1373_v28 = vadd.f32 0.0001, %v1365_v57 }
 0x3a4   : > { %v1334_v44 = vmul.f32 %v3166_v35, %v3723_v32 }
 0x3a5   : > { %v1379_v31 = vmul.f32 2.0, %v1355_v53  ;;  %v1565_v20 = vsel %vm1563_vm5, %v1470_v25, 0.0  ;;  %v1509_v23 = vsel %vm1508_vm4, %v3288_v27, %v1505_v43  ;;  %v1519_v53 = vmul.f32 %v3306_v5, %v1518_v47 }
 0x3a6   : > { %1574 = vadd.xlane.f32.xlu0 %v1565_v20  ;;  %v1532_v25 = vmul.f32 %v3324_v24, %v3242_v49  ;;  %v1366_v42 = vmul.f32 2.0, %v1334_v44  ;;  %v1527_v27 = vand.u32 2147483648, %v3233_v15  ;;  %vm1612_vm4 = vcmask 1042434  }
 0x3a7   : > { %v1387_v21 = vadd.f32 0.0009, %v1379_v31  ;;  %v1514_v31 = vsel %vm1511_vm6, %v1513_v34, %v1509_v23  ;;  %v1520_v20 = vadd.f32 %v3306_v5, %v1519_v53  ;;  %vm1614_vm6 = vcmask 1043459  }
 0x3a8   : > { %v1533_v0 = vsub.f32 1.0, %v1532_v25  ;;  %v1374_v54 = vadd.f32 0.0001, %v1366_v42 }
 0x3a9   : > { %v1395_v11 = vmul.f32 %v1387_v21, %v1371_v45  ;;  %v1902_v45 = vpop.eup %1901 }
 0x3aa   : > { %v1298_v37 = vpop.f32.mrf.mxu2  ;;  %v1547_v16 = vmul.f32 %v1902_v45, %v3252_v33  ;;  %vm1552_vm15 = vweird.f32 %v1902_v45 }
 0x3ab   : > { %v1356_v7 = vsub.f32 %v1298_v37, %v1332_v58  ;;  %v1485_v59 = vmul.f32 %v1484_v17, %v1395_v11  ;;  %v1524_v11 = vsel %vm1523_vm9, %v3306_v5, %v1520_v20  ;;  %v1534_v37 = vmul.f32 %v3324_v24, %v1533_v0  ;;  %vm1553_vm1 = vmor %vm1551_vm0, %vm1552_vm15 }
 0x3ac   : > { %v1528_v17 = vor.u32 1.1754944e-38, %v1527_v27  ;;  %v1548_v22 = vsub.f32 1.0, %v1547_v16 }
 0x3ad   : > { %v1380_v14 = vmul.f32 2.0, %v1356_v7  ;;  %v1566_v48 = vsel %vm1563_vm5, %v1485_v59, 0.0  ;;  %v1535_v38 = vadd.f32 %v3324_v24, %v1534_v37 }
 0x3ae   : > { %1576 = vadd.xlane.f32.xlu1 %v1566_v48  ;;  %v1529_v18 = vsel %vm1526_vm10, %v1528_v17, %v1524_v11  ;;  %v1549_v19 = vmul.f32 %v1902_v45, %v1548_v22 }
 0x3af   : > { %v1388_v1 = vadd.f32 0.0009, %v1380_v14  ;;  %v1542_v14 = vand.u32 2147483648, %v3242_v49  ;;  %v1539_v8 = vsel %vm1538_vm13, %v3324_v24, %v1535_v38  ;;  %v1557_v49 = vand.u32 2147483648, %v3252_v33 }
 0x3b1   : > { %v1396_v6 = vmul.f32 %v1388_v1, %v1372_v63  ;;  %v1336_v63 = vmul.f32 %v3176_v26, %v3725_v46  ;;  %v1543_v61 = vor.u32 1.1754944e-38, %v1542_v14  ;;  %v1555_v46 = vand.u32 2147483647, %v3252_v33 }
 0x3b2   : > { %v1301_v13 = vpop.f32.mrf.mxu2  ;;  %v1597_v33 = vadd.s32 4294967288, %v3262_v36 }
 0x3b3   : > { %v1357_v2 = vsub.f32 %v1301_v13, %v1333_v60  ;;  %v1500_v39 = vmul.f32 %v1499_v30, %v1396_v6  ;;  %v1375_v60 = vadd.f32 0.0001, %v1367_v41  ;;  %v1368_v13 = vmul.f32 2.0, %v1336_v63 }
 0x3b4   : > { %v1544_v57 = vsel %vm1541_vm14, %v1543_v61, %v1539_v8  ;;  %vm1556_vm2 = vcmp.eq.f32.partialorder %v1555_v46, 8.507059e+37 }
 0x3b5   : > { %v1381_v50 = vmul.f32 2.0, %v1357_v2  ;;  %v1567_v40 = vsel %vm1563_vm5, %v1500_v39, 0.0  ;;  %v1550_v39 = vadd.f32 %v1902_v45, %v1549_v19  ;;  %v1376_v47 = vadd.f32 0.0001, %v1368_v13 }
 0x3b6   : > { %1578 = vadd.xlane.f32.xlu1 %v1567_v40 }
 0x3b7   : > { %v1389_v10 = vadd.f32 0.0009, %v1381_v50  ;;  %v1554_v4 = vsel %vm1553_vm1, %v1902_v45, %v1550_v39  ;;  %v1558_v50 = vor.u32 1.1754944e-38, %v1557_v49 }
 0x3b9   : > { %v1397_v12 = vmul.f32 %v1389_v10, %v1373_v28  ;;  %v1559_v55 = vsel %vm1556_vm2, %v1558_v50, %v1554_v4 }
 0x3ba   : > { %v1304_v29 = vpop.f32.mrf.mxu2 }
 0x3bb   : > { %v1358_v35 = vsub.f32 %v1304_v29, %v1334_v44  ;;  %v1515_v32 = vmul.f32 %v1514_v31, %v1397_v12 }
 0x3bd   : > { %v1382_v58 = vmul.f32 2.0, %v1358_v35  ;;  %v1568_v21 = vsel %vm1563_vm5, %v1515_v32, 0.0 }
 0x3be   : > { %1580 = vadd.xlane.f32.xlu2 %v1568_v21 }
 0x3bf   : > { %v1390_v3 = vadd.f32 0.0009, %v1382_v58 }
 0x3c1   : > { %v1398_v7 = vmul.f32 %v1390_v3, %v1374_v54 }
 0x3c2   : > { %v1307_v59 = vpop.f32.mrf.mxu2 }
 0x3c3   : > { %v1359_v15 = vsub.f32 %v1307_v59, %v1335_v9  ;;  %v1530_v52 = vmul.f32 %v1529_v18, %v1398_v7 }
 0x3c5   : > { %v1383_v5 = vmul.f32 2.0, %v1359_v15  ;;  %v1569_v48 = vsel %vm1563_vm5, %v1530_v52, 0.0 }
 0x3c6   : > { %1582 = vadd.xlane.f32.xlu2 %v1569_v48 }
 0x3c7   : > { %v1391_v1 = vadd.f32 0.0009, %v1383_v5 }
 0x3c9   : > { %v1399_v56 = vmul.f32 %v1391_v1, %v1375_v60 }
 0x3ca   : > { %v1310_v6 = vpop.f32.mrf.mxu2 }
 0x3cb   : > { %v1360_v30 = vsub.f32 %v1310_v6, %v1336_v63  ;;  %v1545_v2 = vmul.f32 %v1544_v57, %v1399_v56 }
 0x3cd   : > { %v1384_v43 = vmul.f32 2.0, %v1360_v30  ;;  %v1570_v26 = vsel %vm1563_vm5, %v1545_v2, 0.0 }
 0x3ce   : > { %1584 = vadd.xlane.f32.xlu0 %v1570_v26 }
 0x3cf   : > { %v1392_v24 = vadd.f32 0.0009, %v1384_v43 }
 0x3d1   : > { %v1400_v40 = vmul.f32 %v1392_v24, %v1376_v47 }
 0x3d3   : > { %v1560_v28 = vmul.f32 %v1559_v55, %v1400_v40 }
 0x3d5   : > { %v1571_v44 = vsel %vm1563_vm5, %v1560_v28, 0.0  ;;  %vm1610_vm5 = vcmask 1041409  }
 0x3d6   : > { %1586 = vadd.xlane.f32.xlu1 %v1571_v44 }
 0x411   : > { %v1573_v10 = vpop.xlane.xlu0 %1572 }
 0x412   : > { %v1596_v0 = vperm.slane %v1573_v10, %v3262_v36 }
 0x419   : > { %v1575_v25 = vpop.xlane.xlu0 %1574 }
 0x41a   : > { %v1598_v31 = vperm.slane %v1575_v25, %v1597_v33 }
 0x41c   : > { %v1600_v21 = vsel %vm1599_vm3, %v1598_v31, %v1596_v0 }
 0x421   : > { %v1577_v23 = vpop.xlane.xlu1 %1576 }
 0x422   : > { %v1601_v35 = vperm.slane %v1577_v23, %v3262_v36 }
 0x429   : > { %v1579_v34 = vpop.xlane.xlu1 %1578 }
 0x42a   : > { %v1602_v29 = vperm.slane %v1579_v34, %v1597_v33 }
 0x42c   : > { %v1603_v45 = vsel %vm1599_vm3, %v1602_v29, %v1601_v35 }
 0x42d   : > { %v1611_v9 = vsel %vm1610_vm5, %v1603_v45, %v1600_v21 }
 0x431   : > { %v1581_v53 = vpop.xlane.xlu2 %1580 }
 0x432   : > { %v1604_v32 = vperm.slane %v1581_v53, %v3262_v36 }
 0x439   : > { %v1583_v12 = vpop.xlane.xlu2 %1582 }
 0x43a   : > { %v1605_v42 = vperm.slane %v1583_v12, %v1597_v33 }
 0x43c   : > { %v1606_v27 = vsel %vm1599_vm3, %v1605_v42, %v1604_v32 }
 0x43d   : > { %v1613_v11 = vsel %vm1612_vm4, %v1606_v27, %v1611_v9 }
 0x441   : > { %v1585_v20 = vpop.xlane.xlu0 %1584 }
 0x442   : > { %v1607_v51 = vperm.slane %v1585_v20, %v3262_v36 }
 0x449   : > { %v1587_v58 = vpop.xlane.xlu1 %1586 }
 0x44a   : > { %v1608_v54 = vperm.slane %v1587_v58, %v1597_v33 }
 0x44c   : > { %v1609_v3 = vsel %vm1599_vm3, %v1608_v54, %v1607_v51 }
 0x44d   : > { %v1615_v37 = vsel %vm1614_vm6, %v1609_v3, %v1613_v11 }
 0x44e   : > { %v1618_v16 = vsel %vm1617_vm7, %v1615_v37, 0.0 }
 0x44f   : > { %1619 = vadd.xlane.f32.xlu2 %v1618_v16 }
 0x4c2   : > { %v1620_v36 = vpop.xlane.xlu2 %1619 }
 0x4c3   : > { %1621 = vst [vmem:[%s289_s0] sm:$0xf] %v1620_v36 }
 0x4c4   : > { %2062 = shalt.err (!%p2059_p0)
}
 0x4c5   : > { %1823 = dma.vmem_to_hbm [thread:$0]  (%p2218_p7), %s1636_s24, 64, %s1638_s25, %s1623_s27  }
 0x4c6 PF: > { %s1649_s23 = sand.u32 1, %s2097_s15   ;;  %p3726_p3 = scmp.ge.s32.totalorder %s2109_s18, 2 }
 0x4c7   : > { %s1650_s2 = scalar_lea.sflag [#allocation4], %s1649_s23 }
 0x4c8   : > { %p1840_p12 = pnand %p3726_p3, %p2177_p6 }
 0x4ca   : > { %p1841_p5 = pneg %p1840_p12 }
 0x4cc   : > { %2092 = dma.done.wait (%p1841_p5), %s1650_s2, 64  }
 0x4cd   : > { %2094 = vsyncadd (%p1841_p5), %s1650_s2, 4294967232  ;;  %s3727_s1 = sld [smem:[#allocation14_spill]]  ;;  %p16_p1 = scmp.ge.s32.totalorder %s2199_s30, 4  }
 0x4ce   : > { %s3728_s17 = sld [smem:[#allocation15_spill]]  ;;  %s3729_s15 = smov %s2101_s16 }
 0x4cf   : > { %s3731_s18 = smov %s2199_s30  ;;  %18 = sbr.rel (!%p16_p1) target bundleno = 9 (0x9), region = 99 }
 0x4d3   : > { %s3730_s16 = smov %s3727_s1 }
 0x4d4   :  { %1656 = vsyncpa [#allocation3], 1 }
 0x4d5   :  { %1658 = vsyncpa [#allocation3 + $0x1], 1 }
 0x4d6   :  { %1659 = vsyncpa [#allocation6], 1 }
 0x4d7   :  { %1660 = vsyncpa [#allocation4], 1 }
 0x4d8   :  { %1662 = vsyncpa [#allocation4 + $0x1], 1 }

</bundles_post_ra>
